<compile_context>
chip_gen: v5e
topology: v5e:2x2
jax: 0.10.0
libtpu: 0.0.40
codegen_flags: <defaults>
</compile_context>

<pallas_src>
import functools
import math

import numpy as np
import jax
import jax.numpy as jnp
from jax.experimental import pallas as pl
from jax.experimental.pallas import tpu as pltpu

# ----------------------------- small SAM config ------------------------------
IMG_SIZE = 32          # image_encoder.img_size
PATCH = 8
VIT_DIM = 32
VIT_DEPTH = 2
VIT_HEADS = 2
MLP_RATIO = 4
PROMPT_DIM = 32        # neck out_chans == prompt_embed_dim == transformer_dim
EMB_HW = IMG_SIZE // PATCH      # image embedding spatial size (4)
DEC_HEADS = 2
DEC_MLP = 64
DEC_DEPTH = 2
DOWNSAMPLE = 2
NUM_MULTIMASK = 3
NUM_MASK_TOKENS = NUM_MULTIMASK + 1
IOU_HIDDEN = 32
MASK_THRESHOLD = 0.0
PIXEL_MEAN = jnp.array([123.675, 116.28, 103.53], jnp.float32)
PIXEL_STD = jnp.array([58.395, 57.12, 57.375], jnp.float32)


# ----------------------------- in-kernel math helpers -------------------------
def _erf(x):
    # Abramowitz & Stegun 7.1.26 rational approximation (max abs err ~1.5e-7).
    a1, a2, a3, a4, a5 = 0.254829592, -0.284496736, 1.421413741, -1.453152027, 1.061405429
    pc = 0.3275911
    sgn = jnp.where(x >= 0.0, 1.0, -1.0)
    ax = jnp.abs(x)
    t = 1.0 / (1.0 + pc * ax)
    poly = ((((a5 * t + a4) * t + a3) * t + a2) * t + a1) * t
    return sgn * (1.0 - poly * jnp.exp(-ax * ax))


def _gelu(x):
    # exact-erf GELU (matches torch.nn.GELU default) via the approximation above.
    return 0.5 * x * (1.0 + _erf(x * 0.7071067811865476))


def _ln(x, w, b, eps):
    mu = jnp.mean(x, axis=-1, keepdims=True)
    var = jnp.mean(jnp.square(x - mu), axis=-1, keepdims=True)
    return (x - mu) * jax.lax.rsqrt(var + eps) * w + b


def _mm(a, b):
    # bf16 MXU matmul with f32 accumulation (weights are pre-cast host-side; the cast on an
    # already-bf16 operand is a no-op).
    return jnp.dot(a.astype(jnp.bfloat16), b.astype(jnp.bfloat16),
                   preferred_element_type=jnp.float32)


def _sdpa(q, k, v, scale):
    s = jax.lax.dot_general(q.astype(jnp.bfloat16), k.astype(jnp.bfloat16),
                            (((1,), (1,)), ((), ())),
                            preferred_element_type=jnp.float32) * scale
    s = s - jnp.max(s, axis=-1, keepdims=True)
    e = jnp.exp(s)
    p = e * pl.reciprocal(jnp.sum(e, axis=-1, keepdims=True), approx=True)
    return _mm(p, v)


def _attn_fold(qin, kin, vin, qkv_w, qkv_b, out_w, out_b, Bp, nq, nk, nheads):
    """Multi-head attention on flattened [Bp*nq, C]/[Bp*nk, C] arrays with the output
    projection folded into the per-head loop (no lane-axis concatenate of head outputs)."""
    di = out_w.shape[0]
    q = _mm(qin, qkv_w[:, 0:di]) + qkv_b[:, 0:di]
    k = _mm(kin, qkv_w[:, di:2 * di]) + qkv_b[:, di:2 * di]
    v = _mm(vin, qkv_w[:, 2 * di:3 * di]) + qkv_b[:, 2 * di:3 * di]
    hd = di // nheads
    scale = 1.0 / math.sqrt(hd)
    rows = []
    for b in range(Bp):
        ob = None
        for h in range(nheads):
            c0 = h * hd
            at = _sdpa(q[b * nq:(b + 1) * nq, c0:c0 + hd],
                       k[b * nk:(b + 1) * nk, c0:c0 + hd],
                       v[b * nk:(b + 1) * nk, c0:c0 + hd], scale)
            contrib = _mm(at, out_w[c0:c0 + hd, :])
            ob = contrib if ob is None else ob + contrib
        rows.append(ob)
    return jnp.concatenate(rows, axis=0) + out_b


def _row_roll(x, off):
    # result[r] = x[(r + off) % R]: circular row (sublane) shift.  Equivalent to
    # pltpu.roll(x, shift=(-off) % R, axis=0); written as two static slices + concat so it
    # lowers unconditionally.  Rows whose true 3x3 neighbor is out of range are masked to
    # zero by the caller, so the wrap-around values never contribute.
    R = x.shape[0]
    s = off % R
    if s == 0:
        return x
    return jnp.concatenate([x[s:, :], x[:s, :]], axis=0)


# ----------------------------- fused image encoder kernel ---------------------
def _encoder_kernel(B, patches_ref, pos_ref, pw_ref, pb_ref,
                    ln1w_ref, ln1b_ref, qkvw_ref, qkvb_ref,
                    projw_ref, projb_ref, ln2w_ref, ln2b_ref,
                    m1w_ref, m1b_ref, m2w_ref, m2b_ref,
                    n1w_ref, nln_ref, nmask_ref, n2w_ref, o_ref):
    D = VIT_DIM
    N = EMB_HW * EMB_HW
    H = VIT_HEADS
    hd = D // H
    P = PROMPT_DIM
    g = EMB_HW
    scale = 1.0 / math.sqrt(hd)

    x = _mm(patches_ref[...], pw_ref[...]) + pb_ref[...] + pos_ref[...]       # [R, D]

    ln1w, ln1b = ln1w_ref[...], ln1b_ref[...]
    qkvw, qkvb = qkvw_ref[...], qkvb_ref[...]
    projw, projb = projw_ref[...], projb_ref[...]
    ln2w, ln2b = ln2w_ref[...], ln2b_ref[...]
    m1w, m1b = m1w_ref[...], m1b_ref[...]
    m2w, m2b = m2w_ref[...], m2b_ref[...]

    # TODO(synk): window attention and decomposed relative positional embeddings of
    # ImageEncoderViT blocks are omitted (plain global attention, no rel-pos).
    for blk in range(VIT_DEPTH):
        h = _ln(x, ln1w[blk:blk + 1], ln1b[blk:blk + 1], 1e-5)
        qkv = _mm(h, qkvw[blk * D:(blk + 1) * D]) + qkvb[blk:blk + 1]         # [R, 3D]
        qa, ka, va = qkv[:, :D], qkv[:, D:2 * D], qkv[:, 2 * D:]
        pw_blk = projw[blk * D:(blk + 1) * D]
        brows = []
        for b in range(B):
            r0 = b * N
            ob = None
            for hh in range(H):
                c0 = hh * hd
                at = _sdpa(qa[r0:r0 + N, c0:c0 + hd],
                           ka[r0:r0 + N, c0:c0 + hd],
                           va[r0:r0 + N, c0:c0 + hd], scale)
                # fold output projection into the head loop (no lane concat of head outputs)
                contrib = _mm(at, pw_blk[c0:c0 + hd, :])
                ob = contrib if ob is None else ob + contrib
            brows.append(ob)
        x = x + jnp.concatenate(brows, axis=0) + projb[blk:blk + 1]
        h = _ln(x, ln2w[blk:blk + 1], ln2b[blk:blk + 1], 1e-5)
        m = _gelu(_mm(h, m1w[blk * D:(blk + 1) * D]) + m1b[blk:blk + 1])
        m = _mm(m, m2w[blk * MLP_RATIO * D:(blk + 1) * MLP_RATIO * D]) + m2b[blk:blk + 1]
        x = x + m

    # neck: 1x1 conv -> LayerNorm2d -> 3x3 conv (zero padded) -> LayerNorm2d.
    # Each 3x3 tap = circular row shift + validity mask + weight matmul (replaces the old
    # O(R^2) 0/1 gather-matrix matmuls).
    x1 = _mm(x, n1w_ref[...])
    nln = nln_ref[...]
    x1 = _ln(x1, nln[0:1], nln[1:2], 1e-6)
    nmask = nmask_ref[...]                                                     # [R, 9]
    w2 = n2w_ref[...]                                                          # [9P, P]
    acc = None
    for k in range(9):
        off = (k // 3 - 1) * g + (k % 3 - 1)
        gathered = _row_roll(x1, off) * nmask[:, k:k + 1]
        c = _mm(gathered, w2[k * P:(k + 1) * P, :])
        acc = c if acc is None else acc + c
    o_ref[...] = _ln(acc, nln[2:3], nln[3:4], 1e-6)


@functools.lru_cache(maxsize=None)
def _neck_valid_mask(B, g):
    # validity mask for the zero-padded 3x3 neighborhood, per tap k and flattened row r.
    R = B * g * g
    m = np.zeros((R, 9), np.float32)
    for k in range(9):
        di, dj = k // 3 - 1, k % 3 - 1
        for b in range(B):
            for i in range(g):
                for j in range(g):
                    if 0 <= i + di < g and 0 <= j + dj < g:
                        m[b * g * g + i * g + j, k] = 1.0
    return m


def image_encoder(p, images):
    # images: [B, IMG, IMG, 3] (NHWC) -> [B, g, g, PROMPT_DIM]
    B = images.shape[0]
    g = EMB_HW
    patches = images.reshape(B, g, PATCH, g, PATCH, 3).transpose(0, 1, 3, 2, 4, 5)
    patches = patches.reshape(B * g * g, PATCH * PATCH * 3).astype(jnp.float32)
    pos = jnp.broadcast_to(p["pos_embed"], (B, g, g, VIT_DIM)).reshape(B * g * g, VIT_DIM)

    blocks = p["blocks"]
    rows = lambda name: jnp.concatenate([b[name] for b in blocks], axis=0)
    vecs = lambda name: jnp.stack([b[name] for b in blocks], axis=0)
    bf = lambda a: a.astype(jnp.bfloat16)
    neck_ln = jnp.stack([p["neck_ln1_w"], p["neck_ln1_b"],
                         p["neck_ln2_w"], p["neck_ln2_b"]], axis=0)
    nmask = jnp.asarray(_neck_valid_mask(B, g))

    # TODO(synk): at real-SAM sizes this single-shot kernel needs a token-tile grid and a
    # vmem_limit sized for v7x's 64 MiB VMEM; at this toy size everything fits trivially.
    out = pl.pallas_call(
        functools.partial(_encoder_kernel, B),
        out_shape=jax.ShapeDtypeStruct((B * g * g, PROMPT_DIM), jnp.float32),
        compiler_params=pltpu.CompilerParams(vmem_limit_bytes=32 * 1024 * 1024),
    )(patches, pos, bf(p["patch_w"]), p["patch_b"][None],
      vecs("ln1_w"), vecs("ln1_b"), bf(rows("qkv_w")), vecs("qkv_b"),
      bf(rows("proj_w")), vecs("proj_b"), vecs("ln2_w"), vecs("ln2_b"),
      bf(rows("mlp1_w")), vecs("mlp1_b"), bf(rows("mlp2_w")), vecs("mlp2_b"),
      bf(p["neck_conv1_w"]), neck_ln, nmask, bf(p["neck_conv2_w"]))
    return out.reshape(B, g, g, PROMPT_DIM)


# ----------------------------- prompt encoder (XLA glue) ----------------------
# PE / point / box embedding math is [*,2]x[2,16]-sized: kept in XLA per perf review (a Pallas
# kernel here is pure launch overhead).
def pe_encoding(p, coords01):
    c = coords01.astype(jnp.float32) * 2.0 - 1.0
    proj = (2.0 * math.pi) * jnp.matmul(c, p["pe_gauss"])
    return jnp.concatenate([jnp.sin(proj), jnp.cos(proj)], axis=-1)


def get_dense_pe(p):
    g = EMB_HW
    ys = (jnp.arange(g, dtype=jnp.float32) + 0.5) / g
    xs = (jnp.arange(g, dtype=jnp.float32) + 0.5) / g
    yy, xx = jnp.meshgrid(ys, xs, indexing="ij")
    coords = jnp.stack([xx, yy], axis=-1)            # (x, y) order
    return pe_encoding(p, coords)                    # [g, g, PROMPT_DIM]


def embed_points(p, coords, labels, pad):
    coords = coords.astype(jnp.float32) + 0.5
    labels = labels.astype(jnp.int32)
    if pad:
        Bp = coords.shape[0]
        coords = jnp.concatenate([coords, jnp.zeros((Bp, 1, 2), jnp.float32)], axis=1)
        labels = jnp.concatenate([labels, -jnp.ones((Bp, 1), jnp.int32)], axis=1)
    pe = pe_encoding(p, coords / float(IMG_SIZE))
    lab = labels[..., None]
    pe = jnp.where(lab == -1, 0.0, pe)
    pe = pe + jnp.where(lab == -1, p["not_a_point"][0], 0.0)
    pe = pe + jnp.where(lab == 0, p["point_embeds"][0], 0.0)
    pe = pe + jnp.where(lab == 1, p["point_embeds"][1], 0.0)
    return pe


def embed_boxes(p, boxes):
    b = boxes.astype(jnp.float32) + 0.5
    coords = b.reshape(-1, 2, 2) / float(IMG_SIZE)
    pe = pe_encoding(p, coords)
    pe = pe.at[:, 0, :].add(p["point_embeds"][2])
    pe = pe.at[:, 1, :].add(p["point_embeds"][3])
    return pe


def prompt_encoder(p, points, boxes, masks):
    if points is not None:
        bs = points[0].shape[0]
    elif boxes is not None:
        bs = boxes.shape[0]
    elif masks is not None:
        bs = masks.shape[0]
    else:
        bs = 1
    sparse = jnp.zeros((bs, 0, PROMPT_DIM), jnp.float32)
    if points is not None:
        coords, labels = points
        sparse = jnp.concatenate(
            [sparse, embed_points(p, coords, labels, pad=(boxes is None))], axis=1)
    if boxes is not None:
        sparse = jnp.concatenate([sparse, embed_boxes(p, boxes)], axis=1)
    # TODO(synk): mask_inputs downscaling conv path of PromptEncoder not implemented.
    dense = jnp.broadcast_to(p["no_mask_embed"].reshape(1, 1, 1, PROMPT_DIM),
                             (bs, EMB_HW, EMB_HW, PROMPT_DIM))
    return sparse, dense


# ----------------------------- fully fused mask decoder kernel ----------------
def _decoder_kernel(Bp, Nq, Nk,
                    q0_ref, k0_ref, kpe_ref,
                    aqkv_w_ref, aqkv_b_ref, aout_w_ref, aout_b_ref,
                    m1w_ref, m1b_ref, m2w_ref, m2b_ref,
                    nw_ref, nb_ref,
                    fqkv_w_ref, fqkv_b_ref, fout_w_ref, fvec_ref,
                    up1_w_ref, up1_vec_ref, up2_w_ref, up2_b_ref,
                    hw1_ref, hw2_ref, hw3_ref, hb1_ref, hb2_ref, hb3_ref,
                    iw1_ref, iw2_ref, iw3_ref, ib12_ref, ib3_ref,
                    masks_ref, iou_ref):
    P = PROMPT_DIM
    T = NUM_MASK_TOKENS
    C1 = P // 4
    C2 = P // 8
    L = DEC_DEPTH
    H = DEC_HEADS
    di_s = P
    di_c = P // DOWNSAMPLE

    queries = q0_ref[...]
    qpe = queries                     # query_pe == initial point-embedding tokens
    keys = k0_ref[...]
    kpe = kpe_ref[...]

    aqkv_w = aqkv_w_ref[...]
    aqkv_b = aqkv_b_ref[...]
    aout_w = aout_w_ref[...]
    aout_b = aout_b_ref[...]
    m1w, m1b = m1w_ref[...], m1b_ref[...]
    m2w, m2b = m2w_ref[...], m2b_ref[...]
    nw, nb = nw_ref[...], nb_ref[...]

    # ---- two-way transformer blocks ----
    for l in range(L):
        lw = aqkv_w[l * P:(l + 1) * P, :]
        lb = aqkv_b[l:l + 1, :]
        low = aout_w[l * (P + 2 * di_c):(l + 1) * (P + 2 * di_c), :]
        lob = aout_b[l * 3:(l + 1) * 3, :]
        sa = (lw[:, 0:3 * di_s], lb[:, 0:3 * di_s], low[0:di_s, :], lob[0:1, :])
        t2i = (lw[:, 3 * di_s:3 * di_s + 3 * di_c], lb[:, 3 * di_s:3 * di_s + 3 * di_c],
               low[di_s:di_s + di_c, :], lob[1:2, :])
        i2t = (lw[:, 3 * di_s + 3 * di_c:3 * di_s + 6 * di_c],
               lb[:, 3 * di_s + 3 * di_c:3 * di_s + 6 * di_c],
               low[di_s + di_c:di_s + 2 * di_c, :], lob[2:3, :])
        lnw = nw[l * 4:(l + 1) * 4, :]
        lnb = nb[l * 4:(l + 1) * 4, :]

        if l == 0:   # skip_first_layer_pe: queries replaced by self-attn output
            queries = _attn_fold(queries, queries, queries, *sa, Bp, Nq, Nq, H)
        else:
            q = queries + qpe
            queries = queries + _attn_fold(q, q, queries, *sa, Bp, Nq, Nq, H)
        queries = _ln(queries, lnw[0:1], lnb[0:1], 1e-5)

        q = queries + qpe
        k = keys + kpe
        queries = queries + _attn_fold(q, k, keys, *t2i, Bp, Nq, Nk, H)
        queries = _ln(queries, lnw[1:2], lnb[1:2], 1e-5)

        mlp = jnp.maximum(_mm(queries, m1w[l * P:(l + 1) * P, :]) + m1b[l:l + 1, :], 0.0)
        mlp = _mm(mlp, m2w[l * DEC_MLP:(l + 1) * DEC_MLP, :]) + m2b[l:l + 1, :]
        queries = _ln(queries + mlp, lnw[2:3], lnb[2:3], 1e-5)

        q = queries + qpe
        k = keys + kpe
        keys = keys + _attn_fold(k, q, queries, *i2t, Bp, Nk, Nq, H)
        keys = _ln(keys, lnw[3:4], lnb[3:4], 1e-5)

    # ---- final token -> image attention + LN ----
    fvec = fvec_ref[...]
    q = queries + qpe
    k = keys + kpe
    queries = queries + _attn_fold(q, k, keys, fqkv_w_ref[...], fqkv_b_ref[...],
                                   fout_w_ref[...], fvec[0:1, :], Bp, Nq, Nk, H)
    queries = _ln(queries, fvec[1:2, :], fvec[2:3, :], 1e-5)

    # ---- hypernetwork MLPs (batched over prompts per mask token) ----
    hw1, hw2, hw3 = hw1_ref[...], hw2_ref[...], hw3_ref[...]
    hb1, hb2, hb3 = hb1_ref[...], hb2_ref[...], hb3_ref[...]
    h3 = []
    for i in range(T):
        t_i = jnp.concatenate(
            [queries[b * Nq + 1 + i:b * Nq + 2 + i, :] for b in range(Bp)], axis=0)  # [Bp, P]
        h = jnp.maximum(_mm(t_i, hw1[i * P:(i + 1) * P, :]) + hb1[i:i + 1, :], 0.0)
        h = jnp.maximum(_mm(h, hw2[i * P:(i + 1) * P, :]) + hb2[i:i + 1, :], 0.0)
        h3.append(_mm(h, hw3[i * P:(i + 1) * P, :]) + hb3[i:i + 1, :])                # [Bp, C2]

    # ---- IoU prediction head (batched over prompts) ----
    it = jnp.concatenate([queries[b * Nq:b * Nq + 1, :] for b in range(Bp)], axis=0)  # [Bp, P]
    ib12 = ib12_ref[...]
    h = jnp.maximum(_mm(it, iw1_ref[...]) + ib12[0:1, :], 0.0)
    h = jnp.maximum(_mm(h, iw2_ref[...]) + ib12[1:2, :], 0.0)
    iou_ref[...] = _mm(h, iw3_ref[...]) + ib3_ref[...]

    # ---- output upscaling (ConvT2x2 + LayerNorm2d + GELU + ConvT2x2 + GELU) + mask product.
    # Sub-pixel groups are stacked on the ROW axis (weights restacked host-side) so LN/GELU
    # and the second ConvT run once per prompt on one slab; the mask product is a lane-dense
    # [T, 16*g*g] dot.  Rows of z are ordered (grp2, grp1, i*g+j); the spatial interleave is
    # a tiny permutation done in XLA glue after the kernel.
    up1_w = up1_w_ref[...]
    up1_vec = up1_vec_ref[...]
    up2_w = up2_w_ref[...]
    up2_b = up2_b_ref[...]
    for b in range(Bp):
        src_b = keys[b * Nk:(b + 1) * Nk, :]                                   # [Nk, P]
        y = jnp.concatenate(
            [_mm(src_b, up1_w[g1 * P:(g1 + 1) * P, :]) for g1 in range(4)], axis=0)  # [4Nk, C1]
        y = y + up1_vec[0:1, :]
        y = _gelu(_ln(y, up1_vec[1:2, :], up1_vec[2:3, :], 1e-6))
        z = jnp.concatenate(
            [_mm(y, up2_w[g2 * C1:(g2 + 1) * C1, :]) for g2 in range(4)], axis=0)    # [16Nk, C2]
        z = _gelu(z + up2_b)
        hyper_b = jnp.concatenate([h3[i][b:b + 1, :] for i in range(T)], axis=0)     # [T, C2]
        masks_b = jax.lax.dot_general(hyper_b.astype(jnp.bfloat16), z.astype(jnp.bfloat16),
                                      (((1,), (1,)), ((), ())),
                                      preferred_element_type=jnp.float32)            # [T, 16Nk]
        masks_ref[b * T:(b + 1) * T, :] = masks_b


def mask_decoder(dp, image_embedding, image_pe, sparse, dense, multimask_output):
    Bp = sparse.shape[0]
    P = PROMPT_DIM
    g = EMB_HW
    Nk = g * g
    T = NUM_MASK_TOKENS
    C1 = P // 4
    C2 = P // 8
    L = DEC_DEPTH

    output_tokens = jnp.concatenate([dp["iou_token"], dp["mask_tokens"]], axis=0)
    output_tokens = jnp.broadcast_to(output_tokens[None], (Bp, T + 1, P))
    tokens = jnp.concatenate([output_tokens, sparse], axis=1)            # [Bp, Nq, P]
    Nq = tokens.shape[1]

    src = jnp.broadcast_to(image_embedding, (Bp, g, g, P)) + dense
    pos_src = jnp.broadcast_to(image_pe[None], (Bp, g, g, P))
    q0 = tokens.reshape(Bp * Nq, P)
    k0 = src.reshape(Bp * Nk, P)
    kpe = pos_src.reshape(Bp * Nk, P)

    bf = lambda a: a.astype(jnp.bfloat16)
    layers = dp["layers"]

    def layer_qkv_w(lp):
        return jnp.concatenate(
            [lp["self_attn"]["q_w"], lp["self_attn"]["k_w"], lp["self_attn"]["v_w"],
             lp["cross_t2i"]["q_w"], lp["cross_t2i"]["k_w"], lp["cross_t2i"]["v_w"],
             lp["cross_i2t"]["q_w"], lp["cross_i2t"]["k_w"], lp["cross_i2t"]["v_w"]], axis=1)

    def layer_qkv_b(lp):
        return jnp.concatenate(
            [lp["self_attn"]["q_b"], lp["self_attn"]["k_b"], lp["self_attn"]["v_b"],
             lp["cross_t2i"]["q_b"], lp["cross_t2i"]["k_b"], lp["cross_t2i"]["v_b"],
             lp["cross_i2t"]["q_b"], lp["cross_i2t"]["k_b"], lp["cross_i2t"]["v_b"]], axis=0)

    aqkv_w = jnp.concatenate([layer_qkv_w(lp) for lp in layers], axis=0)        # [L*P, 192]
    aqkv_b = jnp.stack([layer_qkv_b(lp) for lp in layers], axis=0)              # [L, 192]
    aout_w = jnp.concatenate(
        [jnp.concatenate([lp["self_attn"]["out_w"], lp["cross_t2i"]["out_w"],
                          lp["cross_i2t"]["out_w"]], axis=0) for lp in layers], axis=0)
    aout_b = jnp.concatenate(
        [jnp.stack([lp["self_attn"]["out_b"], lp["cross_t2i"]["out_b"],
                    lp["cross_i2t"]["out_b"]], axis=0) for lp in layers], axis=0)
    m1w = jnp.concatenate([lp["mlp1_w"] for lp in layers], axis=0)
    m1b = jnp.stack([lp["mlp1_b"] for lp in layers], axis=0)
    m2w = jnp.concatenate([lp["mlp2_w"] for lp in layers], axis=0)
    m2b = jnp.stack([lp["mlp2_b"] for lp in layers], axis=0)
    nw = jnp.concatenate(
        [jnp.stack([lp["norm%d_w" % i] for i in range(1, 5)], axis=0) for lp in layers], axis=0)
    nb = jnp.concatenate(
        [jnp.stack([lp["norm%d_b" % i] for i in range(1, 5)], axis=0) for lp in layers], axis=0)

    fa = dp["final_attn"]
    fqkv_w = jnp.concatenate([fa["q_w"], fa["k_w"], fa["v_w"]], axis=1)
    fqkv_b = jnp.concatenate([fa["q_b"], fa["k_b"], fa["v_b"]], axis=0)[None]
    fout_w = fa["out_w"]
    fvec = jnp.stack([fa["out_b"], dp["final_ln_w"], dp["final_ln_b"]], axis=0)

    # restack ConvT weights so sub-pixel groups live on the row axis of the matmul weight.
    up1_w = dp["up1_w"].reshape(P, 4, C1).transpose(1, 0, 2).reshape(4 * P, C1)
    up1_vec = jnp.stack([dp["up1_b"], dp["up_ln_w"], dp["up_ln_b"]], axis=0)
    up2_w = dp["up2_w"].reshape(C1, 4, C2).transpose(1, 0, 2).reshape(4 * C1, C2)
    up2_b = dp["up2_b"][None]

    hw1 = jnp.concatenate([dp["hyper"][i]["ws"][0] for i in range(T)], axis=0)
    hw2 = jnp.concatenate([dp["hyper"][i]["ws"][1] for i in range(T)], axis=0)
    hw3 = jnp.concatenate([dp["hyper"][i]["ws"][2] for i in range(T)], axis=0)
    hb1 = jnp.stack([dp["hyper"][i]["bs"][0] for i in range(T)], axis=0)
    hb2 = jnp.stack([dp["hyper"][i]["bs"][1] for i in range(T)], axis=0)
    hb3 = jnp.stack([dp["hyper"][i]["bs"][2] for i in range(T)], axis=0)
    iw1, iw2, iw3 = dp["iou_mlp"]["ws"]
    ib1, ib2, ib3 = dp["iou_mlp"]["bs"]
    ib12 = jnp.stack([ib1, ib2], axis=0)

    masks_flat, iou_pred = pl.pallas_call(
        functools.partial(_decoder_kernel, Bp, Nq, Nk),
        out_shape=(jax.ShapeDtypeStruct((Bp * T, 16 * Nk), jnp.float32),
                   jax.ShapeDtypeStruct((Bp, T), jnp.float32)),
        compiler_params=pltpu.CompilerParams(vmem_limit_bytes=32 * 1024 * 1024),
    )(q0, k0, kpe,
      bf(aqkv_w), aqkv_b, bf(aout_w), aout_b,
      bf(m1w), m1b, bf(m2w), m2b,
      nw, nb,
      bf(fqkv_w), fqkv_b, bf(fout_w), fvec,
      bf(up1_w), up1_vec, bf(up2_w), up2_b,
      bf(hw1), bf(hw2), bf(hw3), hb1, hb2, hb3,
      bf(iw1), bf(iw2), bf(iw3), ib12, ib3[None])

    # block layout -> spatial NCHW: columns are (dy2, dx2, dy1, dx1, i, j); Y = 4i+2dy1+dy2,
    # X = 4j+2dx1+dx2.  Pure permutation on a tiny array (XLA glue).
    m = masks_flat.reshape(Bp, T, 2, 2, 2, 2, g, g)
    m = m.transpose(0, 1, 6, 4, 2, 7, 5, 3).reshape(Bp, T, 4 * g, 4 * g)
    if multimask_output:
        return m[:, 1:], iou_pred[:, 1:]
    return m[:, 0:1], iou_pred[:, 0:1]


# ----------------------------- pre / post processing --------------------------
def preprocess(image_chw):
    # pixel normalization kept in XLA (a Pallas kernel with last dim 3 wastes 97% of lanes).
    x = jnp.transpose(image_chw, (1, 2, 0)).astype(jnp.float32)
    x = (x - PIXEL_MEAN) / PIXEL_STD
    H, W, _ = x.shape
    return jnp.pad(x, ((0, IMG_SIZE - H), (0, IMG_SIZE - W), (0, 0)))


def _resize_matrix(in_size, out_size):
    # PyTorch bilinear, align_corners=False (half-pixel centers, clamped).
    i = np.arange(out_size, dtype=np.float64)
    src = np.maximum((i + 0.5) * (in_size / out_size) - 0.5, 0.0)
    i0 = np.minimum(np.floor(src).astype(np.int64), in_size - 1)
    i1 = np.minimum(i0 + 1, in_size - 1)
    w1 = src - i0
    R = np.zeros((out_size, in_size), dtype=np.float64)
    R[np.arange(out_size), i0] += (1.0 - w1)
    R[np.arange(out_size), i1] += w1
    return R


def _resize_kernel(S, m_ref, rh_ref, rwt_ref, o_ref):
    # all S = Bp*C mask slices processed in ONE un-gridded call (grid steps cost ~0.35us each
    # for a few-us total workload; "parallel" buys nothing here -- per perf review).
    rh = rh_ref[...]
    rwt = rwt_ref[...]
    for s in range(S):
        t = jnp.dot(rh, m_ref[s], preferred_element_type=jnp.float32)
        o_ref[s] = jnp.dot(t, rwt, preferred_element_type=jnp.float32)


def postprocess_masks(masks, input_size, original_size):
    # resize(low_res -> img_size) -> crop(input_size) -> resize(original_size): all linear,
    # pre-composed into one row matrix and one column matrix -> single un-gridded kernel.
    Bp, C, h, w = masks.shape
    ih, iw = int(input_size[0]), int(input_size[1])
    oh, ow = int(original_size[0]), int(original_size[1])
    R1h = _resize_matrix(h, IMG_SIZE)
    R1w = _resize_matrix(w, IMG_SIZE)
    R2h = _resize_matrix(ih, oh)
    R2w = _resize_matrix(iw, ow)
    RH = jnp.asarray((R2h @ R1h[:ih, :]).astype(np.float32))             # [oh, h]
    RWT = jnp.asarray((R2w @ R1w[:iw, :]).T.astype(np.float32))          # [w, ow]
    S = Bp * C
    out = pl.pallas_call(
        functools.partial(_resize_kernel, S),
        out_shape=jax.ShapeDtypeStruct((S, oh, ow), jnp.float32),
    )(masks.reshape(S, h, w), RH, RWT)
    return out.reshape(Bp, C, oh, ow)


# ----------------------------- parameter init --------------------------------
class KeyGen:
    def __init__(self, seed):
        self.key = jax.random.PRNGKey(seed)

    def __call__(self):
        self.key, sub = jax.random.split(self.key)
        return sub


def randn(kg, shape, scale=0.02):
    return (scale * jax.random.normal(kg(), shape, dtype=jnp.float32)).astype(jnp.float32)


def _zeros(*s):
    return jnp.zeros(s, jnp.float32)


def _ones(*s):
    return jnp.ones(s, jnp.float32)


def init_params(kg):
    D, P = VIT_DIM, PROMPT_DIM
    enc = {
        "patch_w": randn(kg, (PATCH * PATCH * 3, D)), "patch_b": _zeros(D),
        "pos_embed": randn(kg, (1, EMB_HW, EMB_HW, D)),
        "blocks": [],
        "neck_conv1_w": randn(kg, (D, P)),                      # 1x1 conv, bias=False
        "neck_ln1_w": _ones(P), "neck_ln1_b": _zeros(P),
        "neck_conv2_w": randn(kg, (3 * 3 * P, P)),              # 3x3 conv, bias=False
        "neck_ln2_w": _ones(P), "neck_ln2_b": _zeros(P),
    }
    for _ in range(VIT_DEPTH):
        enc["blocks"].append({
            "ln1_w": _ones(D), "ln1_b": _zeros(D),
            "qkv_w": randn(kg, (D, 3 * D)), "qkv_b": _zeros(3 * D),
            "proj_w": randn(kg, (D, D)), "proj_b": _zeros(D),
            "ln2_w": _ones(D), "ln2_b": _zeros(D),
            "mlp1_w": randn(kg, (D, MLP_RATIO * D)), "mlp1_b": _zeros(MLP_RATIO * D),
            "mlp2_w": randn(kg, (MLP_RATIO * D, D)), "mlp2_b": _zeros(D),
        })

    prompt = {
        "pe_gauss": jax.random.normal(kg(), (2, P // 2), dtype=jnp.float32),
        "point_embeds": randn(kg, (4, P), scale=1.0),
        "not_a_point": randn(kg, (1, P), scale=1.0),
        "no_mask_embed": randn(kg, (1, P), scale=1.0),
    }

    def attn_p(downsample):
        di = P // downsample
        return {"q_w": randn(kg, (P, di)), "q_b": _zeros(di),
                "k_w": randn(kg, (P, di)), "k_b": _zeros(di),
                "v_w": randn(kg, (P, di)), "v_b": _zeros(di),
                "out_w": randn(kg, (di, P)), "out_b": _zeros(P)}

    layers = []
    for _ in range(DEC_DEPTH):
        l = {"self_attn": attn_p(1),
             "cross_t2i": attn_p(DOWNSAMPLE),
             "cross_i2t": attn_p(DOWNSAMPLE),
             "mlp1_w": randn(kg, (P, DEC_MLP)), "mlp1_b": _zeros(DEC_MLP),
             "mlp2_w": randn(kg, (DEC_MLP, P)), "mlp2_b": _zeros(P)}
        for i in range(1, 5):
            l["norm%d_w" % i] = _ones(P)
            l["norm%d_b" % i] = _zeros(P)
        layers.append(l)

    dec = {
        "iou_token": randn(kg, (1, P), scale=1.0),
        "mask_tokens": randn(kg, (NUM_MASK_TOKENS, P), scale=1.0),
        "layers": layers,
        "final_attn": attn_p(DOWNSAMPLE),
        "final_ln_w": _ones(P), "final_ln_b": _zeros(P),
        "up1_w": randn(kg, (P, 2 * 2 * (P // 4))), "up1_b": _zeros(P // 4),
        "up_ln_w": _ones(P // 4), "up_ln_b": _zeros(P // 4),
        "up2_w": randn(kg, (P // 4, 2 * 2 * (P // 8))), "up2_b": _zeros(P // 8),
        "hyper": [{"ws": [randn(kg, (P, P)), randn(kg, (P, P)), randn(kg, (P, P // 8))],
                   "bs": [_zeros(P), _zeros(P), _zeros(P // 8)]}
                  for _ in range(NUM_MASK_TOKENS)],
        "iou_mlp": {"ws": [randn(kg, (P, IOU_HIDDEN)), randn(kg, (IOU_HIDDEN, IOU_HIDDEN)),
                           randn(kg, (IOU_HIDDEN, NUM_MASK_TOKENS))],
                    "bs": [_zeros(IOU_HIDDEN), _zeros(IOU_HIDDEN), _zeros(NUM_MASK_TOKENS)]},
    }
    return {"enc": enc, "prompt": prompt, "dec": dec}


# ----------------------------- SAM forward -----------------------------------
def sam_forward(params, batched_input, multimask_output):
    input_images = jnp.stack([preprocess(x["image"]) for x in batched_input], axis=0)
    image_embeddings = image_encoder(params["enc"], input_images)        # [B, g, g, P]
    image_pe = get_dense_pe(params["prompt"])                            # [g, g, P]
    outputs = []
    # NOTE: the per-image loop mirrors torch Sam.forward; batching the two decoders into one
    # call would require padding prompts to a common Nq, which changes the attention math vs
    # the reference, so it is intentionally not done.
    # TODO(synk): per-image batched decoder call (fixed-Nq padding + attention mask) if a
    # semantics change is acceptable.
    for image_record, curr_embedding in zip(batched_input, image_embeddings):
        if "point_coords" in image_record:
            points = (image_record["point_coords"], image_record["point_labels"])
        else:
            points = None
        sparse, dense = prompt_encoder(params["prompt"], points,
                                       image_record.get("boxes", None),
                                       image_record.get("mask_inputs", None))
        low_res_masks, iou_pred = mask_decoder(params["dec"], curr_embedding[None],
                                               image_pe, sparse, dense, multimask_output)
        masks = postprocess_masks(low_res_masks,
                                  input_size=image_record["image"].shape[-2:],
                                  original_size=image_record["original_size"])
        masks = masks > MASK_THRESHOLD
        outputs.append({"masks": masks,
                        "iou_predictions": iou_pred,
                        "low_res_logits": low_res_masks})
    return outputs


# ----------------------------- main -------------------------------------------
if __name__ == "__main__":
    kg = KeyGen(0)
    params = init_params(kg)

    img1 = jax.random.uniform(kg(), (3, 32, 30), minval=0.0, maxval=255.0, dtype=jnp.float32)
    img2 = jax.random.uniform(kg(), (3, 28, 32), minval=0.0, maxval=255.0, dtype=jnp.float32)
    pts1 = jax.random.uniform(kg(), (2, 2, 2), minval=0.0, maxval=float(IMG_SIZE), dtype=jnp.float32)
    lbl1 = jnp.array([[1, 0], [1, 1]], dtype=jnp.int32)
    pts2 = jax.random.uniform(kg(), (1, 1, 2), minval=0.0, maxval=float(IMG_SIZE), dtype=jnp.float32)
    lbl2 = jnp.array([[1]], dtype=jnp.int32)
    box2 = jnp.array([[4.0, 6.0, 20.0, 26.0]], dtype=jnp.float32)

    batched_input = [
        {"image": img1, "original_size": (48, 45),
         "point_coords": pts1, "point_labels": lbl1},
        {"image": img2, "original_size": (42, 48),
         "point_coords": pts2, "point_labels": lbl2, "boxes": box2},
    ]

    outputs = sam_forward(params, batched_input, multimask_output=True)
    jax.block_until_ready(outputs)

    assert outputs[0]["masks"].shape == (2, 3, 48, 45)
    assert outputs[0]["iou_predictions"].shape == (2, 3)
    assert outputs[0]["low_res_logits"].shape == (2, 3, 4 * EMB_HW, 4 * EMB_HW)
    assert outputs[1]["masks"].shape == (1, 3, 42, 48)
    assert outputs[1]["iou_predictions"].shape == (1, 3)
    print("KERNEL_OK")
</pallas_src>

<mosaic_0001>
module attributes {stable_mosaic.version = 11 : i64} {
  func.func @_encoder_kernel(%arg0: memref<32x192xf32, #tpu.memory_space<vmem>>, %arg1: memref<32x32xf32, #tpu.memory_space<vmem>>, %arg2: memref<192x32xbf16, #tpu.memory_space<vmem>>, %arg3: memref<1x32xf32, #tpu.memory_space<vmem>>, %arg4: memref<2x32xf32, #tpu.memory_space<vmem>>, %arg5: memref<2x32xf32, #tpu.memory_space<vmem>>, %arg6: memref<64x96xbf16, #tpu.memory_space<vmem>>, %arg7: memref<2x96xf32, #tpu.memory_space<vmem>>, %arg8: memref<64x32xbf16, #tpu.memory_space<vmem>>, %arg9: memref<2x32xf32, #tpu.memory_space<vmem>>, %arg10: memref<2x32xf32, #tpu.memory_space<vmem>>, %arg11: memref<2x32xf32, #tpu.memory_space<vmem>>, %arg12: memref<64x128xbf16, #tpu.memory_space<vmem>>, %arg13: memref<2x128xf32, #tpu.memory_space<vmem>>, %arg14: memref<256x32xbf16, #tpu.memory_space<vmem>>, %arg15: memref<2x32xf32, #tpu.memory_space<vmem>>, %arg16: memref<32x32xbf16, #tpu.memory_space<vmem>>, %arg17: memref<4x32xf32, #tpu.memory_space<vmem>>, %arg18: memref<32x9xf32, #tpu.memory_space<vmem>>, %arg19: memref<288x32xbf16, #tpu.memory_space<vmem>>, %arg20: memref<32x32xf32, #tpu.memory_space<vmem>>) attributes {dimension_semantics = [], scalar_prefetch = 0 : i64, scratch_operands = 0 : i64, tpu.core_type = #tpu.core_type<tc>} {
    %c0 = arith.constant 0 : index
    %c0_0 = arith.constant 0 : index
    %0 = vector.load %arg0[%c0, %c0_0] : memref<32x192xf32, #tpu.memory_space<vmem>>, vector<32x192xf32>
    %c0_1 = arith.constant 0 : index
    %c0_2 = arith.constant 0 : index
    %1 = vector.load %arg2[%c0_1, %c0_2] : memref<192x32xbf16, #tpu.memory_space<vmem>>, vector<192x32xbf16>
    %2 = arith.truncf %0 : vector<32x192xf32> to vector<32x192xbf16>
    %cst = arith.constant dense<0.000000e+00> : vector<32x32xf32>
    %3 = tpu.matmul %2, %1, %cst {dimension_numbers = #tpu.dot_dimension_numbers<[1], [0], [0], [1], [0, 0, 1, 1], [], []>} : vector<32x192xbf16>, vector<192x32xbf16>, vector<32x32xf32> -> vector<32x32xf32>
    %c0_3 = arith.constant 0 : index
    %c0_4 = arith.constant 0 : index
    %4 = vector.load %arg3[%c0_3, %c0_4] : memref<1x32xf32, #tpu.memory_space<vmem>>, vector<1x32xf32>
    %5 = vector.broadcast %4 : vector<1x32xf32> to vector<32x32xf32>
    %6 = arith.addf %3, %5 : vector<32x32xf32>
    %c0_5 = arith.constant 0 : index
    %c0_6 = arith.constant 0 : index
    %7 = vector.load %arg1[%c0_5, %c0_6] : memref<32x32xf32, #tpu.memory_space<vmem>>, vector<32x32xf32>
    %8 = arith.addf %6, %7 : vector<32x32xf32>
    %c0_7 = arith.constant 0 : index
    %c0_8 = arith.constant 0 : index
    %9 = vector.load %arg4[%c0_7, %c0_8] : memref<2x32xf32, #tpu.memory_space<vmem>>, vector<2x32xf32>
    %c0_9 = arith.constant 0 : index
    %c0_10 = arith.constant 0 : index
    %10 = vector.load %arg5[%c0_9, %c0_10] : memref<2x32xf32, #tpu.memory_space<vmem>>, vector<2x32xf32>
    %c0_11 = arith.constant 0 : index
    %c0_12 = arith.constant 0 : index
    %11 = vector.load %arg6[%c0_11, %c0_12] : memref<64x96xbf16, #tpu.memory_space<vmem>>, vector<64x96xbf16>
    %c0_13 = arith.constant 0 : index
    %c0_14 = arith.constant 0 : index
    %12 = vector.load %arg7[%c0_13, %c0_14] : memref<2x96xf32, #tpu.memory_space<vmem>>, vector<2x96xf32>
    %c0_15 = arith.constant 0 : index
    %c0_16 = arith.constant 0 : index
    %13 = vector.load %arg8[%c0_15, %c0_16] : memref<64x32xbf16, #tpu.memory_space<vmem>>, vector<64x32xbf16>
    %c0_17 = arith.constant 0 : index
    %c0_18 = arith.constant 0 : index
    %14 = vector.load %arg9[%c0_17, %c0_18] : memref<2x32xf32, #tpu.memory_space<vmem>>, vector<2x32xf32>
    %c0_19 = arith.constant 0 : index
    %c0_20 = arith.constant 0 : index
    %15 = vector.load %arg10[%c0_19, %c0_20] : memref<2x32xf32, #tpu.memory_space<vmem>>, vector<2x32xf32>
    %c0_21 = arith.constant 0 : index
    %c0_22 = arith.constant 0 : index
    %16 = vector.load %arg11[%c0_21, %c0_22] : memref<2x32xf32, #tpu.memory_space<vmem>>, vector<2x32xf32>
    %c0_23 = arith.constant 0 : index
    %c0_24 = arith.constant 0 : index
    %17 = vector.load %arg12[%c0_23, %c0_24] : memref<64x128xbf16, #tpu.memory_space<vmem>>, vector<64x128xbf16>
    %c0_25 = arith.constant 0 : index
    %c0_26 = arith.constant 0 : index
    %18 = vector.load %arg13[%c0_25, %c0_26] : memref<2x128xf32, #tpu.memory_space<vmem>>, vector<2x128xf32>
    %c0_27 = arith.constant 0 : index
    %c0_28 = arith.constant 0 : index
    %19 = vector.load %arg14[%c0_27, %c0_28] : memref<256x32xbf16, #tpu.memory_space<vmem>>, vector<256x32xbf16>
    %c0_29 = arith.constant 0 : index
    %c0_30 = arith.constant 0 : index
    %20 = vector.load %arg15[%c0_29, %c0_30] : memref<2x32xf32, #tpu.memory_space<vmem>>, vector<2x32xf32>
    %21 = vector.extract_strided_slice %9 {offsets = [0, 0], sizes = [1, 32], strides = [1, 1]} : vector<2x32xf32> to vector<1x32xf32>
    %22 = vector.extract_strided_slice %10 {offsets = [0, 0], sizes = [1, 32], strides = [1, 1]} : vector<2x32xf32> to vector<1x32xf32>
    %cst_31 = arith.constant dense<0.000000e+00> : vector<32xf32>
    %23 = vector.multi_reduction <add>, %8, %cst_31 [1] : vector<32x32xf32> to vector<32xf32>
    %24 = vector.shape_cast %23 : vector<32xf32> to vector<32x1xf32>
    %cst_32 = arith.constant 3.200000e+01 : f32
    %25 = vector.broadcast %cst_32 : f32 to vector<32x1xf32>
    %26 = arith.divf %24, %25 : vector<32x1xf32>
    %27 = vector.broadcast %26 : vector<32x1xf32> to vector<32x32xf32>
    %28 = arith.subf %8, %27 : vector<32x32xf32>
    %29 = arith.mulf %28, %28 : vector<32x32xf32>
    %cst_33 = arith.constant dense<0.000000e+00> : vector<32xf32>
    %30 = vector.multi_reduction <add>, %29, %cst_33 [1] : vector<32x32xf32> to vector<32xf32>
    %31 = vector.shape_cast %30 : vector<32xf32> to vector<32x1xf32>
    %cst_34 = arith.constant 3.200000e+01 : f32
    %32 = vector.broadcast %cst_34 : f32 to vector<32x1xf32>
    %33 = arith.divf %31, %32 : vector<32x1xf32>
    %34 = vector.broadcast %26 : vector<32x1xf32> to vector<32x32xf32>
    %35 = arith.subf %8, %34 : vector<32x32xf32>
    %cst_35 = arith.constant 9.99999974E-6 : f32
    %36 = vector.broadcast %cst_35 : f32 to vector<32x1xf32>
    %37 = arith.addf %33, %36 : vector<32x1xf32>
    %38 = math.rsqrt %37 : vector<32x1xf32>
    %39 = vector.broadcast %38 : vector<32x1xf32> to vector<32x32xf32>
    %40 = arith.mulf %35, %39 : vector<32x32xf32>
    %41 = vector.broadcast %21 : vector<1x32xf32> to vector<32x32xf32>
    %42 = arith.mulf %40, %41 : vector<32x32xf32>
    %43 = vector.broadcast %22 : vector<1x32xf32> to vector<32x32xf32>
    %44 = arith.addf %42, %43 : vector<32x32xf32>
    %45 = vector.extract_strided_slice %11 {offsets = [0, 0], sizes = [32, 96], strides = [1, 1]} : vector<64x96xbf16> to vector<32x96xbf16>
    %46 = arith.truncf %44 : vector<32x32xf32> to vector<32x32xbf16>
    %cst_36 = arith.constant dense<0.000000e+00> : vector<32x96xf32>
    %47 = tpu.matmul %46, %45, %cst_36 {dimension_numbers = #tpu.dot_dimension_numbers<[1], [0], [0], [1], [0, 0, 1, 1], [], []>} : vector<32x32xbf16>, vector<32x96xbf16>, vector<32x96xf32> -> vector<32x96xf32>
    %48 = vector.extract_strided_slice %12 {offsets = [0, 0], sizes = [1, 96], strides = [1, 1]} : vector<2x96xf32> to vector<1x96xf32>
    %49 = vector.broadcast %48 : vector<1x96xf32> to vector<32x96xf32>
    %50 = arith.addf %47, %49 : vector<32x96xf32>
    %51 = vector.extract_strided_slice %50 {offsets = [0, 0], sizes = [32, 32], strides = [1, 1]} : vector<32x96xf32> to vector<32x32xf32>
    %52 = vector.extract_strided_slice %50 {offsets = [0, 32], sizes = [32, 32], strides = [1, 1]} : vector<32x96xf32> to vector<32x32xf32>
    %53 = vector.extract_strided_slice %50 {offsets = [0, 64], sizes = [32, 32], strides = [1, 1]} : vector<32x96xf32> to vector<32x32xf32>
    %54 = vector.extract_strided_slice %13 {offsets = [0, 0], sizes = [32, 32], strides = [1, 1]} : vector<64x32xbf16> to vector<32x32xbf16>
    %55 = vector.extract_strided_slice %51 {offsets = [0, 0], sizes = [16, 16], strides = [1, 1]} : vector<32x32xf32> to vector<16x16xf32>
    %56 = vector.extract_strided_slice %52 {offsets = [0, 0], sizes = [16, 16], strides = [1, 1]} : vector<32x32xf32> to vector<16x16xf32>
    %57 = vector.extract_strided_slice %53 {offsets = [0, 0], sizes = [16, 16], strides = [1, 1]} : vector<32x32xf32> to vector<16x16xf32>
    %58 = arith.truncf %55 : vector<16x16xf32> to vector<16x16xbf16>
    %59 = arith.truncf %56 : vector<16x16xf32> to vector<16x16xbf16>
    %cst_37 = arith.constant dense<0.000000e+00> : vector<16x16xf32>
    %60 = tpu.matmul %58, %59, %cst_37 {dimension_numbers = #tpu.dot_dimension_numbers<[1], [1], [0], [0], [0, 0, 1, 0], [], []>} : vector<16x16xbf16>, vector<16x16xbf16>, vector<16x16xf32> -> vector<16x16xf32>
    %cst_38 = arith.constant 2.500000e-01 : f32
    %61 = vector.broadcast %cst_38 : f32 to vector<16x16xf32>
    %62 = arith.mulf %60, %61 : vector<16x16xf32>
    %cst_39 = arith.constant dense<0xFF800000> : vector<16xf32>
    %63 = vector.multi_reduction <maximumf>, %62, %cst_39 [1] : vector<16x16xf32> to vector<16xf32>
    %64 = vector.shape_cast %63 : vector<16xf32> to vector<16x1xf32>
    %65 = vector.broadcast %64 : vector<16x1xf32> to vector<16x16xf32>
    %66 = arith.subf %62, %65 : vector<16x16xf32>
    %67 = math.exp %66 : vector<16x16xf32>
    %cst_40 = arith.constant dense<0.000000e+00> : vector<16xf32>
    %68 = vector.multi_reduction <add>, %67, %cst_40 [1] : vector<16x16xf32> to vector<16xf32>
    %69 = vector.shape_cast %68 : vector<16xf32> to vector<16x1xf32>
    %70 = tpu.reciprocal %69 {approx = true} : vector<16x1xf32> -> vector<16x1xf32>
    %71 = vector.broadcast %70 : vector<16x1xf32> to vector<16x16xf32>
    %72 = arith.mulf %67, %71 : vector<16x16xf32>
    %73 = arith.truncf %72 : vector<16x16xf32> to vector<16x16xbf16>
    %74 = arith.truncf %57 : vector<16x16xf32> to vector<16x16xbf16>
    %cst_41 = arith.constant dense<0.000000e+00> : vector<16x16xf32>
    %75 = tpu.matmul %73, %74, %cst_41 {dimension_numbers = #tpu.dot_dimension_numbers<[1], [0], [0], [1], [0, 0, 1, 1], [], []>} : vector<16x16xbf16>, vector<16x16xbf16>, vector<16x16xf32> -> vector<16x16xf32>
    %76 = vector.extract_strided_slice %54 {offsets = [0, 0], sizes = [16, 32], strides = [1, 1]} : vector<32x32xbf16> to vector<16x32xbf16>
    %77 = arith.truncf %75 : vector<16x16xf32> to vector<16x16xbf16>
    %cst_42 = arith.constant dense<0.000000e+00> : vector<16x32xf32>
    %78 = tpu.matmul %77, %76, %cst_42 {dimension_numbers = #tpu.dot_dimension_numbers<[1], [0], [0], [1], [0, 0, 1, 1], [], []>} : vector<16x16xbf16>, vector<16x32xbf16>, vector<16x32xf32> -> vector<16x32xf32>
    %79 = vector.extract_strided_slice %51 {offsets = [0, 16], sizes = [16, 16], strides = [1, 1]} : vector<32x32xf32> to vector<16x16xf32>
    %80 = vector.extract_strided_slice %52 {offsets = [0, 16], sizes = [16, 16], strides = [1, 1]} : vector<32x32xf32> to vector<16x16xf32>
    %81 = vector.extract_strided_slice %53 {offsets = [0, 16], sizes = [16, 16], strides = [1, 1]} : vector<32x32xf32> to vector<16x16xf32>
    %82 = arith.truncf %79 : vector<16x16xf32> to vector<16x16xbf16>
    %83 = arith.truncf %80 : vector<16x16xf32> to vector<16x16xbf16>
    %cst_43 = arith.constant dense<0.000000e+00> : vector<16x16xf32>
    %84 = tpu.matmul %82, %83, %cst_43 {dimension_numbers = #tpu.dot_dimension_numbers<[1], [1], [0], [0], [0, 0, 1, 0], [], []>} : vector<16x16xbf16>, vector<16x16xbf16>, vector<16x16xf32> -> vector<16x16xf32>
    %cst_44 = arith.constant 2.500000e-01 : f32
    %85 = vector.broadcast %cst_44 : f32 to vector<16x16xf32>
    %86 = arith.mulf %84, %85 : vector<16x16xf32>
    %cst_45 = arith.constant dense<0xFF800000> : vector<16xf32>
    %87 = vector.multi_reduction <maximumf>, %86, %cst_45 [1] : vector<16x16xf32> to vector<16xf32>
    %88 = vector.shape_cast %87 : vector<16xf32> to vector<16x1xf32>
    %89 = vector.broadcast %88 : vector<16x1xf32> to vector<16x16xf32>
    %90 = arith.subf %86, %89 : vector<16x16xf32>
    %91 = math.exp %90 : vector<16x16xf32>
    %cst_46 = arith.constant dense<0.000000e+00> : vector<16xf32>
    %92 = vector.multi_reduction <add>, %91, %cst_46 [1] : vector<16x16xf32> to vector<16xf32>
    %93 = vector.shape_cast %92 : vector<16xf32> to vector<16x1xf32>
    %94 = tpu.reciprocal %93 {approx = true} : vector<16x1xf32> -> vector<16x1xf32>
    %95 = vector.broadcast %94 : vector<16x1xf32> to vector<16x16xf32>
    %96 = arith.mulf %91, %95 : vector<16x16xf32>
    %97 = arith.truncf %96 : vector<16x16xf32> to vector<16x16xbf16>
    %98 = arith.truncf %81 : vector<16x16xf32> to vector<16x16xbf16>
    %cst_47 = arith.constant dense<0.000000e+00> : vector<16x16xf32>
    %99 = tpu.matmul %97, %98, %cst_47 {dimension_numbers = #tpu.dot_dimension_numbers<[1], [0], [0], [1], [0, 0, 1, 1], [], []>} : vector<16x16xbf16>, vector<16x16xbf16>, vector<16x16xf32> -> vector<16x16xf32>
    %100 = vector.extract_strided_slice %54 {offsets = [16, 0], sizes = [16, 32], strides = [1, 1]} : vector<32x32xbf16> to vector<16x32xbf16>
    %101 = arith.truncf %99 : vector<16x16xf32> to vector<16x16xbf16>
    %cst_48 = arith.constant dense<0.000000e+00> : vector<16x32xf32>
    %102 = tpu.matmul %101, %100, %cst_48 {dimension_numbers = #tpu.dot_dimension_numbers<[1], [0], [0], [1], [0, 0, 1, 1], [], []>} : vector<16x16xbf16>, vector<16x32xbf16>, vector<16x32xf32> -> vector<16x32xf32>
    %103 = arith.addf %78, %102 : vector<16x32xf32>
    %104 = vector.extract_strided_slice %51 {offsets = [16, 0], sizes = [16, 16], strides = [1, 1]} : vector<32x32xf32> to vector<16x16xf32>
    %105 = vector.extract_strided_slice %52 {offsets = [16, 0], sizes = [16, 16], strides = [1, 1]} : vector<32x32xf32> to vector<16x16xf32>
    %106 = vector.extract_strided_slice %53 {offsets = [16, 0], sizes = [16, 16], strides = [1, 1]} : vector<32x32xf32> to vector<16x16xf32>
    %107 = arith.truncf %104 : vector<16x16xf32> to vector<16x16xbf16>
    %108 = arith.truncf %105 : vector<16x16xf32> to vector<16x16xbf16>
    %cst_49 = arith.constant dense<0.000000e+00> : vector<16x16xf32>
    %109 = tpu.matmul %107, %108, %cst_49 {dimension_numbers = #tpu.dot_dimension_numbers<[1], [1], [0], [0], [0, 0, 1, 0], [], []>} : vector<16x16xbf16>, vector<16x16xbf16>, vector<16x16xf32> -> vector<16x16xf32>
    %cst_50 = arith.constant 2.500000e-01 : f32
    %110 = vector.broadcast %cst_50 : f32 to vector<16x16xf32>
    %111 = arith.mulf %109, %110 : vector<16x16xf32>
    %cst_51 = arith.constant dense<0xFF800000> : vector<16xf32>
    %112 = vector.multi_reduction <maximumf>, %111, %cst_51 [1] : vector<16x16xf32> to vector<16xf32>
    %113 = vector.shape_cast %112 : vector<16xf32> to vector<16x1xf32>
    %114 = vector.broadcast %113 : vector<16x1xf32> to vector<16x16xf32>
    %115 = arith.subf %111, %114 : vector<16x16xf32>
    %116 = math.exp %115 : vector<16x16xf32>
    %cst_52 = arith.constant dense<0.000000e+00> : vector<16xf32>
    %117 = vector.multi_reduction <add>, %116, %cst_52 [1] : vector<16x16xf32> to vector<16xf32>
    %118 = vector.shape_cast %117 : vector<16xf32> to vector<16x1xf32>
    %119 = tpu.reciprocal %118 {approx = true} : vector<16x1xf32> -> vector<16x1xf32>
    %120 = vector.broadcast %119 : vector<16x1xf32> to vector<16x16xf32>
    %121 = arith.mulf %116, %120 : vector<16x16xf32>
    %122 = arith.truncf %121 : vector<16x16xf32> to vector<16x16xbf16>
    %123 = arith.truncf %106 : vector<16x16xf32> to vector<16x16xbf16>
    %cst_53 = arith.constant dense<0.000000e+00> : vector<16x16xf32>
    %124 = tpu.matmul %122, %123, %cst_53 {dimension_numbers = #tpu.dot_dimension_numbers<[1], [0], [0], [1], [0, 0, 1, 1], [], []>} : vector<16x16xbf16>, vector<16x16xbf16>, vector<16x16xf32> -> vector<16x16xf32>
    %125 = vector.extract_strided_slice %54 {offsets = [0, 0], sizes = [16, 32], strides = [1, 1]} : vector<32x32xbf16> to vector<16x32xbf16>
    %126 = arith.truncf %124 : vector<16x16xf32> to vector<16x16xbf16>
    %cst_54 = arith.constant dense<0.000000e+00> : vector<16x32xf32>
    %127 = tpu.matmul %126, %125, %cst_54 {dimension_numbers = #tpu.dot_dimension_numbers<[1], [0], [0], [1], [0, 0, 1, 1], [], []>} : vector<16x16xbf16>, vector<16x32xbf16>, vector<16x32xf32> -> vector<16x32xf32>
    %128 = vector.extract_strided_slice %51 {offsets = [16, 16], sizes = [16, 16], strides = [1, 1]} : vector<32x32xf32> to vector<16x16xf32>
    %129 = vector.extract_strided_slice %52 {offsets = [16, 16], sizes = [16, 16], strides = [1, 1]} : vector<32x32xf32> to vector<16x16xf32>
    %130 = vector.extract_strided_slice %53 {offsets = [16, 16], sizes = [16, 16], strides = [1, 1]} : vector<32x32xf32> to vector<16x16xf32>
    %131 = arith.truncf %128 : vector<16x16xf32> to vector<16x16xbf16>
    %132 = arith.truncf %129 : vector<16x16xf32> to vector<16x16xbf16>
    %cst_55 = arith.constant dense<0.000000e+00> : vector<16x16xf32>
    %133 = tpu.matmul %131, %132, %cst_55 {dimension_numbers = #tpu.dot_dimension_numbers<[1], [1], [0], [0], [0, 0, 1, 0], [], []>} : vector<16x16xbf16>, vector<16x16xbf16>, vector<16x16xf32> -> vector<16x16xf32>
    %cst_56 = arith.constant 2.500000e-01 : f32
    %134 = vector.broadcast %cst_56 : f32 to vector<16x16xf32>
    %135 = arith.mulf %133, %134 : vector<16x16xf32>
    %cst_57 = arith.constant dense<0xFF800000> : vector<16xf32>
    %136 = vector.multi_reduction <maximumf>, %135, %cst_57 [1] : vector<16x16xf32> to vector<16xf32>
    %137 = vector.shape_cast %136 : vector<16xf32> to vector<16x1xf32>
    %138 = vector.broadcast %137 : vector<16x1xf32> to vector<16x16xf32>
    %139 = arith.subf %135, %138 : vector<16x16xf32>
    %140 = math.exp %139 : vector<16x16xf32>
    %cst_58 = arith.constant dense<0.000000e+00> : vector<16xf32>
    %141 = vector.multi_reduction <add>, %140, %cst_58 [1] : vector<16x16xf32> to vector<16xf32>
    %142 = vector.shape_cast %141 : vector<16xf32> to vector<16x1xf32>
    %143 = tpu.reciprocal %142 {approx = true} : vector<16x1xf32> -> vector<16x1xf32>
    %144 = vector.broadcast %143 : vector<16x1xf32> to vector<16x16xf32>
    %145 = arith.mulf %140, %144 : vector<16x16xf32>
    %146 = arith.truncf %145 : vector<16x16xf32> to vector<16x16xbf16>
    %147 = arith.truncf %130 : vector<16x16xf32> to vector<16x16xbf16>
    %cst_59 = arith.constant dense<0.000000e+00> : vector<16x16xf32>
    %148 = tpu.matmul %146, %147, %cst_59 {dimension_numbers = #tpu.dot_dimension_numbers<[1], [0], [0], [1], [0, 0, 1, 1], [], []>} : vector<16x16xbf16>, vector<16x16xbf16>, vector<16x16xf32> -> vector<16x16xf32>
    %149 = vector.extract_strided_slice %54 {offsets = [16, 0], sizes = [16, 32], strides = [1, 1]} : vector<32x32xbf16> to vector<16x32xbf16>
    %150 = arith.truncf %148 : vector<16x16xf32> to vector<16x16xbf16>
    %cst_60 = arith.constant dense<0.000000e+00> : vector<16x32xf32>
    %151 = tpu.matmul %150, %149, %cst_60 {dimension_numbers = #tpu.dot_dimension_numbers<[1], [0], [0], [1], [0, 0, 1, 1], [], []>} : vector<16x16xbf16>, vector<16x32xbf16>, vector<16x32xf32> -> vector<16x32xf32>
    %152 = arith.addf %127, %151 : vector<16x32xf32>
    %153 = tpu.concatenate %103, %152 in 0 : vector<16x32xf32>, vector<16x32xf32> -> vector<32x32xf32>
    %154 = arith.addf %8, %153 : vector<32x32xf32>
    %155 = vector.extract_strided_slice %14 {offsets = [0, 0], sizes = [1, 32], strides = [1, 1]} : vector<2x32xf32> to vector<1x32xf32>
    %156 = vector.broadcast %155 : vector<1x32xf32> to vector<32x32xf32>
    %157 = arith.addf %154, %156 : vector<32x32xf32>
    %158 = vector.extract_strided_slice %15 {offsets = [0, 0], sizes = [1, 32], strides = [1, 1]} : vector<2x32xf32> to vector<1x32xf32>
    %159 = vector.extract_strided_slice %16 {offsets = [0, 0], sizes = [1, 32], strides = [1, 1]} : vector<2x32xf32> to vector<1x32xf32>
    %cst_61 = arith.constant dense<0.000000e+00> : vector<32xf32>
    %160 = vector.multi_reduction <add>, %157, %cst_61 [1] : vector<32x32xf32> to vector<32xf32>
    %161 = vector.shape_cast %160 : vector<32xf32> to vector<32x1xf32>
    %cst_62 = arith.constant 3.200000e+01 : f32
    %162 = vector.broadcast %cst_62 : f32 to vector<32x1xf32>
    %163 = arith.divf %161, %162 : vector<32x1xf32>
    %164 = vector.broadcast %163 : vector<32x1xf32> to vector<32x32xf32>
    %165 = arith.subf %157, %164 : vector<32x32xf32>
    %166 = arith.mulf %165, %165 : vector<32x32xf32>
    %cst_63 = arith.constant dense<0.000000e+00> : vector<32xf32>
    %167 = vector.multi_reduction <add>, %166, %cst_63 [1] : vector<32x32xf32> to vector<32xf32>
    %168 = vector.shape_cast %167 : vector<32xf32> to vector<32x1xf32>
    %cst_64 = arith.constant 3.200000e+01 : f32
    %169 = vector.broadcast %cst_64 : f32 to vector<32x1xf32>
    %170 = arith.divf %168, %169 : vector<32x1xf32>
    %171 = vector.broadcast %163 : vector<32x1xf32> to vector<32x32xf32>
    %172 = arith.subf %157, %171 : vector<32x32xf32>
    %cst_65 = arith.constant 9.99999974E-6 : f32
    %173 = vector.broadcast %cst_65 : f32 to vector<32x1xf32>
    %174 = arith.addf %170, %173 : vector<32x1xf32>
    %175 = math.rsqrt %174 : vector<32x1xf32>
    %176 = vector.broadcast %175 : vector<32x1xf32> to vector<32x32xf32>
    %177 = arith.mulf %172, %176 : vector<32x32xf32>
    %178 = vector.broadcast %158 : vector<1x32xf32> to vector<32x32xf32>
    %179 = arith.mulf %177, %178 : vector<32x32xf32>
    %180 = vector.broadcast %159 : vector<1x32xf32> to vector<32x32xf32>
    %181 = arith.addf %179, %180 : vector<32x32xf32>
    %182 = vector.extract_strided_slice %17 {offsets = [0, 0], sizes = [32, 128], strides = [1, 1]} : vector<64x128xbf16> to vector<32x128xbf16>
    %183 = arith.truncf %181 : vector<32x32xf32> to vector<32x32xbf16>
    %cst_66 = arith.constant dense<0.000000e+00> : vector<32x128xf32>
    %184 = tpu.matmul %183, %182, %cst_66 {dimension_numbers = #tpu.dot_dimension_numbers<[1], [0], [0], [1], [0, 0, 1, 1], [], []>} : vector<32x32xbf16>, vector<32x128xbf16>, vector<32x128xf32> -> vector<32x128xf32>
    %185 = vector.extract_strided_slice %18 {offsets = [0, 0], sizes = [1, 128], strides = [1, 1]} : vector<2x128xf32> to vector<1x128xf32>
    %186 = vector.broadcast %185 : vector<1x128xf32> to vector<32x128xf32>
    %187 = arith.addf %184, %186 : vector<32x128xf32>
    %cst_67 = arith.constant 5.000000e-01 : f32
    %188 = vector.broadcast %cst_67 : f32 to vector<32x128xf32>
    %189 = arith.mulf %188, %187 : vector<32x128xf32>
    %cst_68 = arith.constant 0.707106769 : f32
    %190 = vector.broadcast %cst_68 : f32 to vector<32x128xf32>
    %191 = arith.mulf %187, %190 : vector<32x128xf32>
    %cst_69 = arith.constant 0.000000e+00 : f32
    %192 = vector.broadcast %cst_69 : f32 to vector<32x128xf32>
    %193 = arith.cmpf oge, %191, %192 : vector<32x128xf32>
    %cst_70 = arith.constant 1.000000e+00 : f32
    %cst_71 = arith.constant -1.000000e+00 : f32
    %194 = vector.broadcast %cst_70 : f32 to vector<32x128xf32>
    %195 = vector.broadcast %cst_71 : f32 to vector<32x128xf32>
    %196 = arith.select %193, %194, %195 : vector<32x128xi1>, vector<32x128xf32>
    %197 = math.absf %191 : vector<32x128xf32>
    %cst_72 = arith.constant 0.327591091 : f32
    %198 = vector.broadcast %cst_72 : f32 to vector<32x128xf32>
    %199 = arith.mulf %198, %197 : vector<32x128xf32>
    %cst_73 = arith.constant 1.000000e+00 : f32
    %200 = vector.broadcast %cst_73 : f32 to vector<32x128xf32>
    %201 = arith.addf %200, %199 : vector<32x128xf32>
    %cst_74 = arith.constant 1.000000e+00 : f32
    %202 = vector.broadcast %cst_74 : f32 to vector<32x128xf32>
    %203 = arith.divf %202, %201 : vector<32x128xf32>
    %cst_75 = arith.constant 1.06140542 : f32
    %204 = vector.broadcast %cst_75 : f32 to vector<32x128xf32>
    %205 = arith.mulf %204, %203 : vector<32x128xf32>
    %cst_76 = arith.constant -1.45315206 : f32
    %206 = vector.broadcast %cst_76 : f32 to vector<32x128xf32>
    %207 = arith.addf %205, %206 : vector<32x128xf32>
    %208 = arith.mulf %207, %203 : vector<32x128xf32>
    %cst_77 = arith.constant 1.42141378 : f32
    %209 = vector.broadcast %cst_77 : f32 to vector<32x128xf32>
    %210 = arith.addf %208, %209 : vector<32x128xf32>
    %211 = arith.mulf %210, %203 : vector<32x128xf32>
    %cst_78 = arith.constant -0.284496725 : f32
    %212 = vector.broadcast %cst_78 : f32 to vector<32x128xf32>
    %213 = arith.addf %211, %212 : vector<32x128xf32>
    %214 = arith.mulf %213, %203 : vector<32x128xf32>
    %cst_79 = arith.constant 0.254829586 : f32
    %215 = vector.broadcast %cst_79 : f32 to vector<32x128xf32>
    %216 = arith.addf %214, %215 : vector<32x128xf32>
    %217 = arith.mulf %216, %203 : vector<32x128xf32>
    %cst_80 = arith.constant 0.000000e+00 : f32
    %218 = vector.broadcast %cst_80 : f32 to vector<32x128xf32>
    %219 = arith.subf %218, %197 : vector<32x128xf32>
    %220 = arith.mulf %219, %197 : vector<32x128xf32>
    %221 = math.exp %220 : vector<32x128xf32>
    %222 = arith.mulf %217, %221 : vector<32x128xf32>
    %cst_81 = arith.constant 1.000000e+00 : f32
    %223 = vector.broadcast %cst_81 : f32 to vector<32x128xf32>
    %224 = arith.subf %223, %222 : vector<32x128xf32>
    %225 = arith.mulf %196, %224 : vector<32x128xf32>
    %cst_82 = arith.constant 1.000000e+00 : f32
    %226 = vector.broadcast %cst_82 : f32 to vector<32x128xf32>
    %227 = arith.addf %226, %225 : vector<32x128xf32>
    %228 = arith.mulf %189, %227 : vector<32x128xf32>
    %229 = vector.extract_strided_slice %19 {offsets = [0, 0], sizes = [128, 32], strides = [1, 1]} : vector<256x32xbf16> to vector<128x32xbf16>
    %230 = arith.truncf %228 : vector<32x128xf32> to vector<32x128xbf16>
    %cst_83 = arith.constant dense<0.000000e+00> : vector<32x32xf32>
    %231 = tpu.matmul %230, %229, %cst_83 {dimension_numbers = #tpu.dot_dimension_numbers<[1], [0], [0], [1], [0, 0, 1, 1], [], []>} : vector<32x128xbf16>, vector<128x32xbf16>, vector<32x32xf32> -> vector<32x32xf32>
    %232 = vector.extract_strided_slice %20 {offsets = [0, 0], sizes = [1, 32], strides = [1, 1]} : vector<2x32xf32> to vector<1x32xf32>
    %233 = vector.broadcast %232 : vector<1x32xf32> to vector<32x32xf32>
    %234 = arith.addf %231, %233 : vector<32x32xf32>
    %235 = arith.addf %157, %234 : vector<32x32xf32>
    %236 = vector.extract_strided_slice %9 {offsets = [1, 0], sizes = [1, 32], strides = [1, 1]} : vector<2x32xf32> to vector<1x32xf32>
    %237 = vector.extract_strided_slice %10 {offsets = [1, 0], sizes = [1, 32], strides = [1, 1]} : vector<2x32xf32> to vector<1x32xf32>
    %cst_84 = arith.constant dense<0.000000e+00> : vector<32xf32>
    %238 = vector.multi_reduction <add>, %235, %cst_84 [1] : vector<32x32xf32> to vector<32xf32>
    %239 = vector.shape_cast %238 : vector<32xf32> to vector<32x1xf32>
    %cst_85 = arith.constant 3.200000e+01 : f32
    %240 = vector.broadcast %cst_85 : f32 to vector<32x1xf32>
    %241 = arith.divf %239, %240 : vector<32x1xf32>
    %242 = vector.broadcast %241 : vector<32x1xf32> to vector<32x32xf32>
    %243 = arith.subf %235, %242 : vector<32x32xf32>
    %244 = arith.mulf %243, %243 : vector<32x32xf32>
    %cst_86 = arith.constant dense<0.000000e+00> : vector<32xf32>
    %245 = vector.multi_reduction <add>, %244, %cst_86 [1] : vector<32x32xf32> to vector<32xf32>
    %246 = vector.shape_cast %245 : vector<32xf32> to vector<32x1xf32>
    %cst_87 = arith.constant 3.200000e+01 : f32
    %247 = vector.broadcast %cst_87 : f32 to vector<32x1xf32>
    %248 = arith.divf %246, %247 : vector<32x1xf32>
    %249 = vector.broadcast %241 : vector<32x1xf32> to vector<32x32xf32>
    %250 = arith.subf %235, %249 : vector<32x32xf32>
    %cst_88 = arith.constant 9.99999974E-6 : f32
    %251 = vector.broadcast %cst_88 : f32 to vector<32x1xf32>
    %252 = arith.addf %248, %251 : vector<32x1xf32>
    %253 = math.rsqrt %252 : vector<32x1xf32>
    %254 = vector.broadcast %253 : vector<32x1xf32> to vector<32x32xf32>
    %255 = arith.mulf %250, %254 : vector<32x32xf32>
    %256 = vector.broadcast %236 : vector<1x32xf32> to vector<32x32xf32>
    %257 = arith.mulf %255, %256 : vector<32x32xf32>
    %258 = vector.broadcast %237 : vector<1x32xf32> to vector<32x32xf32>
    %259 = arith.addf %257, %258 : vector<32x32xf32>
    %260 = vector.extract_strided_slice %11 {offsets = [32, 0], sizes = [32, 96], strides = [1, 1]} : vector<64x96xbf16> to vector<32x96xbf16>
    %261 = arith.truncf %259 : vector<32x32xf32> to vector<32x32xbf16>
    %cst_89 = arith.constant dense<0.000000e+00> : vector<32x96xf32>
    %262 = tpu.matmul %261, %260, %cst_89 {dimension_numbers = #tpu.dot_dimension_numbers<[1], [0], [0], [1], [0, 0, 1, 1], [], []>} : vector<32x32xbf16>, vector<32x96xbf16>, vector<32x96xf32> -> vector<32x96xf32>
    %263 = vector.extract_strided_slice %12 {offsets = [1, 0], sizes = [1, 96], strides = [1, 1]} : vector<2x96xf32> to vector<1x96xf32>
    %264 = vector.broadcast %263 : vector<1x96xf32> to vector<32x96xf32>
    %265 = arith.addf %262, %264 : vector<32x96xf32>
    %266 = vector.extract_strided_slice %265 {offsets = [0, 0], sizes = [32, 32], strides = [1, 1]} : vector<32x96xf32> to vector<32x32xf32>
    %267 = vector.extract_strided_slice %265 {offsets = [0, 32], sizes = [32, 32], strides = [1, 1]} : vector<32x96xf32> to vector<32x32xf32>
    %268 = vector.extract_strided_slice %265 {offsets = [0, 64], sizes = [32, 32], strides = [1, 1]} : vector<32x96xf32> to vector<32x32xf32>
    %269 = vector.extract_strided_slice %13 {offsets = [32, 0], sizes = [32, 32], strides = [1, 1]} : vector<64x32xbf16> to vector<32x32xbf16>
    %270 = vector.extract_strided_slice %266 {offsets = [0, 0], sizes = [16, 16], strides = [1, 1]} : vector<32x32xf32> to vector<16x16xf32>
    %271 = vector.extract_strided_slice %267 {offsets = [0, 0], sizes = [16, 16], strides = [1, 1]} : vector<32x32xf32> to vector<16x16xf32>
    %272 = vector.extract_strided_slice %268 {offsets = [0, 0], sizes = [16, 16], strides = [1, 1]} : vector<32x32xf32> to vector<16x16xf32>
    %273 = arith.truncf %270 : vector<16x16xf32> to vector<16x16xbf16>
    %274 = arith.truncf %271 : vector<16x16xf32> to vector<16x16xbf16>
    %cst_90 = arith.constant dense<0.000000e+00> : vector<16x16xf32>
    %275 = tpu.matmul %273, %274, %cst_90 {dimension_numbers = #tpu.dot_dimension_numbers<[1], [1], [0], [0], [0, 0, 1, 0], [], []>} : vector<16x16xbf16>, vector<16x16xbf16>, vector<16x16xf32> -> vector<16x16xf32>
    %cst_91 = arith.constant 2.500000e-01 : f32
    %276 = vector.broadcast %cst_91 : f32 to vector<16x16xf32>
    %277 = arith.mulf %275, %276 : vector<16x16xf32>
    %cst_92 = arith.constant dense<0xFF800000> : vector<16xf32>
    %278 = vector.multi_reduction <maximumf>, %277, %cst_92 [1] : vector<16x16xf32> to vector<16xf32>
    %279 = vector.shape_cast %278 : vector<16xf32> to vector<16x1xf32>
    %280 = vector.broadcast %279 : vector<16x1xf32> to vector<16x16xf32>
    %281 = arith.subf %277, %280 : vector<16x16xf32>
    %282 = math.exp %281 : vector<16x16xf32>
    %cst_93 = arith.constant dense<0.000000e+00> : vector<16xf32>
    %283 = vector.multi_reduction <add>, %282, %cst_93 [1] : vector<16x16xf32> to vector<16xf32>
    %284 = vector.shape_cast %283 : vector<16xf32> to vector<16x1xf32>
    %285 = tpu.reciprocal %284 {approx = true} : vector<16x1xf32> -> vector<16x1xf32>
    %286 = vector.broadcast %285 : vector<16x1xf32> to vector<16x16xf32>
    %287 = arith.mulf %282, %286 : vector<16x16xf32>
    %288 = arith.truncf %287 : vector<16x16xf32> to vector<16x16xbf16>
    %289 = arith.truncf %272 : vector<16x16xf32> to vector<16x16xbf16>
    %cst_94 = arith.constant dense<0.000000e+00> : vector<16x16xf32>
    %290 = tpu.matmul %288, %289, %cst_94 {dimension_numbers = #tpu.dot_dimension_numbers<[1], [0], [0], [1], [0, 0, 1, 1], [], []>} : vector<16x16xbf16>, vector<16x16xbf16>, vector<16x16xf32> -> vector<16x16xf32>
    %291 = vector.extract_strided_slice %269 {offsets = [0, 0], sizes = [16, 32], strides = [1, 1]} : vector<32x32xbf16> to vector<16x32xbf16>
    %292 = arith.truncf %290 : vector<16x16xf32> to vector<16x16xbf16>
    %cst_95 = arith.constant dense<0.000000e+00> : vector<16x32xf32>
    %293 = tpu.matmul %292, %291, %cst_95 {dimension_numbers = #tpu.dot_dimension_numbers<[1], [0], [0], [1], [0, 0, 1, 1], [], []>} : vector<16x16xbf16>, vector<16x32xbf16>, vector<16x32xf32> -> vector<16x32xf32>
    %294 = vector.extract_strided_slice %266 {offsets = [0, 16], sizes = [16, 16], strides = [1, 1]} : vector<32x32xf32> to vector<16x16xf32>
    %295 = vector.extract_strided_slice %267 {offsets = [0, 16], sizes = [16, 16], strides = [1, 1]} : vector<32x32xf32> to vector<16x16xf32>
    %296 = vector.extract_strided_slice %268 {offsets = [0, 16], sizes = [16, 16], strides = [1, 1]} : vector<32x32xf32> to vector<16x16xf32>
    %297 = arith.truncf %294 : vector<16x16xf32> to vector<16x16xbf16>
    %298 = arith.truncf %295 : vector<16x16xf32> to vector<16x16xbf16>
    %cst_96 = arith.constant dense<0.000000e+00> : vector<16x16xf32>
    %299 = tpu.matmul %297, %298, %cst_96 {dimension_numbers = #tpu.dot_dimension_numbers<[1], [1], [0], [0], [0, 0, 1, 0], [], []>} : vector<16x16xbf16>, vector<16x16xbf16>, vector<16x16xf32> -> vector<16x16xf32>
    %cst_97 = arith.constant 2.500000e-01 : f32
    %300 = vector.broadcast %cst_97 : f32 to vector<16x16xf32>
    %301 = arith.mulf %299, %300 : vector<16x16xf32>
    %cst_98 = arith.constant dense<0xFF800000> : vector<16xf32>
    %302 = vector.multi_reduction <maximumf>, %301, %cst_98 [1] : vector<16x16xf32> to vector<16xf32>
    %303 = vector.shape_cast %302 : vector<16xf32> to vector<16x1xf32>
    %304 = vector.broadcast %303 : vector<16x1xf32> to vector<16x16xf32>
    %305 = arith.subf %301, %304 : vector<16x16xf32>
    %306 = math.exp %305 : vector<16x16xf32>
    %cst_99 = arith.constant dense<0.000000e+00> : vector<16xf32>
    %307 = vector.multi_reduction <add>, %306, %cst_99 [1] : vector<16x16xf32> to vector<16xf32>
    %308 = vector.shape_cast %307 : vector<16xf32> to vector<16x1xf32>
    %309 = tpu.reciprocal %308 {approx = true} : vector<16x1xf32> -> vector<16x1xf32>
    %310 = vector.broadcast %309 : vector<16x1xf32> to vector<16x16xf32>
    %311 = arith.mulf %306, %310 : vector<16x16xf32>
    %312 = arith.truncf %311 : vector<16x16xf32> to vector<16x16xbf16>
    %313 = arith.truncf %296 : vector<16x16xf32> to vector<16x16xbf16>
    %cst_100 = arith.constant dense<0.000000e+00> : vector<16x16xf32>
    %314 = tpu.matmul %312, %313, %cst_100 {dimension_numbers = #tpu.dot_dimension_numbers<[1], [0], [0], [1], [0, 0, 1, 1], [], []>} : vector<16x16xbf16>, vector<16x16xbf16>, vector<16x16xf32> -> vector<16x16xf32>
    %315 = vector.extract_strided_slice %269 {offsets = [16, 0], sizes = [16, 32], strides = [1, 1]} : vector<32x32xbf16> to vector<16x32xbf16>
    %316 = arith.truncf %314 : vector<16x16xf32> to vector<16x16xbf16>
    %cst_101 = arith.constant dense<0.000000e+00> : vector<16x32xf32>
    %317 = tpu.matmul %316, %315, %cst_101 {dimension_numbers = #tpu.dot_dimension_numbers<[1], [0], [0], [1], [0, 0, 1, 1], [], []>} : vector<16x16xbf16>, vector<16x32xbf16>, vector<16x32xf32> -> vector<16x32xf32>
    %318 = arith.addf %293, %317 : vector<16x32xf32>
    %319 = vector.extract_strided_slice %266 {offsets = [16, 0], sizes = [16, 16], strides = [1, 1]} : vector<32x32xf32> to vector<16x16xf32>
    %320 = vector.extract_strided_slice %267 {offsets = [16, 0], sizes = [16, 16], strides = [1, 1]} : vector<32x32xf32> to vector<16x16xf32>
    %321 = vector.extract_strided_slice %268 {offsets = [16, 0], sizes = [16, 16], strides = [1, 1]} : vector<32x32xf32> to vector<16x16xf32>
    %322 = arith.truncf %319 : vector<16x16xf32> to vector<16x16xbf16>
    %323 = arith.truncf %320 : vector<16x16xf32> to vector<16x16xbf16>
    %cst_102 = arith.constant dense<0.000000e+00> : vector<16x16xf32>
    %324 = tpu.matmul %322, %323, %cst_102 {dimension_numbers = #tpu.dot_dimension_numbers<[1], [1], [0], [0], [0, 0, 1, 0], [], []>} : vector<16x16xbf16>, vector<16x16xbf16>, vector<16x16xf32> -> vector<16x16xf32>
    %cst_103 = arith.constant 2.500000e-01 : f32
    %325 = vector.broadcast %cst_103 : f32 to vector<16x16xf32>
    %326 = arith.mulf %324, %325 : vector<16x16xf32>
    %cst_104 = arith.constant dense<0xFF800000> : vector<16xf32>
    %327 = vector.multi_reduction <maximumf>, %326, %cst_104 [1] : vector<16x16xf32> to vector<16xf32>
    %328 = vector.shape_cast %327 : vector<16xf32> to vector<16x1xf32>
    %329 = vector.broadcast %328 : vector<16x1xf32> to vector<16x16xf32>
    %330 = arith.subf %326, %329 : vector<16x16xf32>
    %331 = math.exp %330 : vector<16x16xf32>
    %cst_105 = arith.constant dense<0.000000e+00> : vector<16xf32>
    %332 = vector.multi_reduction <add>, %331, %cst_105 [1] : vector<16x16xf32> to vector<16xf32>
    %333 = vector.shape_cast %332 : vector<16xf32> to vector<16x1xf32>
    %334 = tpu.reciprocal %333 {approx = true} : vector<16x1xf32> -> vector<16x1xf32>
    %335 = vector.broadcast %334 : vector<16x1xf32> to vector<16x16xf32>
    %336 = arith.mulf %331, %335 : vector<16x16xf32>
    %337 = arith.truncf %336 : vector<16x16xf32> to vector<16x16xbf16>
    %338 = arith.truncf %321 : vector<16x16xf32> to vector<16x16xbf16>
    %cst_106 = arith.constant dense<0.000000e+00> : vector<16x16xf32>
    %339 = tpu.matmul %337, %338, %cst_106 {dimension_numbers = #tpu.dot_dimension_numbers<[1], [0], [0], [1], [0, 0, 1, 1], [], []>} : vector<16x16xbf16>, vector<16x16xbf16>, vector<16x16xf32> -> vector<16x16xf32>
    %340 = vector.extract_strided_slice %269 {offsets = [0, 0], sizes = [16, 32], strides = [1, 1]} : vector<32x32xbf16> to vector<16x32xbf16>
    %341 = arith.truncf %339 : vector<16x16xf32> to vector<16x16xbf16>
    %cst_107 = arith.constant dense<0.000000e+00> : vector<16x32xf32>
    %342 = tpu.matmul %341, %340, %cst_107 {dimension_numbers = #tpu.dot_dimension_numbers<[1], [0], [0], [1], [0, 0, 1, 1], [], []>} : vector<16x16xbf16>, vector<16x32xbf16>, vector<16x32xf32> -> vector<16x32xf32>
    %343 = vector.extract_strided_slice %266 {offsets = [16, 16], sizes = [16, 16], strides = [1, 1]} : vector<32x32xf32> to vector<16x16xf32>
    %344 = vector.extract_strided_slice %267 {offsets = [16, 16], sizes = [16, 16], strides = [1, 1]} : vector<32x32xf32> to vector<16x16xf32>
    %345 = vector.extract_strided_slice %268 {offsets = [16, 16], sizes = [16, 16], strides = [1, 1]} : vector<32x32xf32> to vector<16x16xf32>
    %346 = arith.truncf %343 : vector<16x16xf32> to vector<16x16xbf16>
    %347 = arith.truncf %344 : vector<16x16xf32> to vector<16x16xbf16>
    %cst_108 = arith.constant dense<0.000000e+00> : vector<16x16xf32>
    %348 = tpu.matmul %346, %347, %cst_108 {dimension_numbers = #tpu.dot_dimension_numbers<[1], [1], [0], [0], [0, 0, 1, 0], [], []>} : vector<16x16xbf16>, vector<16x16xbf16>, vector<16x16xf32> -> vector<16x16xf32>
    %cst_109 = arith.constant 2.500000e-01 : f32
    %349 = vector.broadcast %cst_109 : f32 to vector<16x16xf32>
    %350 = arith.mulf %348, %349 : vector<16x16xf32>
    %cst_110 = arith.constant dense<0xFF800000> : vector<16xf32>
    %351 = vector.multi_reduction <maximumf>, %350, %cst_110 [1] : vector<16x16xf32> to vector<16xf32>
    %352 = vector.shape_cast %351 : vector<16xf32> to vector<16x1xf32>
    %353 = vector.broadcast %352 : vector<16x1xf32> to vector<16x16xf32>
    %354 = arith.subf %350, %353 : vector<16x16xf32>
    %355 = math.exp %354 : vector<16x16xf32>
    %cst_111 = arith.constant dense<0.000000e+00> : vector<16xf32>
    %356 = vector.multi_reduction <add>, %355, %cst_111 [1] : vector<16x16xf32> to vector<16xf32>
    %357 = vector.shape_cast %356 : vector<16xf32> to vector<16x1xf32>
    %358 = tpu.reciprocal %357 {approx = true} : vector<16x1xf32> -> vector<16x1xf32>
    %359 = vector.broadcast %358 : vector<16x1xf32> to vector<16x16xf32>
    %360 = arith.mulf %355, %359 : vector<16x16xf32>
    %361 = arith.truncf %360 : vector<16x16xf32> to vector<16x16xbf16>
    %362 = arith.truncf %345 : vector<16x16xf32> to vector<16x16xbf16>
    %cst_112 = arith.constant dense<0.000000e+00> : vector<16x16xf32>
    %363 = tpu.matmul %361, %362, %cst_112 {dimension_numbers = #tpu.dot_dimension_numbers<[1], [0], [0], [1], [0, 0, 1, 1], [], []>} : vector<16x16xbf16>, vector<16x16xbf16>, vector<16x16xf32> -> vector<16x16xf32>
    %364 = vector.extract_strided_slice %269 {offsets = [16, 0], sizes = [16, 32], strides = [1, 1]} : vector<32x32xbf16> to vector<16x32xbf16>
    %365 = arith.truncf %363 : vector<16x16xf32> to vector<16x16xbf16>
    %cst_113 = arith.constant dense<0.000000e+00> : vector<16x32xf32>
    %366 = tpu.matmul %365, %364, %cst_113 {dimension_numbers = #tpu.dot_dimension_numbers<[1], [0], [0], [1], [0, 0, 1, 1], [], []>} : vector<16x16xbf16>, vector<16x32xbf16>, vector<16x32xf32> -> vector<16x32xf32>
    %367 = arith.addf %342, %366 : vector<16x32xf32>
    %368 = tpu.concatenate %318, %367 in 0 : vector<16x32xf32>, vector<16x32xf32> -> vector<32x32xf32>
    %369 = arith.addf %235, %368 : vector<32x32xf32>
    %370 = vector.extract_strided_slice %14 {offsets = [1, 0], sizes = [1, 32], strides = [1, 1]} : vector<2x32xf32> to vector<1x32xf32>
    %371 = vector.broadcast %370 : vector<1x32xf32> to vector<32x32xf32>
    %372 = arith.addf %369, %371 : vector<32x32xf32>
    %373 = vector.extract_strided_slice %15 {offsets = [1, 0], sizes = [1, 32], strides = [1, 1]} : vector<2x32xf32> to vector<1x32xf32>
    %374 = vector.extract_strided_slice %16 {offsets = [1, 0], sizes = [1, 32], strides = [1, 1]} : vector<2x32xf32> to vector<1x32xf32>
    %cst_114 = arith.constant dense<0.000000e+00> : vector<32xf32>
    %375 = vector.multi_reduction <add>, %372, %cst_114 [1] : vector<32x32xf32> to vector<32xf32>
    %376 = vector.shape_cast %375 : vector<32xf32> to vector<32x1xf32>
    %cst_115 = arith.constant 3.200000e+01 : f32
    %377 = vector.broadcast %cst_115 : f32 to vector<32x1xf32>
    %378 = arith.divf %376, %377 : vector<32x1xf32>
    %379 = vector.broadcast %378 : vector<32x1xf32> to vector<32x32xf32>
    %380 = arith.subf %372, %379 : vector<32x32xf32>
    %381 = arith.mulf %380, %380 : vector<32x32xf32>
    %cst_116 = arith.constant dense<0.000000e+00> : vector<32xf32>
    %382 = vector.multi_reduction <add>, %381, %cst_116 [1] : vector<32x32xf32> to vector<32xf32>
    %383 = vector.shape_cast %382 : vector<32xf32> to vector<32x1xf32>
    %cst_117 = arith.constant 3.200000e+01 : f32
    %384 = vector.broadcast %cst_117 : f32 to vector<32x1xf32>
    %385 = arith.divf %383, %384 : vector<32x1xf32>
    %386 = vector.broadcast %378 : vector<32x1xf32> to vector<32x32xf32>
    %387 = arith.subf %372, %386 : vector<32x32xf32>
    %cst_118 = arith.constant 9.99999974E-6 : f32
    %388 = vector.broadcast %cst_118 : f32 to vector<32x1xf32>
    %389 = arith.addf %385, %388 : vector<32x1xf32>
    %390 = math.rsqrt %389 : vector<32x1xf32>
    %391 = vector.broadcast %390 : vector<32x1xf32> to vector<32x32xf32>
    %392 = arith.mulf %387, %391 : vector<32x32xf32>
    %393 = vector.broadcast %373 : vector<1x32xf32> to vector<32x32xf32>
    %394 = arith.mulf %392, %393 : vector<32x32xf32>
    %395 = vector.broadcast %374 : vector<1x32xf32> to vector<32x32xf32>
    %396 = arith.addf %394, %395 : vector<32x32xf32>
    %397 = vector.extract_strided_slice %17 {offsets = [32, 0], sizes = [32, 128], strides = [1, 1]} : vector<64x128xbf16> to vector<32x128xbf16>
    %398 = arith.truncf %396 : vector<32x32xf32> to vector<32x32xbf16>
    %cst_119 = arith.constant dense<0.000000e+00> : vector<32x128xf32>
    %399 = tpu.matmul %398, %397, %cst_119 {dimension_numbers = #tpu.dot_dimension_numbers<[1], [0], [0], [1], [0, 0, 1, 1], [], []>} : vector<32x32xbf16>, vector<32x128xbf16>, vector<32x128xf32> -> vector<32x128xf32>
    %400 = vector.extract_strided_slice %18 {offsets = [1, 0], sizes = [1, 128], strides = [1, 1]} : vector<2x128xf32> to vector<1x128xf32>
    %401 = vector.broadcast %400 : vector<1x128xf32> to vector<32x128xf32>
    %402 = arith.addf %399, %401 : vector<32x128xf32>
    %cst_120 = arith.constant 5.000000e-01 : f32
    %403 = vector.broadcast %cst_120 : f32 to vector<32x128xf32>
    %404 = arith.mulf %403, %402 : vector<32x128xf32>
    %cst_121 = arith.constant 0.707106769 : f32
    %405 = vector.broadcast %cst_121 : f32 to vector<32x128xf32>
    %406 = arith.mulf %402, %405 : vector<32x128xf32>
    %cst_122 = arith.constant 0.000000e+00 : f32
    %407 = vector.broadcast %cst_122 : f32 to vector<32x128xf32>
    %408 = arith.cmpf oge, %406, %407 : vector<32x128xf32>
    %cst_123 = arith.constant 1.000000e+00 : f32
    %cst_124 = arith.constant -1.000000e+00 : f32
    %409 = vector.broadcast %cst_123 : f32 to vector<32x128xf32>
    %410 = vector.broadcast %cst_124 : f32 to vector<32x128xf32>
    %411 = arith.select %408, %409, %410 : vector<32x128xi1>, vector<32x128xf32>
    %412 = math.absf %406 : vector<32x128xf32>
    %cst_125 = arith.constant 0.327591091 : f32
    %413 = vector.broadcast %cst_125 : f32 to vector<32x128xf32>
    %414 = arith.mulf %413, %412 : vector<32x128xf32>
    %cst_126 = arith.constant 1.000000e+00 : f32
    %415 = vector.broadcast %cst_126 : f32 to vector<32x128xf32>
    %416 = arith.addf %415, %414 : vector<32x128xf32>
    %cst_127 = arith.constant 1.000000e+00 : f32
    %417 = vector.broadcast %cst_127 : f32 to vector<32x128xf32>
    %418 = arith.divf %417, %416 : vector<32x128xf32>
    %cst_128 = arith.constant 1.06140542 : f32
    %419 = vector.broadcast %cst_128 : f32 to vector<32x128xf32>
    %420 = arith.mulf %419, %418 : vector<32x128xf32>
    %cst_129 = arith.constant -1.45315206 : f32
    %421 = vector.broadcast %cst_129 : f32 to vector<32x128xf32>
    %422 = arith.addf %420, %421 : vector<32x128xf32>
    %423 = arith.mulf %422, %418 : vector<32x128xf32>
    %cst_130 = arith.constant 1.42141378 : f32
    %424 = vector.broadcast %cst_130 : f32 to vector<32x128xf32>
    %425 = arith.addf %423, %424 : vector<32x128xf32>
    %426 = arith.mulf %425, %418 : vector<32x128xf32>
    %cst_131 = arith.constant -0.284496725 : f32
    %427 = vector.broadcast %cst_131 : f32 to vector<32x128xf32>
    %428 = arith.addf %426, %427 : vector<32x128xf32>
    %429 = arith.mulf %428, %418 : vector<32x128xf32>
    %cst_132 = arith.constant 0.254829586 : f32
    %430 = vector.broadcast %cst_132 : f32 to vector<32x128xf32>
    %431 = arith.addf %429, %430 : vector<32x128xf32>
    %432 = arith.mulf %431, %418 : vector<32x128xf32>
    %cst_133 = arith.constant 0.000000e+00 : f32
    %433 = vector.broadcast %cst_133 : f32 to vector<32x128xf32>
    %434 = arith.subf %433, %412 : vector<32x128xf32>
    %435 = arith.mulf %434, %412 : vector<32x128xf32>
    %436 = math.exp %435 : vector<32x128xf32>
    %437 = arith.mulf %432, %436 : vector<32x128xf32>
    %cst_134 = arith.constant 1.000000e+00 : f32
    %438 = vector.broadcast %cst_134 : f32 to vector<32x128xf32>
    %439 = arith.subf %438, %437 : vector<32x128xf32>
    %440 = arith.mulf %411, %439 : vector<32x128xf32>
    %cst_135 = arith.constant 1.000000e+00 : f32
    %441 = vector.broadcast %cst_135 : f32 to vector<32x128xf32>
    %442 = arith.addf %441, %440 : vector<32x128xf32>
    %443 = arith.mulf %404, %442 : vector<32x128xf32>
    %444 = vector.extract_strided_slice %19 {offsets = [128, 0], sizes = [128, 32], strides = [1, 1]} : vector<256x32xbf16> to vector<128x32xbf16>
    %445 = arith.truncf %443 : vector<32x128xf32> to vector<32x128xbf16>
    %cst_136 = arith.constant dense<0.000000e+00> : vector<32x32xf32>
    %446 = tpu.matmul %445, %444, %cst_136 {dimension_numbers = #tpu.dot_dimension_numbers<[1], [0], [0], [1], [0, 0, 1, 1], [], []>} : vector<32x128xbf16>, vector<128x32xbf16>, vector<32x32xf32> -> vector<32x32xf32>
    %447 = vector.extract_strided_slice %20 {offsets = [1, 0], sizes = [1, 32], strides = [1, 1]} : vector<2x32xf32> to vector<1x32xf32>
    %448 = vector.broadcast %447 : vector<1x32xf32> to vector<32x32xf32>
    %449 = arith.addf %446, %448 : vector<32x32xf32>
    %450 = arith.addf %372, %449 : vector<32x32xf32>
    %c0_137 = arith.constant 0 : index
    %c0_138 = arith.constant 0 : index
    %451 = vector.load %arg16[%c0_137, %c0_138] : memref<32x32xbf16, #tpu.memory_space<vmem>>, vector<32x32xbf16>
    %452 = arith.truncf %450 : vector<32x32xf32> to vector<32x32xbf16>
    %cst_139 = arith.constant dense<0.000000e+00> : vector<32x32xf32>
    %453 = tpu.matmul %452, %451, %cst_139 {dimension_numbers = #tpu.dot_dimension_numbers<[1], [0], [0], [1], [0, 0, 1, 1], [], []>} : vector<32x32xbf16>, vector<32x32xbf16>, vector<32x32xf32> -> vector<32x32xf32>
    %c0_140 = arith.constant 0 : index
    %c0_141 = arith.constant 0 : index
    %454 = vector.load %arg17[%c0_140, %c0_141] : memref<4x32xf32, #tpu.memory_space<vmem>>, vector<4x32xf32>
    %455 = vector.extract_strided_slice %454 {offsets = [0, 0], sizes = [1, 32], strides = [1, 1]} : vector<4x32xf32> to vector<1x32xf32>
    %456 = vector.extract_strided_slice %454 {offsets = [1, 0], sizes = [1, 32], strides = [1, 1]} : vector<4x32xf32> to vector<1x32xf32>
    %cst_142 = arith.constant dense<0.000000e+00> : vector<32xf32>
    %457 = vector.multi_reduction <add>, %453, %cst_142 [1] : vector<32x32xf32> to vector<32xf32>
    %458 = vector.shape_cast %457 : vector<32xf32> to vector<32x1xf32>
    %cst_143 = arith.constant 3.200000e+01 : f32
    %459 = vector.broadcast %cst_143 : f32 to vector<32x1xf32>
    %460 = arith.divf %458, %459 : vector<32x1xf32>
    %461 = vector.broadcast %460 : vector<32x1xf32> to vector<32x32xf32>
    %462 = arith.subf %453, %461 : vector<32x32xf32>
    %463 = arith.mulf %462, %462 : vector<32x32xf32>
    %cst_144 = arith.constant dense<0.000000e+00> : vector<32xf32>
    %464 = vector.multi_reduction <add>, %463, %cst_144 [1] : vector<32x32xf32> to vector<32xf32>
    %465 = vector.shape_cast %464 : vector<32xf32> to vector<32x1xf32>
    %cst_145 = arith.constant 3.200000e+01 : f32
    %466 = vector.broadcast %cst_145 : f32 to vector<32x1xf32>
    %467 = arith.divf %465, %466 : vector<32x1xf32>
    %468 = vector.broadcast %460 : vector<32x1xf32> to vector<32x32xf32>
    %469 = arith.subf %453, %468 : vector<32x32xf32>
    %cst_146 = arith.constant 9.99999997E-7 : f32
    %470 = vector.broadcast %cst_146 : f32 to vector<32x1xf32>
    %471 = arith.addf %467, %470 : vector<32x1xf32>
    %472 = math.rsqrt %471 : vector<32x1xf32>
    %473 = vector.broadcast %472 : vector<32x1xf32> to vector<32x32xf32>
    %474 = arith.mulf %469, %473 : vector<32x32xf32>
    %475 = vector.broadcast %455 : vector<1x32xf32> to vector<32x32xf32>
    %476 = arith.mulf %474, %475 : vector<32x32xf32>
    %477 = vector.broadcast %456 : vector<1x32xf32> to vector<32x32xf32>
    %478 = arith.addf %476, %477 : vector<32x32xf32>
    %c0_147 = arith.constant 0 : index
    %c0_148 = arith.constant 0 : index
    %479 = vector.load %arg18[%c0_147, %c0_148] : memref<32x9xf32, #tpu.memory_space<vmem>>, vector<32x9xf32>
    %c0_149 = arith.constant 0 : index
    %c0_150 = arith.constant 0 : index
    %480 = vector.load %arg19[%c0_149, %c0_150] : memref<288x32xbf16, #tpu.memory_space<vmem>>, vector<288x32xbf16>
    %481 = vector.extract_strided_slice %478 {offsets = [27, 0], sizes = [5, 32], strides = [1, 1]} : vector<32x32xf32> to vector<5x32xf32>
    %482 = vector.extract_strided_slice %478 {offsets = [0, 0], sizes = [27, 32], strides = [1, 1]} : vector<32x32xf32> to vector<27x32xf32>
    %483 = tpu.concatenate %481, %482 in 0 : vector<5x32xf32>, vector<27x32xf32> -> vector<32x32xf32>
    %484 = vector.extract_strided_slice %479 {offsets = [0, 0], sizes = [32, 1], strides = [1, 1]} : vector<32x9xf32> to vector<32x1xf32>
    %485 = vector.broadcast %484 : vector<32x1xf32> to vector<32x32xf32>
    %486 = arith.mulf %483, %485 : vector<32x32xf32>
    %487 = vector.extract_strided_slice %480 {offsets = [0, 0], sizes = [32, 32], strides = [1, 1]} : vector<288x32xbf16> to vector<32x32xbf16>
    %488 = arith.truncf %486 : vector<32x32xf32> to vector<32x32xbf16>
    %cst_151 = arith.constant dense<0.000000e+00> : vector<32x32xf32>
    %489 = tpu.matmul %488, %487, %cst_151 {dimension_numbers = #tpu.dot_dimension_numbers<[1], [0], [0], [1], [0, 0, 1, 1], [], []>} : vector<32x32xbf16>, vector<32x32xbf16>, vector<32x32xf32> -> vector<32x32xf32>
    %490 = vector.extract_strided_slice %478 {offsets = [28, 0], sizes = [4, 32], strides = [1, 1]} : vector<32x32xf32> to vector<4x32xf32>
    %491 = vector.extract_strided_slice %478 {offsets = [0, 0], sizes = [28, 32], strides = [1, 1]} : vector<32x32xf32> to vector<28x32xf32>
    %492 = tpu.concatenate %490, %491 in 0 : vector<4x32xf32>, vector<28x32xf32> -> vector<32x32xf32>
    %493 = vector.extract_strided_slice %479 {offsets = [0, 1], sizes = [32, 1], strides = [1, 1]} : vector<32x9xf32> to vector<32x1xf32>
    %494 = vector.broadcast %493 : vector<32x1xf32> to vector<32x32xf32>
    %495 = arith.mulf %492, %494 : vector<32x32xf32>
    %496 = vector.extract_strided_slice %480 {offsets = [32, 0], sizes = [32, 32], strides = [1, 1]} : vector<288x32xbf16> to vector<32x32xbf16>
    %497 = arith.truncf %495 : vector<32x32xf32> to vector<32x32xbf16>
    %cst_152 = arith.constant dense<0.000000e+00> : vector<32x32xf32>
    %498 = tpu.matmul %497, %496, %cst_152 {dimension_numbers = #tpu.dot_dimension_numbers<[1], [0], [0], [1], [0, 0, 1, 1], [], []>} : vector<32x32xbf16>, vector<32x32xbf16>, vector<32x32xf32> -> vector<32x32xf32>
    %499 = arith.addf %489, %498 : vector<32x32xf32>
    %500 = vector.extract_strided_slice %478 {offsets = [29, 0], sizes = [3, 32], strides = [1, 1]} : vector<32x32xf32> to vector<3x32xf32>
    %501 = vector.extract_strided_slice %478 {offsets = [0, 0], sizes = [29, 32], strides = [1, 1]} : vector<32x32xf32> to vector<29x32xf32>
    %502 = tpu.concatenate %500, %501 in 0 : vector<3x32xf32>, vector<29x32xf32> -> vector<32x32xf32>
    %503 = vector.extract_strided_slice %479 {offsets = [0, 2], sizes = [32, 1], strides = [1, 1]} : vector<32x9xf32> to vector<32x1xf32>
    %504 = vector.broadcast %503 : vector<32x1xf32> to vector<32x32xf32>
    %505 = arith.mulf %502, %504 : vector<32x32xf32>
    %506 = vector.extract_strided_slice %480 {offsets = [64, 0], sizes = [32, 32], strides = [1, 1]} : vector<288x32xbf16> to vector<32x32xbf16>
    %507 = arith.truncf %505 : vector<32x32xf32> to vector<32x32xbf16>
    %cst_153 = arith.constant dense<0.000000e+00> : vector<32x32xf32>
    %508 = tpu.matmul %507, %506, %cst_153 {dimension_numbers = #tpu.dot_dimension_numbers<[1], [0], [0], [1], [0, 0, 1, 1], [], []>} : vector<32x32xbf16>, vector<32x32xbf16>, vector<32x32xf32> -> vector<32x32xf32>
    %509 = arith.addf %499, %508 : vector<32x32xf32>
    %510 = vector.extract_strided_slice %478 {offsets = [31, 0], sizes = [1, 32], strides = [1, 1]} : vector<32x32xf32> to vector<1x32xf32>
    %511 = vector.extract_strided_slice %478 {offsets = [0, 0], sizes = [31, 32], strides = [1, 1]} : vector<32x32xf32> to vector<31x32xf32>
    %512 = tpu.concatenate %510, %511 in 0 : vector<1x32xf32>, vector<31x32xf32> -> vector<32x32xf32>
    %513 = vector.extract_strided_slice %479 {offsets = [0, 3], sizes = [32, 1], strides = [1, 1]} : vector<32x9xf32> to vector<32x1xf32>
    %514 = vector.broadcast %513 : vector<32x1xf32> to vector<32x32xf32>
    %515 = arith.mulf %512, %514 : vector<32x32xf32>
    %516 = vector.extract_strided_slice %480 {offsets = [96, 0], sizes = [32, 32], strides = [1, 1]} : vector<288x32xbf16> to vector<32x32xbf16>
    %517 = arith.truncf %515 : vector<32x32xf32> to vector<32x32xbf16>
    %cst_154 = arith.constant dense<0.000000e+00> : vector<32x32xf32>
    %518 = tpu.matmul %517, %516, %cst_154 {dimension_numbers = #tpu.dot_dimension_numbers<[1], [0], [0], [1], [0, 0, 1, 1], [], []>} : vector<32x32xbf16>, vector<32x32xbf16>, vector<32x32xf32> -> vector<32x32xf32>
    %519 = arith.addf %509, %518 : vector<32x32xf32>
    %520 = vector.extract_strided_slice %479 {offsets = [0, 4], sizes = [32, 1], strides = [1, 1]} : vector<32x9xf32> to vector<32x1xf32>
    %521 = vector.broadcast %520 : vector<32x1xf32> to vector<32x32xf32>
    %522 = arith.mulf %478, %521 : vector<32x32xf32>
    %523 = vector.extract_strided_slice %480 {offsets = [128, 0], sizes = [32, 32], strides = [1, 1]} : vector<288x32xbf16> to vector<32x32xbf16>
    %524 = arith.truncf %522 : vector<32x32xf32> to vector<32x32xbf16>
    %cst_155 = arith.constant dense<0.000000e+00> : vector<32x32xf32>
    %525 = tpu.matmul %524, %523, %cst_155 {dimension_numbers = #tpu.dot_dimension_numbers<[1], [0], [0], [1], [0, 0, 1, 1], [], []>} : vector<32x32xbf16>, vector<32x32xbf16>, vector<32x32xf32> -> vector<32x32xf32>
    %526 = arith.addf %519, %525 : vector<32x32xf32>
    %527 = vector.extract_strided_slice %478 {offsets = [1, 0], sizes = [31, 32], strides = [1, 1]} : vector<32x32xf32> to vector<31x32xf32>
    %528 = vector.extract_strided_slice %478 {offsets = [0, 0], sizes = [1, 32], strides = [1, 1]} : vector<32x32xf32> to vector<1x32xf32>
    %529 = tpu.concatenate %527, %528 in 0 : vector<31x32xf32>, vector<1x32xf32> -> vector<32x32xf32>
    %530 = vector.extract_strided_slice %479 {offsets = [0, 5], sizes = [32, 1], strides = [1, 1]} : vector<32x9xf32> to vector<32x1xf32>
    %531 = vector.broadcast %530 : vector<32x1xf32> to vector<32x32xf32>
    %532 = arith.mulf %529, %531 : vector<32x32xf32>
    %533 = vector.extract_strided_slice %480 {offsets = [160, 0], sizes = [32, 32], strides = [1, 1]} : vector<288x32xbf16> to vector<32x32xbf16>
    %534 = arith.truncf %532 : vector<32x32xf32> to vector<32x32xbf16>
    %cst_156 = arith.constant dense<0.000000e+00> : vector<32x32xf32>
    %535 = tpu.matmul %534, %533, %cst_156 {dimension_numbers = #tpu.dot_dimension_numbers<[1], [0], [0], [1], [0, 0, 1, 1], [], []>} : vector<32x32xbf16>, vector<32x32xbf16>, vector<32x32xf32> -> vector<32x32xf32>
    %536 = arith.addf %526, %535 : vector<32x32xf32>
    %537 = vector.extract_strided_slice %478 {offsets = [3, 0], sizes = [29, 32], strides = [1, 1]} : vector<32x32xf32> to vector<29x32xf32>
    %538 = vector.extract_strided_slice %478 {offsets = [0, 0], sizes = [3, 32], strides = [1, 1]} : vector<32x32xf32> to vector<3x32xf32>
    %539 = tpu.concatenate %537, %538 in 0 : vector<29x32xf32>, vector<3x32xf32> -> vector<32x32xf32>
    %540 = vector.extract_strided_slice %479 {offsets = [0, 6], sizes = [32, 1], strides = [1, 1]} : vector<32x9xf32> to vector<32x1xf32>
    %541 = vector.broadcast %540 : vector<32x1xf32> to vector<32x32xf32>
    %542 = arith.mulf %539, %541 : vector<32x32xf32>
    %543 = vector.extract_strided_slice %480 {offsets = [192, 0], sizes = [32, 32], strides = [1, 1]} : vector<288x32xbf16> to vector<32x32xbf16>
    %544 = arith.truncf %542 : vector<32x32xf32> to vector<32x32xbf16>
    %cst_157 = arith.constant dense<0.000000e+00> : vector<32x32xf32>
    %545 = tpu.matmul %544, %543, %cst_157 {dimension_numbers = #tpu.dot_dimension_numbers<[1], [0], [0], [1], [0, 0, 1, 1], [], []>} : vector<32x32xbf16>, vector<32x32xbf16>, vector<32x32xf32> -> vector<32x32xf32>
    %546 = arith.addf %536, %545 : vector<32x32xf32>
    %547 = vector.extract_strided_slice %478 {offsets = [4, 0], sizes = [28, 32], strides = [1, 1]} : vector<32x32xf32> to vector<28x32xf32>
    %548 = vector.extract_strided_slice %478 {offsets = [0, 0], sizes = [4, 32], strides = [1, 1]} : vector<32x32xf32> to vector<4x32xf32>
    %549 = tpu.concatenate %547, %548 in 0 : vector<28x32xf32>, vector<4x32xf32> -> vector<32x32xf32>
    %550 = vector.extract_strided_slice %479 {offsets = [0, 7], sizes = [32, 1], strides = [1, 1]} : vector<32x9xf32> to vector<32x1xf32>
    %551 = vector.broadcast %550 : vector<32x1xf32> to vector<32x32xf32>
    %552 = arith.mulf %549, %551 : vector<32x32xf32>
    %553 = vector.extract_strided_slice %480 {offsets = [224, 0], sizes = [32, 32], strides = [1, 1]} : vector<288x32xbf16> to vector<32x32xbf16>
    %554 = arith.truncf %552 : vector<32x32xf32> to vector<32x32xbf16>
    %cst_158 = arith.constant dense<0.000000e+00> : vector<32x32xf32>
    %555 = tpu.matmul %554, %553, %cst_158 {dimension_numbers = #tpu.dot_dimension_numbers<[1], [0], [0], [1], [0, 0, 1, 1], [], []>} : vector<32x32xbf16>, vector<32x32xbf16>, vector<32x32xf32> -> vector<32x32xf32>
    %556 = arith.addf %546, %555 : vector<32x32xf32>
    %557 = vector.extract_strided_slice %478 {offsets = [5, 0], sizes = [27, 32], strides = [1, 1]} : vector<32x32xf32> to vector<27x32xf32>
    %558 = vector.extract_strided_slice %478 {offsets = [0, 0], sizes = [5, 32], strides = [1, 1]} : vector<32x32xf32> to vector<5x32xf32>
    %559 = tpu.concatenate %557, %558 in 0 : vector<27x32xf32>, vector<5x32xf32> -> vector<32x32xf32>
    %560 = vector.extract_strided_slice %479 {offsets = [0, 8], sizes = [32, 1], strides = [1, 1]} : vector<32x9xf32> to vector<32x1xf32>
    %561 = vector.broadcast %560 : vector<32x1xf32> to vector<32x32xf32>
    %562 = arith.mulf %559, %561 : vector<32x32xf32>
    %563 = vector.extract_strided_slice %480 {offsets = [256, 0], sizes = [32, 32], strides = [1, 1]} : vector<288x32xbf16> to vector<32x32xbf16>
    %564 = arith.truncf %562 : vector<32x32xf32> to vector<32x32xbf16>
    %cst_159 = arith.constant dense<0.000000e+00> : vector<32x32xf32>
    %565 = tpu.matmul %564, %563, %cst_159 {dimension_numbers = #tpu.dot_dimension_numbers<[1], [0], [0], [1], [0, 0, 1, 1], [], []>} : vector<32x32xbf16>, vector<32x32xbf16>, vector<32x32xf32> -> vector<32x32xf32>
    %566 = arith.addf %556, %565 : vector<32x32xf32>
    %567 = vector.extract_strided_slice %454 {offsets = [2, 0], sizes = [1, 32], strides = [1, 1]} : vector<4x32xf32> to vector<1x32xf32>
    %568 = vector.extract_strided_slice %454 {offsets = [3, 0], sizes = [1, 32], strides = [1, 1]} : vector<4x32xf32> to vector<1x32xf32>
    %cst_160 = arith.constant dense<0.000000e+00> : vector<32xf32>
    %569 = vector.multi_reduction <add>, %566, %cst_160 [1] : vector<32x32xf32> to vector<32xf32>
    %570 = vector.shape_cast %569 : vector<32xf32> to vector<32x1xf32>
    %cst_161 = arith.constant 3.200000e+01 : f32
    %571 = vector.broadcast %cst_161 : f32 to vector<32x1xf32>
    %572 = arith.divf %570, %571 : vector<32x1xf32>
    %573 = vector.broadcast %572 : vector<32x1xf32> to vector<32x32xf32>
    %574 = arith.subf %566, %573 : vector<32x32xf32>
    %575 = arith.mulf %574, %574 : vector<32x32xf32>
    %cst_162 = arith.constant dense<0.000000e+00> : vector<32xf32>
    %576 = vector.multi_reduction <add>, %575, %cst_162 [1] : vector<32x32xf32> to vector<32xf32>
    %577 = vector.shape_cast %576 : vector<32xf32> to vector<32x1xf32>
    %cst_163 = arith.constant 3.200000e+01 : f32
    %578 = vector.broadcast %cst_163 : f32 to vector<32x1xf32>
    %579 = arith.divf %577, %578 : vector<32x1xf32>
    %580 = vector.broadcast %572 : vector<32x1xf32> to vector<32x32xf32>
    %581 = arith.subf %566, %580 : vector<32x32xf32>
    %cst_164 = arith.constant 9.99999997E-7 : f32
    %582 = vector.broadcast %cst_164 : f32 to vector<32x1xf32>
    %583 = arith.addf %579, %582 : vector<32x1xf32>
    %584 = math.rsqrt %583 : vector<32x1xf32>
    %585 = vector.broadcast %584 : vector<32x1xf32> to vector<32x32xf32>
    %586 = arith.mulf %581, %585 : vector<32x32xf32>
    %587 = vector.broadcast %567 : vector<1x32xf32> to vector<32x32xf32>
    %588 = arith.mulf %586, %587 : vector<32x32xf32>
    %589 = vector.broadcast %568 : vector<1x32xf32> to vector<32x32xf32>
    %590 = arith.addf %588, %589 : vector<32x32xf32>
    %c0_165 = arith.constant 0 : index
    %c0_166 = arith.constant 0 : index
    %591 = vector.load %arg20[%c0_165, %c0_166] : memref<32x32xf32, #tpu.memory_space<vmem>>, vector<32x32xf32>
    tpu.vector_store %arg20[%c0_165, %c0_166], %590 {strides = array<i32>} : memref<32x32xf32, #tpu.memory_space<vmem>>, vector<32x32xf32>,
    return
  }
}

</mosaic_0001>

<bundles_post_ra>
// kernel: tpu_custom_call.1
= control target key start
LH: loop header
LB: loop body
LE: loop exit
PB: predicated region body
PF: predicated region fallthrough
CT: control target
= control target key end

     0   :  { %s4777_s0 = inlined_call_operand.vmem [shape: f32[32,192], index: 0, kind: input, shape index: {}]   ;;  %s4778_s1 = inlined_call_operand.vmem [shape: f32[32,32], index: 1, kind: input, shape index: {}]   ;;  %s4779_s2 = inlined_call_operand.vmem [shape: bf16[192,32], index: 2, kind: input, shape index: {}]   ;;  %s4780_s3 = inlined_call_operand.vmem [shape: f32[1,32], index: 3, kind: input, shape index: {}]   ;;  %s4781_s4 = inlined_call_operand.vmem [shape: f32[2,32], index: 4, kind: input, shape index: {}]   ;;  %s4782_s5 = inlined_call_operand.vmem [shape: f32[2,32], index: 5, kind: input, shape index: {}]   ;;  %s4783_s6 = inlined_call_operand.vmem [shape: bf16[64,96], index: 6, kind: input, shape index: {}]   ;;  %s4784_s7 = inlined_call_operand.vmem [shape: f32[2,96], index: 7, kind: input, shape index: {}]   ;;  %s4785_s8 = inlined_call_operand.vmem [shape: bf16[64,32], index: 8, kind: input, shape index: {}]   ;;  %s4786_s9 = inlined_call_operand.vmem [shape: f32[2,32], index: 9, kind: input, shape index: {}]   ;;  %s4787_s10 = inlined_call_operand.vmem [shape: f32[2,32], index: 10, kind: input, shape index: {}]   ;;  %s4788_s11 = inlined_call_operand.vmem [shape: f32[2,32], index: 11, kind: input, shape index: {}]   ;;  %s4789_s12 = inlined_call_operand.vmem [shape: bf16[64,128], index: 12, kind: input, shape index: {}]   ;;  %s4790_s13 = inlined_call_operand.vmem [shape: f32[2,128], index: 13, kind: input, shape index: {}]   ;;  %s4791_s14 = inlined_call_operand.vmem [shape: bf16[256,32], index: 14, kind: input, shape index: {}]   ;;  %s4792_s15 = inlined_call_operand.vmem [shape: f32[2,32], index: 15, kind: input, shape index: {}]   ;;  %s4793_s16 = inlined_call_operand.vmem [shape: bf16[32,32], index: 16, kind: input, shape index: {}]   ;;  %s4794_s17 = inlined_call_operand.vmem [shape: f32[4,32], index: 17, kind: input, shape index: {}]   ;;  %s4795_s18 = inlined_call_operand.vmem [shape: f32[32,9], index: 18, kind: input, shape index: {}]   ;;  %s4796_s19 = inlined_call_operand.vmem [shape: bf16[288,32], index: 19, kind: input, shape index: {}]   ;;  %s4797_s20 = inlined_call_operand.hbm [shape: f32[32,32], index: 20, kind: output, shape index: {}]  }
   0x1   :  { %4802 = sst [smem:[#allocation5_spill]] %s4777_s0 }
   0x2   :  { %4803 = sst [smem:[#allocation6_spill]] %s4778_s1 }
   0x3   :  { %4804 = sst [smem:[#allocation7_spill]] %s4779_s2 }
   0x4   :  { %4805 = sst [smem:[#allocation8_spill]] %s4780_s3 }
   0x5   :  { %4806 = sst [smem:[#allocation9_spill]] %s4781_s4 }
   0x6   :  { %s4807_s23 = sld [smem:[#allocation7_spill]] }
   0xc   :  { %v3303_v0 = vld [vmem:[%s4807_s23 + $0x38] sm:$0xff]  ;;  %v3302_v2 = vld [vmem:[%s4807_s23 + $0x30] sm:$0xff]  ;;  %v3301_v4 = vld [vmem:[%s4807_s23 + $0x28] sm:$0xff] }
   0xd   :  { %v3307_v1 = vld [vmem:[%s4807_s23 + $0x58] sm:$0xff]  ;;  %186 = vmatpush.bf16.msra.mxu0 %v3303_v0  ;;  %v3306_v3 = vld [vmem:[%s4807_s23 + $0x50] sm:$0xff] }
   0xe   :  { %209 = vmatpush.bf16.msra.mxu1 %v3307_v1 }
  0x11   :  { %187 = vmatpush.bf16.msra.mxu0 %v3302_v2 }
  0x12   :  { %25 = vsyncpa [#allocation3], 0  ;;  %210 = vmatpush.bf16.msra.mxu1 %v3306_v3  ;;  %v3305_v5 = vld [vmem:[%s4807_s23 + $0x48] sm:$0xff]  ;;  %v3300_v6 = vld [vmem:[%s4807_s23 + $0x20] sm:$0xff]  ;;  %s4808_s25 = sld [smem:[#allocation5_spill]]  ;;  %vm179_vm0 = vcmask 523264  }
  0x13   :  { %v3304_v7 = vld [vmem:[%s4807_s23 + $0x40] sm:$0xff]  ;;  %v3299_v10 = vld [vmem:[%s4807_s23 + $0x18] sm:$0xff]  ;;  %v3298_v12 = vld [vmem:[%s4807_s23 + $0x10] sm:$0xff]  ;;  %s4809_s22 = sld [smem:[#allocation8_spill]]  ;;  %vm296_vm1 = vcmask 261120   ;;  %v3592_v53 = vmov 32.0  }
  0x14   :  { %v3297_v13 = vld [vmem:[%s4807_s23 + $0x8] sm:$0xff]  ;;  %v3296_v14 = vld [vmem:[%s4807_s23] sm:$0xff]  ;;  %s4810_s3 = sld [smem:[#allocation6_spill]]  ;;  %3412 = vrcp.f32 %v3592_v53  ;;  %s3593_s27 = smov 112   ;;  %vm446_vm15 = vcmask 130048  }
  0x15   :  { %188 = vmatpush.bf16.msra.mxu0 %v3301_v4  ;;  %s4811_s24 = sld [smem:[#allocation9_spill]]  ;;  %s3594_s28 = smov 80  }
  0x16   :  { %211 = vmatpush.bf16.msra.mxu1 %v3305_v5  ;;  %s3595_s4 = smov 96   ;;  %s3596_s23 = smov 64  }
  0x17   :  { %s3597_s29 = smov 48  }
  0x18   :  { %v68_v8 = vld [vmem:[%s4808_s25 + $0x8] sm:$0xff]  ;;  %v70_v9 = vld [vmem:[%s4808_s25 + $0x18] sm:$0xff]  ;;  %v67_v15 = vld [vmem:[%s4808_s25] sm:$0xff] }
  0x19   :  { %189 = vmatpush.bf16.msra.mxu0 %v3300_v6  ;;  %v100_v11 = vpack.c.bf16 %v70_v9, %v68_v8  ;;  %v69_v16 = vld [vmem:[%s4808_s25 + $0x10] sm:$0xff]  ;;  %v72_v17 = vld [vmem:[%s4808_s25 + $0x28] sm:$0xff]  ;;  %v74_v18 = vld [vmem:[%s4808_s25 + $0x38] sm:$0xff] }
  0x1a   :  { %212 = vmatpush.bf16.msra.mxu1 %v3304_v7  ;;  %v99_v19 = vpack.c.bf16 %v69_v16, %v67_v15  ;;  %v102_v20 = vpack.c.bf16 %v74_v18, %v72_v17  ;;  %v71_v21 = vld [vmem:[%s4808_s25 + $0x20] sm:$0xff]  ;;  %v73_v22 = vld [vmem:[%s4808_s25 + $0x30] sm:$0xff]  ;;  %v225_v35 = vld [vmem:[%s4810_s3 + $0x8] sm:$0xff]  ;;  %v3413_v54 = vpop.eup %3412 }
  0x1b   :  { %v101_v23 = vpack.c.bf16 %v73_v22, %v71_v21  ;;  %v3411_v25 = vld [vmem:[%s4809_s22] ss:$0 sm:$0xff]  ;;  %v226_v42 = vld [vmem:[%s4810_s3 + $0x10] sm:$0xff]  ;;  %v227_v49 = vld [vmem:[%s4810_s3 + $0x18] sm:$0xff]  ;;  %v310_v55 = vmul.f32 32.0, %v3413_v54  ;;  %vm314_vm2 = vweird.f32 %v3413_v54 }
  0x1c   :  { %v224_v28 = vld [vmem:[%s4810_s3] sm:$0xff]  ;;  %v3309_v16 = vld [vmem:[%s4783_s6 + $0x8] sm:$0xff] }
  0x1d   :  { %190 = vmatpush.bf16.msra.mxu0 %v3299_v10  ;;  %3050 = vmatmul.msk.bf16.vlgmr.msra.gmra.mxu1 %vm179_vm0, %v100_v11  ;;  %v311_v56 = vsub.f32 1.0, %v310_v55 }
  0x1e   :  { %429 = vmatpush.bf16.msra.mxu2 %v3309_v16 }
  0x1f   :  { %v312_v57 = vmul.f32 %v3413_v54, %v311_v56 }
  0x21   :  { %191 = vmatpush.bf16.msra.mxu0 %v3298_v12  ;;  %v313_v58 = vadd.f32 %v3413_v54, %v312_v57 }
  0x23   :  { %v3809_v59 = vsel %vm314_vm2, %v3413_v54, %v313_v58 }
  0x25   :  { %192 = vmatpush.bf16.msra.mxu0 %v3297_v13 }
  0x29   :  { %193 = vmatpush.bf16.msra.mxu0 %v3296_v14 }
  0x2c   :  { %194 = vmatmul.bf16.vlgmr.msra.gmra.mxu0 %v99_v19  ;;  %v3308_v19 = vld [vmem:[%s4783_s6] sm:$0xff] }
  0x2d   :  { %3051 = vmatmul.msk.bf16.gmra.mxu1 %vm179_vm0, %v102_v20  ;;  %430 = vmatpush.bf16.msra.mxu2 %v3308_v19 }
  0x3c   :  { %199 = vmatmul.bf16.gmra.mxu0 %v101_v23 }
  0x9a   :  { %v214_v24 = vpop.f32.mrf.mxu1 }
  0xa2   :  { %v216_v31 = vpop.f32.mrf.mxu1 }
  0xa9   :  { %v195_v26 = vpop.f32.mrf.mxu0 }
  0xaa   :  { %v196_v27 = vadd.f32 %v3411_v25, %v195_v26  ;;  %v219_v38 = vpop.f32.mrf.mxu1 }
  0xac   :  { %v215_v29 = vadd.f32 %v214_v24, %v196_v27 }
  0xae   :  { %v3784_v30 = vadd.f32 %v224_v28, %v215_v29 }
  0xb0   :  { %v297_v32 = vsel %vm296_vm1, %v3784_v30, 0.0 }
  0xb1   :  { %v197_v33 = vpop.f32.mrf.mxu0  ;;  %298 = vadd.xlane.f32.xlu0 %v297_v32 }
  0xb2   :  { %v198_v34 = vadd.f32 %v3411_v25, %v197_v33  ;;  %v221_v47 = vpop.f32.mrf.mxu1 }
  0xb4   :  { %v217_v36 = vadd.f32 %v216_v31, %v198_v34 }
  0xb6   :  { %v3791_v37 = vadd.f32 %v225_v35, %v217_v36 }
  0xb8   :  { %v300_v39 = vsel %vm296_vm1, %v3791_v37, 0.0 }
  0xb9   :  { %v200_v40 = vpop.f32.mrf.mxu0  ;;  %301 = vadd.xlane.f32.xlu0 %v300_v39 }
  0xba   :  { %v201_v41 = vadd.f32 %v3411_v25, %v200_v40 }
  0xbc   :  { %v220_v43 = vadd.f32 %v219_v38, %v201_v41  ;;  %v232_v41 = vld [vmem:[%s4811_s24] sm:$0x3] }
  0xbe   :  { %v3798_v44 = vadd.f32 %v226_v42, %v220_v43 }
  0xc0   :  { %v303_v45 = vsel %vm296_vm1, %v3798_v44, 0.0 }
  0xc1   :  { %v202_v46 = vpop.f32.mrf.mxu0  ;;  %304 = vadd.xlane.f32.xlu2 %v303_v45 }
  0xc2   :  { %v203_v48 = vadd.f32 %v3411_v25, %v202_v46 }
  0xc4   :  { %v222_v50 = vadd.f32 %v221_v47, %v203_v48  ;;  %v392_v48 = vperm.slane %v232_v41, 0 }
  0xc6   :  { %v3805_v51 = vadd.f32 %v227_v49, %v222_v50 }
  0xc8   :  { %v306_v52 = vsel %vm296_vm1, %v3805_v51, 0.0 }
  0xc9   :  { %307 = vadd.xlane.f32.xlu2 %v306_v52  ;;  %v233_v52 = vld [vmem:[%s4782_s5] sm:$0x3] }
  0xca   :  { %v397_v57 = vperm.slane %v233_v52, 0 }
 0x124   :  { %v299_v60 = vpop.xlane.xlu0 %298 }
 0x125   :  { %v316_v61 = vmul.f32 %v3809_v59, %v299_v60 }
 0x127   :  { %v320_v62 = vsub.f32 %v3784_v30, %v316_v61 }
 0x129   :  { %v324_v63 = vmul.f32 %v320_v62, %v320_v62 }
 0x12b   :  { %v328_v0 = vsel %vm296_vm1, %v324_v63, 0.0 }
 0x12c   :  { %329 = vadd.xlane.f32.xlu1 %v328_v0  ;;  %v302_v1 = vpop.xlane.xlu0 %301 }
 0x12d   :  { %v317_v2 = vmul.f32 %v3809_v59, %v302_v1 }
 0x12f   :  { %v3816_v3 = vsub.f32 %v3791_v37, %v317_v2 }
 0x131   :  { %v325_v4 = vmul.f32 %v3816_v3, %v3816_v3 }
 0x133   :  { %v331_v5 = vsel %vm296_vm1, %v325_v4, 0.0 }
 0x134   :  { %v305_v6 = vpop.xlane.xlu2 %304  ;;  %332 = vadd.xlane.f32.xlu1 %v331_v5 }
 0x135   :  { %v318_v7 = vmul.f32 %v3809_v59, %v305_v6 }
 0x137   :  { %v3823_v8 = vsub.f32 %v3798_v44, %v318_v7 }
 0x139   :  { %v326_v9 = vmul.f32 %v3823_v8, %v3823_v8 }
 0x13b   :  { %v334_v10 = vsel %vm296_vm1, %v326_v9, 0.0 }
 0x13c   :  { %v308_v11 = vpop.xlane.xlu2 %307  ;;  %335 = vadd.xlane.f32.xlu0 %v334_v10 }
 0x13d   :  { %v319_v12 = vmul.f32 %v3809_v59, %v308_v11 }
 0x13f   :  { %v3830_v13 = vsub.f32 %v3805_v51, %v319_v12 }
 0x141   :  { %v327_v14 = vmul.f32 %v3830_v13, %v3830_v13 }
 0x143   :  { %v337_v15 = vsel %vm296_vm1, %v327_v14, 0.0 }
 0x144   :  { %338 = vadd.xlane.f32.xlu1 %v337_v15 }
 0x19f   :  { %v330_v17 = vpop.xlane.xlu1 %329 }
 0x1a0   :  { %v340_v18 = vmul.f32 %v330_v17, %v3809_v59 }
 0x1a2   :  { %v344_v20 = vadd.f32 1e-05, %v340_v18 }
 0x1a4   :  { %3414 = vrsqrt.f32 %v344_v20  ;;  %vm354_vm4 = vweird.f32 %v344_v20 }
 0x1a7   :  { %v333_v21 = vpop.xlane.xlu1 %332 }
 0x1a8   :  { %v341_v22 = vmul.f32 %v333_v21, %v3809_v59 }
 0x1aa   :  { %v3415_v23 = vpop.eup %3414  ;;  %v345_v24 = vadd.f32 1e-05, %v341_v22 }
 0x1ab   :  { %v349_v25 = vmul.f32 %v3415_v23, %v344_v20  ;;  %vm355_vm3 = vweird.f32 %v3415_v23  ;;  %v242_v20 = vld [vmem:[%s4784_s7] sm:$0x3] }
 0x1ac   :  { %3416 = vrsqrt.f32 %v345_v24  ;;  %vm356_vm5 = vmor %vm354_vm4, %vm355_vm3  ;;  %vm364_vm7 = vweird.f32 %v345_v24  ;;  %v404_v21 = vperm.slane %v242_v20, 0 }
 0x1ad   :  { %v350_v26 = vmul.f32 %v3415_v23, %v349_v25 }
 0x1af   :  { %v351_v27 = vmul.f32 0.5, %v350_v26  ;;  %v336_v28 = vpop.xlane.xlu0 %335 }
 0x1b0   :  { %v342_v29 = vmul.f32 %v336_v28, %v3809_v59 }
 0x1b1   :  { %v352_v31 = vsub.f32 1.5, %v351_v27 }
 0x1b2   :  { %v3417_v32 = vpop.eup %3416  ;;  %v346_v33 = vadd.f32 1e-05, %v342_v29 }
 0x1b3   :  { %v353_v34 = vmul.f32 %v3415_v23, %v352_v31  ;;  %v359_v35 = vmul.f32 %v3417_v32, %v345_v24  ;;  %vm365_vm6 = vweird.f32 %v3417_v32 }
 0x1b4   :  { %3418 = vrsqrt.f32 %v346_v33  ;;  %vm366_vm8 = vmor %vm364_vm7, %vm365_vm6  ;;  %vm374_vm9 = vweird.f32 %v346_v33 }
 0x1b5   :  { %v360_v36 = vmul.f32 %v3417_v32, %v359_v35  ;;  %v357_v38 = vsel %vm356_vm5, %v3415_v23, %v353_v34 }
 0x1b6   :  { %v388_v47 = vmul.f32 %v357_v38, %v320_v62 }
 0x1b7   :  { %v361_v39 = vmul.f32 0.5, %v360_v36  ;;  %v339_v40 = vpop.xlane.xlu1 %338 }
 0x1b8   :  { %v343_v42 = vmul.f32 %v339_v40, %v3809_v59  ;;  %v393_v56 = vmul.f32 %v392_v48, %v388_v47 }
 0x1b9   :  { %v362_v43 = vsub.f32 1.5, %v361_v39 }
 0x1ba   :  { %v3419_v45 = vpop.eup %3418  ;;  %v347_v46 = vadd.f32 1e-05, %v343_v42  ;;  %v398_v63 = vadd.f32 %v397_v57, %v393_v56 }
 0x1bb   :  { %v363_v49 = vmul.f32 %v3417_v32, %v362_v43  ;;  %v369_v50 = vmul.f32 %v3419_v45, %v346_v33  ;;  %vm375_vm10 = vweird.f32 %v3419_v45 }
 0x1bc   :  { %3420 = vrsqrt.f32 %v347_v46  ;;  %vm376_vm11 = vmor %vm374_vm9, %vm375_vm10  ;;  %vm384_vm12 = vweird.f32 %v347_v46 }
 0x1bd   :  { %v367_v53 = vsel %vm366_vm8, %v3417_v32, %v363_v49  ;;  %v370_v54 = vmul.f32 %v3419_v45, %v369_v50 }
 0x1be   :  { %v389_v55 = vmul.f32 %v367_v53, %v3816_v3 }
 0x1bf   :  { %v371_v58 = vmul.f32 0.5, %v370_v54 }
 0x1c0   :  { %v394_v60 = vmul.f32 %v392_v48, %v389_v55 }
 0x1c1   :  { %v372_v61 = vsub.f32 1.5, %v371_v58 }
 0x1c2   :  { %v3421_v62 = vpop.eup %3420  ;;  %v399_v0 = vadd.f32 %v397_v57, %v394_v60 }
 0x1c3   :  { %v373_v1 = vmul.f32 %v3419_v45, %v372_v61  ;;  %v379_v2 = vmul.f32 %v3421_v62, %v347_v46  ;;  %vm385_vm13 = vweird.f32 %v3421_v62 }
 0x1c4   :  { %v402_v4 = vpack.c.bf16 %v399_v0, %v398_v63  ;;  %vm386_vm14 = vmor %vm384_vm12, %vm385_vm13 }
 0x1c5   :  { %v380_v5 = vmul.f32 %v3421_v62, %v379_v2  ;;  %v377_v6 = vsel %vm376_vm11, %v3419_v45, %v373_v1 }
 0x1c6   :  { %3060 = vmatmul.msk.bf16.vlgmr.msra.gmra.mxu2 %vm296_vm1, %v402_v4  ;;  %v390_v9 = vmul.f32 %v377_v6, %v3823_v8 }
 0x1c7   :  { %v381_v7 = vmul.f32 0.5, %v380_v5 }
 0x1c8   :  { %v395_v14 = vmul.f32 %v392_v48, %v390_v9 }
 0x1c9   :  { %v382_v3 = vsub.f32 1.5, %v381_v7 }
 0x1ca   :  { %v400_v16 = vadd.f32 %v397_v57, %v395_v14 }
 0x1cb   :  { %v383_v10 = vmul.f32 %v3421_v62, %v382_v3 }
 0x1cd   :  { %v387_v11 = vsel %vm386_vm14, %v3421_v62, %v383_v10  ;;  %v3313_v10 = vld [vmem:[%s4785_s8 + $0x8] sm:$0xff] }
 0x1ce   :  { %v391_v12 = vmul.f32 %v387_v11, %v3830_v13  ;;  %599 = vmatpush.bf16.msrb.mxu1 %v3313_v10 }
 0x1d0   :  { %v396_v15 = vmul.f32 %v392_v48, %v391_v12 }
 0x1d2   :  { %v401_v17 = vadd.f32 %v397_v57, %v396_v15 }
 0x1d4   :  { %v403_v18 = vpack.c.bf16 %v401_v17, %v400_v16 }
 0x1d6   :  { %3061 = vmatmul.msk.bf16.gmra.mxu2 %vm296_vm1, %v403_v18 }
 0x249   :  { %v432_v19 = vpop.f32.mrf.mxu2 }
 0x24a   :  { %v433_v8 = vadd.f32 %v432_v19, %v404_v21 }
 0x251   :  { %v434_v22 = vpop.f32.mrf.mxu2 }
 0x252   :  { %v435_v23 = vadd.f32 %v434_v22, %v404_v21 }
 0x254   :  { %v3859_v24 = vpack.c.bf16 %v435_v23, %v433_v8 }
 0x256   :  { %513 = vrot.lane.b32.xlu1 %v3859_v24, %s3593_s27  ;;  %515 = vrot.lane.b32.xlu0 %v3859_v24, %s3594_s28 }
 0x257   :  { %444 = vrot.lane.b32.xlu2 %v3859_v24, %s3595_s4 }
 0x259   :  { %v437_v33 = vpop.f32.mrf.mxu2 }
 0x25a   :  { %v438_v47 = vadd.f32 %v437_v33, %v404_v21 }
 0x261   :  { %v439_v38 = vpop.f32.mrf.mxu2 }
 0x262   :  { %v440_v46 = vadd.f32 %v439_v38, %v404_v21 }
 0x264   :  { %v3878_v48 = vpack.c.bf16 %v440_v46, %v438_v47 }
 0x2b1   :  { %v445_v13 = vpop.permute.xlu2 %444 }
 0x2b2   :  { %v451_v25 = vsel %vm446_vm15, %v445_v13, 0 }
 0x2b3   :  { %460 = vmatpush.bf16.xpose.msra.mxu3 %v451_v25 }
 0x2ba   :  { %3062 = vmatmul.msk.bf16.vlgmr.msra.gmra.mxu3 %vm446_vm15, %v3859_v24 }
 0x2c8   :  { %v516_v26 = vpop.permute.xlu0 %515  ;;  %v514_v28 = vpop.permute.xlu1 %513 }
 0x2c9   :  { %v521_v27 = vsel %vm446_vm15, %v516_v26, 0 }
 0x2ca   :  { %530 = vmatpush.bf16.xpose.msrb.mxu2 %v521_v27 }
 0x2d1   :  { %3064 = vmatmul.msk.bf16.vlgmr.msrb.gmra.mxu2 %vm446_vm15, %v514_v28  ;;  %v3904_v28 = vld [vmem:[%s4785_s8] sm:$0xff] }
 0x2d2   :  { %622 = vmatpush.bf16.msra.mxu2 %v3904_v28 }
 0x33d   :  { %v462_v29 = vpop.f32.mrf.mxu3 }
 0x33e   :  { %v467_v31 = vmul.f32 0.25, %v462_v29 }
 0x340   :  { %v469_v32 = vsel %vm446_vm15, %v467_v31, -inf }
 0x341   :  { %470 = vmax.xlane.f32.xlu2 %v469_v32 }
 0x345   :  { %v464_v34 = vpop.f32.mrf.mxu3 }
 0x346   :  { %v468_v35 = vmul.f32 0.25, %v464_v34 }
 0x348   :  { %v472_v36 = vsel %vm446_vm15, %v468_v35, -inf }
 0x349   :  { %473 = vmax.xlane.f32.xlu0 %v472_v36 }
 0x354   :  { %v532_v39 = vpop.f32.mrf.mxu2 }
 0x355   :  { %v537_v40 = vmul.f32 0.25, %v532_v39  ;;  %v251_v39 = vld [vmem:[%s4786_s9] sm:$0x3] }
 0x357   :  { %v539_v41 = vsel %vm446_vm15, %v537_v40, -inf }
 0x358   :  { %540 = vmax.xlane.f32.xlu1 %v539_v41 }
 0x35c   :  { %v534_v42 = vpop.f32.mrf.mxu2 }
 0x35d   :  { %v538_v43 = vmul.f32 0.25, %v534_v42 }
 0x35f   :  { %v542_v45 = vsel %vm446_vm15, %v538_v43, -inf }
 0x360   :  { %543 = vmax.xlane.f32.xlu2 %v542_v45 }
 0x371   :  { %492 = vrot.lane.b32.xlu1 %v3859_v24, %s3596_s23 }
 0x379   :  { %631 = vrot.lane.b32.xlu1 %v3878_v48, %s3595_s4 }
 0x3b4   :  { %v471_v49 = vpop.xlane.xlu2 %470 }
 0x3b5   :  { %v475_v50 = vsub.f32 %v467_v31, %v471_v49 }
 0x3b7   :  { %v477_v52 = vmul.f32 1.442695, %v475_v50 }
 0x3b9   :  { %3422 = vpow2.f32 %v477_v52 }
 0x3bc   :  { %v474_v53 = vpop.xlane.xlu0 %473 }
 0x3bd   :  { %v476_v54 = vsub.f32 %v468_v35, %v474_v53 }
 0x3bf   :  { %v3423_v55 = vpop.eup %3422  ;;  %v479_v56 = vmul.f32 1.442695, %v476_v54 }
 0x3c0   :  { %v481_v57 = vsel %vm446_vm15, %v3423_v55, 0.0 }
 0x3c1   :  { %3424 = vpow2.f32 %v479_v56  ;;  %482 = vadd.xlane.f32.xlu0 %v481_v57 }
 0x3c7   :  { %v3425_v58 = vpop.eup %3424 }
 0x3c8   :  { %v484_v60 = vsel %vm446_vm15, %v3425_v58, 0.0 }
 0x3c9   :  { %485 = vadd.xlane.f32.xlu2 %v484_v60 }
 0x3cb   :  { %v541_v61 = vpop.xlane.xlu1 %540 }
 0x3cc   :  { %v545_v62 = vsub.f32 %v537_v40, %v541_v61 }
 0x3ce   :  { %v547_v63 = vmul.f32 1.442695, %v545_v62 }
 0x3d0   :  { %3426 = vpow2.f32 %v547_v63 }
 0x3d3   :  { %v544_v0 = vpop.xlane.xlu2 %543 }
 0x3d4   :  { %v546_v1 = vsub.f32 %v538_v43, %v544_v0  ;;  %v3913_v43 = vperm.slane %v251_v39, 0 }
 0x3d6   :  { %v3427_v2 = vpop.eup %3426  ;;  %v549_v4 = vmul.f32 1.442695, %v546_v1 }
 0x3d7   :  { %v551_v5 = vsel %vm446_vm15, %v3427_v2, 0.0 }
 0x3d8   :  { %3428 = vpow2.f32 %v549_v4  ;;  %552 = vadd.xlane.f32.xlu0 %v551_v5 }
 0x3de   :  { %v3429_v6 = vpop.eup %3428 }
 0x3df   :  { %v554_v7 = vsel %vm446_vm15, %v3429_v6, 0.0 }
 0x3e0   :  { %555 = vadd.xlane.f32.xlu2 %v554_v7 }
 0x3e3   :  { %v493_v3 = vpop.permute.xlu1 %492 }
 0x3e4   :  { %505 = vmatpush.bf16.msrb.mxu3 %v493_v3 }
 0x3eb   :  { %v632_v8 = vpop.permute.xlu1 %631 }
 0x3ec   :  { %562 = vrot.lane.b32.xlu0 %v3859_v24, %s3597_s29  ;;  %v637_v26 = vsel %vm446_vm15, %v632_v8, 0 }
 0x3f4   :  { %699 = vrot.lane.b32.xlu0 %v3878_v48, %s3593_s27 }
 0x3f8   :  { %701 = vrot.lane.b32.xlu2 %v3878_v48, %s3594_s28 }
 0x434   :  { %v483_v9 = vpop.xlane.xlu0 %482 }
 0x435   :  { %3430 = vrcp.f32 %v483_v9 }
 0x43b   :  { %v3431_v12 = vpop.eup %3430 }
 0x43c   :  { %v486_v11 = vpop.xlane.xlu2 %485  ;;  %v489_v15 = vmul.f32 %v3431_v12, %v3423_v55 }
 0x43d   :  { %3432 = vrcp.f32 %v486_v11 }
 0x443   :  { %v3433_v14 = vpop.eup %3432 }
 0x444   :  { %v490_v16 = vmul.f32 %v3433_v14, %v3425_v58 }
 0x446   :  { %v491_v17 = vpack.c.bf16 %v490_v16, %v489_v15 }
 0x448   :  { %3063 = vmatmul.msk.bf16.vlgmr.msrb.gmra.mxu3 %vm446_vm15, %v491_v17 }
 0x44b   :  { %v553_v18 = vpop.xlane.xlu0 %552 }
 0x453   :  { %v556_v19 = vpop.xlane.xlu2 %555 }
 0x454   :  { %3434 = vrcp.f32 %v556_v19 }
 0x455   :  { %3436 = vrcp.f32 %v553_v18 }
 0x45a   :  { %v3435_v20 = vpop.eup %3434 }
 0x45b   :  { %v3437_v21 = vpop.eup %3436  ;;  %v702_v22 = vpop.permute.xlu2 %701  ;;  %v560_v23 = vmul.f32 %v3435_v20, %v3429_v6 }
 0x45c   :  { %v707_v24 = vsel %vm446_vm15, %v702_v22, 0  ;;  %v559_v13 = vmul.f32 %v3437_v21, %v3427_v2 }
 0x45d   :  { %716 = vmatpush.bf16.xpose.msra.mxu1 %v707_v24 }
 0x45e   :  { %v563_v25 = vpop.permute.xlu0 %562  ;;  %v561_v27 = vpack.c.bf16 %v560_v23, %v559_v13 }
 0x45f   :  { %575 = vmatpush.bf16.msra.mxu3 %v563_v25 }
 0x462   :  { %3065 = vmatmul.msk.bf16.vlgmr.msra.gmra.mxu3 %vm446_vm15, %v561_v27 }
 0x463   :  { %646 = vmatpush.bf16.xpose.msrb.mxu3 %v637_v26 }
 0x466   :  { %v700_v36 = vpop.permute.xlu0 %699 }
 0x46b   :  { %779 = vmatpush.bf16.msra.mxu3 %v3313_v10 }
 0x472   :  { %3076 = vmatmul.msk.bf16.vlgmr.msrb.gmra.mxu3 %vm446_vm15, %v3878_v48 }
 0x4cb   :  { %v507_v29 = vpop.f32.mrf.mxu3 }
 0x4d3   :  { %v509_v31 = vpop.f32.mrf.mxu3 }
 0x4d4   :  { %v512_v32 = vpack.c.bf16 %v509_v31, %v507_v29 }
 0x4d6   :  { %3075 = vmatmul.msk.bf16.vlgmr.msra.gmra.mxu2 %vm446_vm15, %v512_v32 }
 0x4e5   :  { %v577_v33 = vpop.f32.mrf.mxu3 }
 0x4ed   :  { %v579_v34 = vpop.f32.mrf.mxu3 }
 0x4ee   :  { %v582_v35 = vpack.c.bf16 %v579_v34, %v577_v33 }
 0x4f0   :  { %3070 = vmatmul.msk.bf16.vlgmr.msrb.gmra.mxu1 %vm446_vm15, %v582_v35 }
 0x4f5   :  { %v648_v38 = vpop.f32.mrf.mxu3 }
 0x4f6   :  { %v653_v1 = vmul.f32 0.25, %v648_v38  ;;  %v3317_v38 = vld [vmem:[%s4789_s12 + $0x8] sm:$0xff] }
 0x4f7   :  { %937 = vmatpush.bf16.msrb.mxu1 %v3317_v38  ;;  %v3326_v38 = vld [vmem:[%s4791_s14 + $0x30] sm:$0xff] }
 0x4f8   :  { %v655_v2 = vsel %vm446_vm15, %v653_v1, -inf }
 0x4fd   :  { %v650_v49 = vpop.f32.mrf.mxu3 }
 0x4fe   :  { %v654_v52 = vmul.f32 0.25, %v650_v49 }
 0x500   :  { %3078 = vmatmul.msk.bf16.vlgmr.msra.gmra.mxu1 %vm446_vm15, %v700_v36  ;;  %v658_v55 = vsel %vm446_vm15, %v654_v52, -inf }
 0x559   :  { %v624_v40 = vpop.f32.mrf.mxu2 }
 0x561   :  { %v626_v53 = vpop.f32.mrf.mxu2 }
 0x56d   :  { %v601_v41 = vpop.f32.mrf.mxu1 }
 0x56e   :  { %v625_v42 = vadd.f32 %v624_v40, %v601_v41  ;;  %v3316_v41 = vld [vmem:[%s4789_s12] sm:$0xff] }
 0x56f   :  { %938 = vmatpush.bf16.msrb.mxu1 %v3316_v41 }
 0x570   :  { %v803_v45 = vadd.f32 %v625_v42, %v3784_v30 }
 0x572   :  { %v3917_v46 = vadd.f32 %v3913_v43, %v803_v45 }
 0x574   :  { %v812_v47 = vsel %vm296_vm1, %v3917_v46, 0.0 }
 0x575   :  { %813 = vadd.xlane.f32.xlu0 %v812_v47  ;;  %v603_v50 = vpop.f32.mrf.mxu1 }
 0x576   :  { %v627_v54 = vadd.f32 %v626_v53, %v603_v50 }
 0x578   :  { %v804_v58 = vadd.f32 %v627_v54, %v3791_v37 }
 0x57a   :  { %v3925_v60 = vadd.f32 %v3913_v43, %v804_v58 }
 0x57c   :  { %v815_v63 = vsel %vm296_vm1, %v3925_v60, 0.0 }
 0x57d   :  { %659 = vmax.xlane.f32.xlu0 %v658_v55  ;;  %v718_v56 = vpop.f32.mrf.mxu1 }
 0x57e   :  { %v723_v57 = vmul.f32 0.25, %v718_v56 }
 0x580   :  { %v725_v30 = vsel %vm446_vm15, %v723_v57, -inf }
 0x581   :  { %726 = vmax.xlane.f32.xlu1 %v725_v30 }
 0x585   :  { %v720_v61 = vpop.f32.mrf.mxu1 }
 0x586   :  { %v724_v62 = vmul.f32 0.25, %v720_v61 }
 0x588   :  { %v728_v0 = vsel %vm446_vm15, %v724_v62, -inf }
 0x589   :  { %816 = vadd.xlane.f32.xlu1 %v815_v63  ;;  %729 = vmax.xlane.f32.xlu2 %v728_v0 }
 0x591   :  { %656 = vmax.xlane.f32.xlu2 %v655_v2 }
 0x5e8   :  { %v814_v37 = vpop.xlane.xlu0 %813 }
 0x5e9   :  { %v824_v4 = vmul.f32 %v814_v37, %v3809_v59  ;;  %v252_v37 = vld [vmem:[%s4787_s10] sm:$0x3] }
 0x5eb   :  { %v3933_v5 = vsub.f32 %v3917_v46, %v824_v4 }
 0x5ed   :  { %v832_v6 = vmul.f32 %v3933_v5, %v3933_v5 }
 0x5ef   :  { %v836_v7 = vsel %vm296_vm1, %v832_v6, 0.0 }
 0x5f0   :  { %837 = vadd.xlane.f32.xlu0 %v836_v7  ;;  %v660_v11 = vpop.xlane.xlu0 %659 }
 0x5f1   :  { %v662_v18 = vsub.f32 %v654_v52, %v660_v11 }
 0x5f3   :  { %v665_v22 = vmul.f32 1.442695, %v662_v18 }
 0x5f4   :  { %v727_v3 = vpop.xlane.xlu1 %726 }
 0x5f5   :  { %v731_v9 = vsub.f32 %v723_v57, %v727_v3  ;;  %v3971_v3 = vperm.slane %v252_v37, 0 }
 0x5f7   :  { %v733_v10 = vmul.f32 1.442695, %v731_v9 }
 0x5f9   :  { %3438 = vpow2.f32 %v733_v10  ;;  %v253_v10 = vld [vmem:[%s4788_s11] sm:$0x3] }
 0x5fc   :  { %v817_v12 = vpop.xlane.xlu1 %816  ;;  %v730_v14 = vpop.xlane.xlu2 %729 }
 0x5fd   :  { %v825_v15 = vmul.f32 %v817_v12, %v3809_v59  ;;  %v732_v16 = vsub.f32 %v724_v62, %v730_v14 }
 0x5ff   :  { %v3439_v17 = vpop.eup %3438  ;;  %v735_v19 = vmul.f32 1.442695, %v732_v16  ;;  %v3940_v20 = vsub.f32 %v3925_v60, %v825_v15  ;;  %v3977_v16 = vperm.slane %v253_v10, 0 }
 0x600   :  { %v737_v21 = vsel %vm446_vm15, %v3439_v17, 0.0 }
 0x601   :  { %3440 = vpow2.f32 %v735_v19  ;;  %738 = vadd.xlane.f32.xlu1 %v737_v21  ;;  %v833_v23 = vmul.f32 %v3940_v20, %v3940_v20 }
 0x602   :  { %3442 = vpow2.f32 %v665_v22 }
 0x603   :  { %v839_v26 = vsel %vm296_vm1, %v833_v23, 0.0 }
 0x604   :  { %v657_v8 = vpop.xlane.xlu2 %656 }
 0x605   :  { %v661_v24 = vsub.f32 %v653_v1, %v657_v8 }
 0x607   :  { %v3441_v13 = vpop.eup %3440  ;;  %v663_v25 = vmul.f32 1.442695, %v661_v24 }
 0x608   :  { %v740_v27 = vsel %vm446_vm15, %v3441_v13, 0.0  ;;  %v3947_v29 = vpop.eup %3442 }
 0x609   :  { %3444 = vpow2.f32 %v663_v25  ;;  %840 = vadd.xlane.f32.xlu1 %v839_v26  ;;  %741 = vadd.xlane.f32.xlu2 %v740_v27  ;;  %v670_v33 = vsel %vm446_vm15, %v3947_v29, 0.0  ;;  %v262_v25 = vld [vmem:[%s4790_s13] sm:$0x3] }
 0x60f   :  { %v3949_v31 = vpop.eup %3444 }
 0x610   :  { %v667_v32 = vsel %vm446_vm15, %v3949_v31, 0.0 }
 0x611   :  { %668 = vadd.xlane.f32.xlu0 %v667_v32  ;;  %671 = vadd.xlane.f32.xlu1 %v670_v33 }
 0x621   :  { %748 = vrot.lane.b32.xlu2 %v3878_v48, %s3597_s29 }
 0x625   :  { %678 = vrot.lane.b32.xlu0 %v3878_v48, %s3596_s23 }
 0x663   :  { %v838_v34 = vpop.xlane.xlu0 %837 }
 0x664   :  { %v848_v35 = vmul.f32 %v838_v34, %v3809_v59  ;;  %v3327_v34 = vld [vmem:[%s4791_s14 + $0x38] sm:$0xff] }
 0x666   :  { %v852_v36 = vadd.f32 1e-05, %v848_v35 }
 0x668   :  { %3446 = vrsqrt.f32 %v852_v36  ;;  %vm862_vm2 = vweird.f32 %v852_v36 }
 0x66e   :  { %v3447_v40 = vpop.eup %3446 }
 0x66f   :  { %v857_v42 = vmul.f32 %v3447_v40, %v852_v36  ;;  %vm863_vm0 = vweird.f32 %v3447_v40 }
 0x670   :  { %vm864_vm3 = vmor %vm862_vm2, %vm863_vm0 }
 0x671   :  { %v858_v48 = vmul.f32 %v3447_v40, %v857_v42 }
 0x673   :  { %v859_v52 = vmul.f32 0.5, %v858_v48 }
 0x674   :  { %v739_v39 = vpop.xlane.xlu1 %738 }
 0x675   :  { %3448 = vrcp.f32 %v739_v39  ;;  %v860_v55 = vsub.f32 1.5, %v859_v52 }
 0x677   :  { %v861_v62 = vmul.f32 %v3447_v40, %v860_v55 }
 0x679   :  { %v865_v4 = vsel %vm864_vm3, %v3447_v40, %v861_v62  ;;  %v3322_v62 = vld [vmem:[%s4791_s14 + $0x10] sm:$0xff] }
 0x67a   :  { %v896_v9 = vmul.f32 %v865_v4, %v3933_v5 }
 0x67b   :  { %v3449_v53 = vpop.eup %3448 }
 0x67c   :  { %v841_v45 = vpop.xlane.xlu1 %840  ;;  %v742_v47 = vpop.xlane.xlu2 %741  ;;  %v745_v56 = vmul.f32 %v3449_v53, %v3439_v17  ;;  %v901_v17 = vmul.f32 %v3971_v3, %v896_v9 }
 0x67d   :  { %v849_v49 = vmul.f32 %v841_v45, %v3809_v59  ;;  %3450 = vrcp.f32 %v742_v47  ;;  %v3325_v45 = vld [vmem:[%s4791_s14 + $0x28] sm:$0xff] }
 0x67e   :  { %v906_v22 = vadd.f32 %v3977_v16, %v901_v17  ;;  %v3320_v17 = vld [vmem:[%s4791_s14] sm:$0xff] }
 0x67f   :  { %v853_v50 = vadd.f32 1e-05, %v849_v49 }
 0x681   :  { %3452 = vrsqrt.f32 %v853_v50  ;;  %vm872_vm5 = vweird.f32 %v853_v50 }
 0x683   :  { %v3451_v54 = vpop.eup %3450 }
 0x684   :  { %v746_v57 = vmul.f32 %v3451_v54, %v3441_v13  ;;  %v749_v58 = vpop.permute.xlu2 %748  ;;  %v672_v0 = vpop.xlane.xlu1 %671 }
 0x685   :  { %761 = vmatpush.bf16.msrb.mxu2 %v749_v58  ;;  %v669_v1 = vpop.xlane.xlu0 %668  ;;  %3454 = vrcp.f32 %v672_v0 }
 0x686   :  { %v747_v30 = vpack.c.bf16 %v746_v57, %v745_v56  ;;  %3456 = vrcp.f32 %v669_v1  ;;  %v3323_v56 = vld [vmem:[%s4791_s14 + $0x18] sm:$0xff] }
 0x687   :  { %v3453_v61 = vpop.eup %3452 }
 0x688   :  { %v867_v63 = vmul.f32 %v3453_v61, %v853_v50  ;;  %3079 = vmatmul.msk.bf16.vlgmr.msrb.gmra.mxu2 %vm446_vm15, %v747_v30  ;;  %vm873_vm4 = vweird.f32 %v3453_v61  ;;  %v3324_v50 = vld [vmem:[%s4791_s14 + $0x20] sm:$0xff] }
 0x689   :  { %vm874_vm6 = vmor %vm872_vm5, %vm873_vm4  ;;  %1161 = vmatpush.bf16.msra.mxu2 %v3327_v34 }
 0x68a   :  { %v868_v2 = vmul.f32 %v3453_v61, %v867_v63 }
 0x68b   :  { %v3455_v12 = vpop.eup %3454 }
 0x68c   :  { %v869_v6 = vmul.f32 0.5, %v868_v2  ;;  %v3457_v14 = vpop.eup %3456  ;;  %v676_v5 = vmul.f32 %v3455_v12, %v3947_v29  ;;  %v3992_v29 = vperm.slane %v262_v25, 0 }
 0x68d   :  { %v675_v21 = vmul.f32 %v3457_v14, %v3949_v31  ;;  %1162 = vmatpush.bf16.msra.mxu2 %v3326_v38 }
 0x68e   :  { %v870_v7 = vsub.f32 1.5, %v869_v6  ;;  %v3321_v6 = vld [vmem:[%s4791_s14 + $0x8] sm:$0xff] }
 0x68f   :  { %v677_v24 = vpack.c.bf16 %v676_v5, %v675_v21 }
 0x690   :  { %v871_v11 = vmul.f32 %v3453_v61, %v870_v7 }
 0x691   :  { %1163 = vmatpush.bf16.msra.mxu2 %v3325_v45 }
 0x692   :  { %v875_v15 = vsel %vm874_vm6, %v3453_v61, %v871_v11 }
 0x693   :  { %v897_v18 = vmul.f32 %v875_v15, %v3940_v20 }
 0x695   :  { %v902_v19 = vmul.f32 %v3971_v3, %v897_v18  ;;  %1164 = vmatpush.bf16.msra.mxu2 %v3324_v50 }
 0x697   :  { %v907_v8 = vadd.f32 %v3977_v16, %v902_v19  ;;  %v679_v23 = vpop.permute.xlu0 %678 }
 0x698   :  { %691 = vmatpush.bf16.msrb.mxu0 %v679_v23 }
 0x699   :  { %v910_v13 = vpack.c.bf16 %v907_v8, %v906_v22  ;;  %1165 = vmatpush.bf16.msra.mxu2 %v3323_v56  ;;  %v3598_v56 = vmov -1.0  }
 0x69b   :  { %3077 = vmatmul.msk.bf16.vlgmr.msrb.gmra.mxu0 %vm446_vm15, %v677_v24  ;;  %3090 = vmatmul.msk.bf16.vlgmr.msrb.gmra.mxu1 %vm296_vm1, %v910_v13 }
 0x69c   :  { %796 = vmatpush.bf16.msra.mxu0 %v3904_v28 }
 0x69d   :  { %1166 = vmatpush.bf16.msra.mxu2 %v3322_v62 }
 0x6a1   :  { %1167 = vmatpush.bf16.msra.mxu2 %v3321_v6 }
 0x6a5   :  { %1168 = vmatpush.bf16.msra.mxu2 %v3320_v17 }
 0x70b   :  { %v763_v20 = vpop.f32.mrf.mxu2 }
 0x713   :  { %v765_v26 = vpop.f32.mrf.mxu2 }
 0x714   :  { %v768_v27 = vpack.c.bf16 %v765_v26, %v763_v20 }
 0x716   :  { %3080 = vmatmul.msk.bf16.vlgmr.msra.gmra.mxu3 %vm446_vm15, %v768_v27 }
 0x718   :  { %v693_v31 = vpop.f32.mrf.mxu0  ;;  %v940_v32 = vpop.f32.mrf.mxu1 }
 0x719   :  { %v3996_v33 = vadd.f32 %v940_v32, %v3992_v29 }
 0x71b   :  { %v3999_v28 = vmul.f32 0.70710677, %v3996_v33 }
 0x71d   :  { %v966_v35 = vand.u32 2147483647, %v3999_v28  ;;  %vm958_vm0 = vcmp.ge.f32.partialorder %v3999_v28, 0.0 }
 0x71f   :  { %v970_v36 = vmul.f32 0.3275911, %v966_v35  ;;  %v1074_v9 = vsub.f32 0.0, %v966_v35 }
 0x720   :  { %v695_v39 = vpop.f32.mrf.mxu0  ;;  %v942_v40 = vpop.f32.mrf.mxu1 }
 0x721   :  { %v974_v41 = vadd.f32 1.0, %v970_v36  ;;  %v698_v42 = vpack.c.bf16 %v695_v39, %v693_v31  ;;  %v4009_v48 = vadd.f32 %v942_v40, %v3992_v29  ;;  %v1078_v19 = vmul.f32 %v1074_v9, %v966_v35 }
 0x723   :  { %3458 = vrcp.f32 %v974_v41  ;;  %3081 = vmatmul.msk.bf16.vlgmr.msra.gmra.mxu0 %vm446_vm15, %v698_v42  ;;  %v4016_v47 = vmul.f32 0.70710677, %v4009_v48  ;;  %v989_v58 = vand.u32 2147483648, %v974_v41  ;;  %v987_v61 = vand.u32 2147483647, %v974_v41 }
 0x724   :  { %vm983_vm8 = vweird.f32 %v974_v41  ;;  %v1082_v24 = vmul.f32 1.442695, %v1078_v19  ;;  %v951_v28 = vmul.f32 0.5, %v4009_v48 }
 0x725   :  { %v967_v49 = vand.u32 2147483647, %v4016_v47  ;;  %v990_v0 = vor.u32 1.1754944e-38, %v989_v58  ;;  %vm988_vm10 = vcmp.eq.f32.partialorder %v987_v61, 8.507059e+37  ;;  %vm959_vm2 = vcmp.ge.f32.partialorder %v4016_v47, 0.0 }
 0x726   :  { %v963_v61 = vsel %vm959_vm2, 1.0, %v3598_v56 }
 0x727   :  { %v971_v52 = vmul.f32 0.3275911, %v967_v49  ;;  %v1075_v20 = vsub.f32 0.0, %v967_v49 }
 0x729   :  { %v3459_v53 = vpop.eup %3458  ;;  %v975_v55 = vadd.f32 1.0, %v971_v52  ;;  %v1079_v32 = vmul.f32 %v1075_v20, %v967_v49  ;;  %v962_v49 = vsel %vm958_vm0, 1.0, %v3598_v56 }
 0x72a   :  { %v979_v54 = vmul.f32 %v3459_v53, %v974_v41  ;;  %vm984_vm7 = vweird.f32 %v3459_v53 }
 0x72b   :  { %3460 = vrcp.f32 %v975_v55  ;;  %vm985_vm9 = vmor %vm983_vm8, %vm984_vm7  ;;  %v1004_v12 = vand.u32 2147483648, %v975_v55  ;;  %v1002_v15 = vand.u32 2147483647, %v975_v55  ;;  %vm998_vm12 = vweird.f32 %v975_v55 }
 0x72c   :  { %v980_v57 = vsub.f32 1.0, %v979_v54  ;;  %3462 = vpow2.f32 %v1082_v24  ;;  %v1084_v39 = vmul.f32 1.442695, %v1079_v32 }
 0x72d   :  { %v1005_v22 = vor.u32 1.1754944e-38, %v1004_v12  ;;  %vm1003_vm14 = vcmp.eq.f32.partialorder %v1002_v15, 8.507059e+37 }
 0x72e   :  { %v981_v30 = vmul.f32 %v3459_v53, %v980_v57  ;;  %3464 = vpow2.f32 %v1084_v39 }
 0x730   :  { %v982_v63 = vadd.f32 %v3459_v53, %v981_v30 }
 0x731   :  { %v3461_v1 = vpop.eup %3460 }
 0x732   :  { %v986_v2 = vsel %vm985_vm9, %v3459_v53, %v982_v63  ;;  %v994_v4 = vmul.f32 %v3461_v1, %v975_v55  ;;  %vm999_vm11 = vweird.f32 %v3461_v1  ;;  %v3463_v41 = vpop.eup %3462 }
 0x733   :  { %v991_v37 = vsel %vm988_vm10, %v990_v0, %v986_v2  ;;  %vm1000_vm13 = vmor %vm998_vm12, %vm999_vm11  ;;  %v950_v0 = vmul.f32 0.5, %v3996_v33 }
 0x734   :  { %v1038_v7 = vmul.f32 1.0614054, %v991_v37  ;;  %v995_v10 = vsub.f32 1.0, %v994_v4  ;;  %v3465_v55 = vpop.eup %3464 }
 0x736   :  { %v1042_v11 = vadd.f32 -1.4531521, %v1038_v7  ;;  %v996_v14 = vmul.f32 %v3461_v1, %v995_v10 }
 0x738   :  { %v1046_v18 = vmul.f32 %v1042_v11, %v991_v37  ;;  %v997_v5 = vadd.f32 %v3461_v1, %v996_v14 }
 0x73a   :  { %v1050_v21 = vadd.f32 1.4214138, %v1046_v18  ;;  %v1001_v8 = vsel %vm1000_vm13, %v3461_v1, %v997_v5 }
 0x73b   :  { %v1006_v13 = vsel %vm1003_vm14, %v1005_v22, %v1001_v8 }
 0x73c   :  { %v1054_v23 = vmul.f32 %v1050_v21, %v991_v37  ;;  %v1039_v25 = vmul.f32 1.0614054, %v1006_v13 }
 0x73e   :  { %v1058_v26 = vadd.f32 -0.28449672, %v1054_v23  ;;  %v1043_v27 = vadd.f32 -1.4531521, %v1039_v25 }
 0x740   :  { %v1062_v31 = vmul.f32 %v1058_v26, %v991_v37  ;;  %v1047_v34 = vmul.f32 %v1043_v27, %v1006_v13 }
 0x742   :  { %v1066_v35 = vadd.f32 0.2548296, %v1062_v31  ;;  %v1051_v36 = vadd.f32 1.4214138, %v1047_v34 }
 0x744   :  { %v1070_v38 = vmul.f32 %v1066_v35, %v991_v37  ;;  %v1055_v40 = vmul.f32 %v1051_v36, %v1006_v13 }
 0x746   :  { %v1090_v42 = vmul.f32 %v3463_v41, %v1070_v38  ;;  %v1059_v45 = vadd.f32 -0.28449672, %v1055_v40 }
 0x748   :  { %v1063_v50 = vmul.f32 %v1059_v45, %v1006_v13  ;;  %v1094_v52 = vsub.f32 1.0, %v1090_v42 }
 0x74a   :  { %v1067_v53 = vadd.f32 0.2548296, %v1063_v50  ;;  %v1098_v57 = vmul.f32 %v1094_v52, %v962_v49 }
 0x74c   :  { %v1071_v54 = vmul.f32 %v1067_v53, %v1006_v13  ;;  %v1102_v62 = vadd.f32 1.0, %v1098_v57 }
 0x74e   :  { %v1091_v58 = vmul.f32 %v3465_v55, %v1071_v54  ;;  %v1106_v2 = vmul.f32 %v1102_v62, %v950_v0 }
 0x750   :  { %v1095_v30 = vsub.f32 1.0, %v1091_v58 }
 0x752   :  { %v1099_v63 = vmul.f32 %v1095_v30, %v963_v61 }
 0x754   :  { %v1103_v1 = vadd.f32 1.0, %v1099_v63 }
 0x756   :  { %v1107_v37 = vmul.f32 %v1103_v1, %v951_v28 }
 0x758   :  { %v1110_v4 = vpack.c.bf16 %v1107_v37, %v1106_v2 }
 0x75a   :  { %1169 = vmatmul.bf16.vlgmr.msra.gmra.mxu2 %v1110_v4 }
 0x799   :  { %v781_v6 = vpop.f32.mrf.mxu3 }
 0x7a0   :  { %v798_v7 = vpop.f32.mrf.mxu0 }
 0x7a1   :  { %v799_v9 = vadd.f32 %v798_v7, %v781_v6  ;;  %v783_v12 = vpop.f32.mrf.mxu3 }
 0x7a3   :  { %v805_v47 = vadd.f32 %v799_v9, %v3798_v44  ;;  %v295_v44 = vld [vmem:[%s4792_s15] sm:$0x3] }
 0x7a4   :  { %v4055_v18 = vperm.slane %v295_v44, 0 }
 0x7a5   :  { %v4042_v10 = vadd.f32 %v3913_v43, %v805_v47 }
 0x7a7   :  { %v818_v11 = vsel %vm296_vm1, %v4042_v10, 0.0 }
 0x7a8   :  { %v800_v33 = vpop.f32.mrf.mxu0  ;;  %819 = vadd.xlane.f32.xlu1 %v818_v11 }
 0x7a9   :  { %v801_v48 = vadd.f32 %v800_v33, %v783_v12 }
 0x7ab   :  { %v806_v14 = vadd.f32 %v801_v48, %v3805_v51 }
 0x7ad   :  { %v4048_v15 = vadd.f32 %v3913_v43, %v806_v14 }
 0x7af   :  { %v821_v17 = vsel %vm296_vm1, %v4048_v15, 0.0 }
 0x7b0   :  { %822 = vadd.xlane.f32.xlu1 %v821_v17 }
 0x7dd   :  { %v1170_v19 = vpop.f32.mrf.mxu2 }
 0x7de   :  { %v1171_v5 = vadd.f32 %v1170_v19, %v4055_v18 }
 0x7e0   :  { %v4059_v21 = vadd.f32 %v1171_v5, %v3917_v46 }
 0x7e2   :  { %v1184_v51 = vsel %vm296_vm1, %v4059_v21, 0.0 }
 0x7e3   :  { %1185 = vadd.xlane.f32.xlu0 %v1184_v51  ;;  %v3311_v51 = vld [vmem:[%s4783_s6 + $0x18] sm:$0xff] }
 0x7e4   :  { %1309 = vmatpush.bf16.msrb.mxu3 %v3311_v51 }
 0x7e5   :  { %v1172_v46 = vpop.f32.mrf.mxu2 }
 0x7e6   :  { %v1173_v27 = vadd.f32 %v1172_v46, %v4055_v18 }
 0x7e8   :  { %v4071_v32 = vadd.f32 %v1173_v27, %v3925_v60 }
 0x7ea   :  { %v1187_v34 = vsel %vm296_vm1, %v4071_v32, 0.0 }
 0x81b   :  { %v820_v43 = vpop.xlane.xlu1 %819 }
 0x81c   :  { %v826_v22 = vmul.f32 %v820_v43, %v3809_v59 }
 0x81e   :  { %v830_v8 = vsub.f32 %v4042_v10, %v826_v22 }
 0x820   :  { %v834_v23 = vmul.f32 %v830_v8, %v830_v8 }
 0x822   :  { %v842_v24 = vsel %vm296_vm1, %v834_v23, 0.0 }
 0x823   :  { %843 = vadd.xlane.f32.xlu2 %v842_v24  ;;  %v823_v13 = vpop.xlane.xlu1 %822 }
 0x824   :  { %v827_v20 = vmul.f32 %v823_v13, %v3809_v59 }
 0x826   :  { %v831_v25 = vsub.f32 %v4048_v15, %v827_v20 }
 0x828   :  { %v835_v26 = vmul.f32 %v831_v25, %v831_v25 }
 0x82a   :  { %v845_v31 = vsel %vm296_vm1, %v835_v26, 0.0 }
 0x82b   :  { %846 = vadd.xlane.f32.xlu1 %v845_v31 }
 0x833   :  { %1188 = vadd.xlane.f32.xlu1 %v1187_v34 }
 0x856   :  { %v1186_v35 = vpop.xlane.xlu0 %1185 }
 0x857   :  { %v1196_v36 = vmul.f32 %v1186_v35, %v3809_v59 }
 0x859   :  { %v4077_v38 = vsub.f32 %v4059_v21, %v1196_v36  ;;  %v3558_v36 = vld [vmem:[%s4811_s24] sm:$0x3] }
 0x85b   :  { %v1204_v39 = vmul.f32 %v4077_v38, %v4077_v38 }
 0x85d   :  { %v1208_v40 = vsel %vm296_vm1, %v1204_v39, 0.0  ;;  %v4107_v39 = vperm.slane %v3558_v36, 1 }
 0x85e   :  { %1209 = vadd.xlane.f32.xlu1 %v1208_v40 }
 0x896   :  { %v844_v41 = vpop.xlane.xlu2 %843 }
 0x897   :  { %v850_v60 = vmul.f32 %v844_v41, %v3809_v59 }
 0x899   :  { %v854_v42 = vadd.f32 1e-05, %v850_v60 }
 0x89b   :  { %3466 = vrsqrt.f32 %v854_v42  ;;  %vm882_vm4 = vweird.f32 %v854_v42 }
 0x89e   :  { %v847_v45 = vpop.xlane.xlu1 %846 }
 0x89f   :  { %v851_v50 = vmul.f32 %v847_v45, %v3809_v59 }
 0x8a1   :  { %v3467_v52 = vpop.eup %3466  ;;  %v855_v53 = vadd.f32 1e-05, %v851_v50 }
 0x8a2   :  { %v877_v54 = vmul.f32 %v3467_v52, %v854_v42  ;;  %vm883_vm3 = vweird.f32 %v3467_v52  ;;  %v3559_v42 = vld [vmem:[%s4782_s5] sm:$0x3] }
 0x8a3   :  { %3468 = vrsqrt.f32 %v855_v53  ;;  %vm884_vm5 = vmor %vm882_vm4, %vm883_vm3  ;;  %vm892_vm7 = vweird.f32 %v855_v53  ;;  %v4113_v45 = vperm.slane %v3559_v42, 1 }
 0x8a4   :  { %v878_v55 = vmul.f32 %v3467_v52, %v877_v54 }
 0x8a6   :  { %v879_v49 = vmul.f32 0.5, %v878_v55  ;;  %v1189_v57 = vpop.xlane.xlu1 %1188 }
 0x8a7   :  { %v1197_v58 = vmul.f32 %v1189_v57, %v3809_v59 }
 0x8a8   :  { %v880_v30 = vsub.f32 1.5, %v879_v49 }
 0x8a9   :  { %v3469_v61 = vpop.eup %3468  ;;  %v4086_v62 = vsub.f32 %v4071_v32, %v1197_v58 }
 0x8aa   :  { %v881_v63 = vmul.f32 %v3467_v52, %v880_v30  ;;  %v887_v0 = vmul.f32 %v3469_v61, %v855_v53  ;;  %vm893_vm6 = vweird.f32 %v3469_v61 }
 0x8ab   :  { %v1205_v28 = vmul.f32 %v4086_v62, %v4086_v62  ;;  %vm894_vm8 = vmor %vm892_vm7, %vm893_vm6 }
 0x8ac   :  { %v888_v1 = vmul.f32 %v3469_v61, %v887_v0  ;;  %v885_v37 = vsel %vm884_vm5, %v3467_v52, %v881_v63 }
 0x8ad   :  { %v1211_v2 = vsel %vm296_vm1, %v1205_v28, 0.0  ;;  %v898_v7 = vmul.f32 %v885_v37, %v830_v8 }
 0x8ae   :  { %v889_v4 = vmul.f32 0.5, %v888_v1  ;;  %1212 = vadd.xlane.f32.xlu1 %v1211_v2 }
 0x8af   :  { %v903_v12 = vmul.f32 %v3971_v3, %v898_v7 }
 0x8b0   :  { %v890_v6 = vsub.f32 1.5, %v889_v4 }
 0x8b1   :  { %v908_v48 = vadd.f32 %v3977_v16, %v903_v12 }
 0x8b2   :  { %v891_v9 = vmul.f32 %v3469_v61, %v890_v6 }
 0x8b4   :  { %v895_v47 = vsel %vm894_vm8, %v3469_v61, %v891_v9 }
 0x8b5   :  { %v899_v11 = vmul.f32 %v895_v47, %v831_v25 }
 0x8b7   :  { %v904_v33 = vmul.f32 %v3971_v3, %v899_v11  ;;  %v3310_v3 = vld [vmem:[%s4783_s6 + $0x10] sm:$0xff] }
 0x8b8   :  { %1310 = vmatpush.bf16.msrb.mxu3 %v3310_v3 }
 0x8b9   :  { %v909_v14 = vadd.f32 %v3977_v16, %v904_v33 }
 0x8bb   :  { %v911_v17 = vpack.c.bf16 %v909_v14, %v908_v48 }
 0x8bd   :  { %3091 = vmatmul.msk.bf16.gmra.mxu1 %vm296_vm1, %v911_v17 }
 0x8d1   :  { %v1210_v44 = vpop.xlane.xlu1 %1209 }
 0x8d2   :  { %v1220_v19 = vmul.f32 %v1210_v44, %v3809_v59 }
 0x8d4   :  { %v1224_v5 = vadd.f32 1e-05, %v1220_v19 }
 0x8d6   :  { %3470 = vrsqrt.f32 %v1224_v5  ;;  %vm1234_vm10 = vweird.f32 %v1224_v5 }
 0x8dc   :  { %v3471_v43 = vpop.eup %3470 }
 0x8dd   :  { %v1229_v22 = vmul.f32 %v3471_v43, %v1224_v5  ;;  %vm1235_vm9 = vweird.f32 %v3471_v43 }
 0x8de   :  { %vm1236_vm11 = vmor %vm1234_vm10, %vm1235_vm9 }
 0x8df   :  { %v1230_v16 = vmul.f32 %v3471_v43, %v1229_v22 }
 0x8e1   :  { %v1231_v13 = vmul.f32 0.5, %v1230_v16 }
 0x8e3   :  { %v1232_v20 = vsub.f32 1.5, %v1231_v13 }
 0x8e5   :  { %v1233_v46 = vmul.f32 %v3471_v43, %v1232_v20 }
 0x8e7   :  { %v1237_v31 = vsel %vm1236_vm11, %v3471_v43, %v1233_v46 }
 0x8e8   :  { %v1268_v40 = vmul.f32 %v1237_v31, %v4077_v38 }
 0x8ea   :  { %v1273_v50 = vmul.f32 %v4107_v39, %v1268_v40 }
 0x8ec   :  { %v1278_v38 = vadd.f32 %v4113_v45, %v1273_v50 }
 0x921   :  { %v1213_v8 = vpop.xlane.xlu1 %1212 }
 0x922   :  { %v1221_v23 = vmul.f32 %v1213_v8, %v3809_v59 }
 0x924   :  { %v1225_v24 = vadd.f32 1e-05, %v1221_v23 }
 0x926   :  { %3472 = vrsqrt.f32 %v1225_v24  ;;  %vm1244_vm13 = vweird.f32 %v1225_v24 }
 0x92c   :  { %v3473_v25 = vpop.eup %3472 }
 0x92d   :  { %v1239_v26 = vmul.f32 %v3473_v25, %v1225_v24  ;;  %vm1245_vm12 = vweird.f32 %v3473_v25 }
 0x92e   :  { %vm1246_vm14 = vmor %vm1244_vm13, %vm1245_vm12 }
 0x92f   :  { %v1240_v27 = vmul.f32 %v3473_v25, %v1239_v26 }
 0x931   :  { %v1241_v34 = vmul.f32 0.5, %v1240_v27 }
 0x933   :  { %v1242_v35 = vsub.f32 1.5, %v1241_v34 }
 0x935   :  { %v1243_v41 = vmul.f32 %v3473_v25, %v1242_v35 }
 0x937   :  { %v1247_v60 = vsel %vm1246_vm14, %v3473_v25, %v1243_v41 }
 0x938   :  { %v1269_v52 = vmul.f32 %v1247_v60, %v4086_v62 }
 0x93a   :  { %v1274_v53 = vmul.f32 %v4107_v39, %v1269_v52  ;;  %v945_v54 = vpop.f32.mrf.mxu1 }
 0x93b   :  { %v4119_v55 = vadd.f32 %v945_v54, %v3992_v29 }
 0x93c   :  { %v1279_v49 = vadd.f32 %v4113_v45, %v1274_v53 }
 0x93d   :  { %v4124_v57 = vmul.f32 0.70710677, %v4119_v55 }
 0x93e   :  { %v1282_v58 = vpack.c.bf16 %v1279_v49, %v1278_v38 }
 0x93f   :  { %v968_v30 = vand.u32 2147483647, %v4124_v57  ;;  %vm960_vm9 = vcmp.ge.f32.partialorder %v4124_v57, 0.0 }
 0x940   :  { %3132 = vmatmul.msk.bf16.vlgmr.msrb.gmra.mxu3 %vm296_vm1, %v1282_v58 }
 0x941   :  { %v972_v61 = vmul.f32 0.3275911, %v968_v30  ;;  %v1076_v44 = vsub.f32 0.0, %v968_v30 }
 0x942   :  { %v947_v62 = vpop.f32.mrf.mxu1 }
 0x943   :  { %v976_v63 = vadd.f32 1.0, %v972_v61  ;;  %v4129_v0 = vadd.f32 %v947_v62, %v3992_v29  ;;  %v1080_v16 = vmul.f32 %v1076_v44, %v968_v30 }
 0x945   :  { %3474 = vrcp.f32 %v976_v63  ;;  %v4132_v28 = vmul.f32 0.70710677, %v4129_v0  ;;  %v1019_v9 = vand.u32 2147483648, %v976_v63  ;;  %v1017_v11 = vand.u32 2147483647, %v976_v63 }
 0x946   :  { %vm1013_vm2 = vweird.f32 %v976_v63  ;;  %v1086_v25 = vmul.f32 1.442695, %v1080_v16 }
 0x947   :  { %v969_v1 = vand.u32 2147483647, %v4132_v28  ;;  %v1020_v29 = vor.u32 1.1754944e-38, %v1019_v9  ;;  %vm1018_vm4 = vcmp.eq.f32.partialorder %v1017_v11, 8.507059e+37  ;;  %vm961_vm10 = vcmp.ge.f32.partialorder %v4132_v28, 0.0 }
 0x948   :  { %v953_v11 = vmul.f32 0.5, %v4129_v0  ;;  %v3560_v28 = vld [vmem:[%s4784_s7] sm:$0x3] }
 0x949   :  { %v973_v2 = vmul.f32 0.3275911, %v969_v1  ;;  %v1077_v46 = vsub.f32 0.0, %v969_v1 }
 0x94b   :  { %v3475_v37 = vpop.eup %3474  ;;  %v977_v6 = vadd.f32 1.0, %v973_v2  ;;  %v1081_v36 = vmul.f32 %v1077_v46, %v969_v1  ;;  %v964_v1 = vsel %vm960_vm9, 1.0, %v3598_v56 }
 0x94c   :  { %v1009_v4 = vmul.f32 %v3475_v37, %v976_v63  ;;  %vm1014_vm0 = vweird.f32 %v3475_v37 }
 0x94d   :  { %3476 = vrcp.f32 %v977_v6  ;;  %vm1015_vm3 = vmor %vm1013_vm2, %vm1014_vm0  ;;  %v1034_v51 = vand.u32 2147483648, %v977_v6  ;;  %v1032_v3 = vand.u32 2147483647, %v977_v6  ;;  %vm1028_vm6 = vweird.f32 %v977_v6 }
 0x94e   :  { %v1010_v7 = vsub.f32 1.0, %v1009_v4  ;;  %3478 = vpow2.f32 %v1086_v25  ;;  %v1088_v50 = vmul.f32 1.442695, %v1081_v36 }
 0x94f   :  { %v1035_v24 = vor.u32 1.1754944e-38, %v1034_v51  ;;  %vm1033_vm8 = vcmp.eq.f32.partialorder %v1032_v3, 8.507059e+37 }
 0x950   :  { %v1011_v47 = vmul.f32 %v3475_v37, %v1010_v7  ;;  %3480 = vpow2.f32 %v1088_v50 }
 0x952   :  { %v1012_v12 = vadd.f32 %v3475_v37, %v1011_v47  ;;  %v952_v47 = vmul.f32 0.5, %v4119_v55 }
 0x953   :  { %v3477_v33 = vpop.eup %3476 }
 0x954   :  { %v1016_v48 = vsel %vm1015_vm3, %v3475_v37, %v1012_v12  ;;  %v1024_v14 = vmul.f32 %v3477_v33, %v977_v6  ;;  %vm1029_vm5 = vweird.f32 %v3477_v33  ;;  %v3479_v54 = vpop.eup %3478  ;;  %v965_v6 = vsel %vm961_vm10, 1.0, %v3598_v56 }
 0x955   :  { %v1021_v17 = vsel %vm1018_vm4, %v1020_v29, %v1016_v48  ;;  %vm1030_vm7 = vmor %vm1028_vm6, %vm1029_vm5 }
 0x956   :  { %v1040_v19 = vmul.f32 1.0614054, %v1021_v17  ;;  %v1025_v5 = vsub.f32 1.0, %v1024_v14  ;;  %v3481_v63 = vpop.eup %3480  ;;  %v4144_v14 = vperm.slane %v3560_v28, 1 }
 0x958   :  { %v1044_v43 = vadd.f32 -1.4531521, %v1040_v19  ;;  %v1026_v22 = vmul.f32 %v3477_v33, %v1025_v5 }
 0x95a   :  { %v1048_v8 = vmul.f32 %v1044_v43, %v1021_v17  ;;  %v1027_v23 = vadd.f32 %v3477_v33, %v1026_v22 }
 0x95c   :  { %v1052_v13 = vadd.f32 1.4214138, %v1048_v8  ;;  %v1031_v20 = vsel %vm1030_vm7, %v3477_v33, %v1027_v23 }
 0x95d   :  { %v1036_v26 = vsel %vm1033_vm8, %v1035_v24, %v1031_v20 }
 0x95e   :  { %v1056_v27 = vmul.f32 %v1052_v13, %v1021_v17  ;;  %v1041_v31 = vmul.f32 1.0614054, %v1036_v26 }
 0x960   :  { %v1060_v34 = vadd.f32 -0.28449672, %v1056_v27  ;;  %v1045_v35 = vadd.f32 -1.4531521, %v1041_v31 }
 0x962   :  { %v1064_v40 = vmul.f32 %v1060_v34, %v1021_v17  ;;  %v1049_v41 = vmul.f32 %v1045_v35, %v1036_v26 }
 0x964   :  { %v1068_v60 = vadd.f32 0.2548296, %v1064_v40  ;;  %v1053_v42 = vadd.f32 1.4214138, %v1049_v41 }
 0x966   :  { %v1072_v52 = vmul.f32 %v1068_v60, %v1021_v17  ;;  %v1057_v53 = vmul.f32 %v1053_v42, %v1036_v26 }
 0x968   :  { %v1061_v38 = vadd.f32 -0.28449672, %v1057_v53  ;;  %v1092_v49 = vmul.f32 %v3479_v54, %v1072_v52 }
 0x96a   :  { %v1065_v58 = vmul.f32 %v1061_v38, %v1036_v26  ;;  %v1096_v61 = vsub.f32 1.0, %v1092_v49 }
 0x96c   :  { %v1069_v30 = vadd.f32 0.2548296, %v1065_v58  ;;  %v1100_v37 = vmul.f32 %v1096_v61, %v964_v1 }
 0x96e   :  { %v1073_v62 = vmul.f32 %v1069_v30, %v1036_v26  ;;  %v1104_v9 = vadd.f32 1.0, %v1100_v37 }
 0x970   :  { %v1093_v2 = vmul.f32 %v3481_v63, %v1073_v62  ;;  %v1108_v12 = vmul.f32 %v1104_v9, %v952_v47 }
 0x972   :  { %v1097_v4 = vsub.f32 1.0, %v1093_v2 }
 0x974   :  { %v1101_v7 = vmul.f32 %v1097_v4, %v965_v6 }
 0x976   :  { %v1105_v57 = vadd.f32 1.0, %v1101_v7 }
 0x978   :  { %v1109_v29 = vmul.f32 %v1105_v57, %v953_v11 }
 0x97a   :  { %v1111_v33 = vpack.c.bf16 %v1109_v29, %v1108_v12 }
 0x97c   :  { %1174 = vmatmul.bf16.gmra.mxu2 %v1111_v33 }
 0x9c3   :  { %v1312_v48 = vpop.f32.mrf.mxu3 }
 0x9c4   :  { %v1313_v44 = vadd.f32 %v1312_v48, %v4144_v14 }
 0x9cb   :  { %v1314_v17 = vpop.f32.mrf.mxu3 }
 0x9cc   :  { %v1315_v19 = vadd.f32 %v1314_v17, %v4144_v14 }
 0x9ce   :  { %v4148_v55 = vpack.c.bf16 %v1315_v19, %v1313_v44 }
 0x9d0   :  { %1392 = vrot.lane.b32.xlu2 %v4148_v55, %s3593_s27  ;;  %1394 = vrot.lane.b32.xlu1 %v4148_v55, %s3594_s28 }
 0x9d8   :  { %1324 = vrot.lane.b32.xlu1 %v4148_v55, %s3595_s4 }
 0x9ff   :  { %v1175_v0 = vpop.f32.mrf.mxu2 }
 0xa00   :  { %v1176_v5 = vadd.f32 %v1175_v0, %v4055_v18 }
 0xa02   :  { %v4158_v51 = vadd.f32 %v1176_v5, %v4042_v10 }
 0xa04   :  { %v1190_v43 = vsel %vm296_vm1, %v4158_v51, 0.0 }
 0xa05   :  { %1191 = vadd.xlane.f32.xlu0 %v1190_v43 }
 0xa07   :  { %v1177_v22 = vpop.f32.mrf.mxu2 }
 0xa08   :  { %v1178_v3 = vadd.f32 %v1177_v22, %v4055_v18 }
 0xa0a   :  { %v4164_v16 = vadd.f32 %v1178_v3, %v4048_v15 }
 0xa0c   :  { %v1193_v8 = vsel %vm296_vm1, %v4164_v16, 0.0 }
 0xa0d   :  { %1194 = vadd.xlane.f32.xlu0 %v1193_v8 }
 0xa2a   :  { %v1393_v10 = vpop.permute.xlu2 %1392 }
 0xa42   :  { %v1395_v23 = vpop.permute.xlu1 %1394 }
 0xa43   :  { %v1400_v24 = vsel %vm446_vm15, %v1395_v23, 0 }
 0xa44   :  { %1409 = vmatpush.bf16.xpose.msra.mxu1 %v1400_v24 }
 0xa4a   :  { %v1325_v13 = vpop.permute.xlu1 %1324 }
 0xa4b   :  { %v1330_v20 = vsel %vm446_vm15, %v1325_v13, 0  ;;  %3136 = vmatmul.msk.bf16.vlgmr.msra.gmra.mxu1 %vm446_vm15, %v1393_v10 }
 0xa4c   :  { %1339 = vmatpush.bf16.xpose.msrb.mxu0 %v1330_v20 }
 0xa53   :  { %3134 = vmatmul.msk.bf16.vlgmr.msrb.gmra.mxu0 %vm446_vm15, %v4148_v55 }
 0xa78   :  { %v1192_v15 = vpop.xlane.xlu0 %1191 }
 0xa79   :  { %v1198_v18 = vmul.f32 %v1192_v15, %v3809_v59 }
 0xa7b   :  { %v1202_v25 = vsub.f32 %v4158_v51, %v1198_v18 }
 0xa7d   :  { %v1206_v46 = vmul.f32 %v1202_v25, %v1202_v25 }
 0xa7f   :  { %v1214_v26 = vsel %vm296_vm1, %v1206_v46, 0.0 }
 0xa80   :  { %1215 = vadd.xlane.f32.xlu0 %v1214_v26  ;;  %v1195_v27 = vpop.xlane.xlu0 %1194 }
 0xa81   :  { %v1199_v31 = vmul.f32 %v1195_v27, %v3809_v59 }
 0xa83   :  { %v1203_v34 = vsub.f32 %v4164_v16, %v1199_v31 }
 0xa85   :  { %v1207_v35 = vmul.f32 %v1203_v34, %v1203_v34 }
 0xa87   :  { %v1217_v36 = vsel %vm296_vm1, %v1207_v35, 0.0 }
 0xa88   :  { %1218 = vadd.xlane.f32.xlu2 %v1217_v36 }
 0xac8   :  { %v1411_v40 = vpop.f32.mrf.mxu1 }
 0xac9   :  { %v1416_v41 = vmul.f32 0.25, %v1411_v40 }
 0xacb   :  { %v1418_v60 = vsel %vm446_vm15, %v1416_v41, -inf }
 0xacc   :  { %1419 = vmax.xlane.f32.xlu1 %v1418_v60 }
 0xad0   :  { %v1341_v42 = vpop.f32.mrf.mxu0  ;;  %v1413_v50 = vpop.f32.mrf.mxu1 }
 0xad1   :  { %v1346_v52 = vmul.f32 0.25, %v1341_v42  ;;  %v1417_v53 = vmul.f32 0.25, %v1413_v50 }
 0xad3   :  { %v1421_v54 = vsel %vm446_vm15, %v1417_v53, -inf  ;;  %v1348_v38 = vsel %vm446_vm15, %v1346_v52, -inf }
 0xad4   :  { %1422 = vmax.xlane.f32.xlu0 %v1421_v54  ;;  %1349 = vmax.xlane.f32.xlu2 %v1348_v38 }
 0xad8   :  { %v1343_v49 = vpop.f32.mrf.mxu0 }
 0xad9   :  { %v4182_v58 = vmul.f32 0.25, %v1343_v49 }
 0xadb   :  { %v1351_v30 = vsel %vm446_vm15, %v4182_v58, -inf }
 0xadc   :  { %1352 = vmax.xlane.f32.xlu1 %v1351_v30 }
 0xaf3   :  { %v1216_v61 = vpop.xlane.xlu0 %1215 }
 0xaf4   :  { %v1222_v62 = vmul.f32 %v1216_v61, %v3809_v59 }
 0xaf5   :  { %1371 = vrot.lane.b32.xlu1 %v4148_v55, %s3596_s23 }
 0xaf6   :  { %v1226_v63 = vadd.f32 1e-05, %v1222_v62 }
 0xaf8   :  { %3482 = vrsqrt.f32 %v1226_v63  ;;  %vm1254_vm12 = vweird.f32 %v1226_v63 }
 0xafb   :  { %v1219_v1 = vpop.xlane.xlu2 %1218 }
 0xafc   :  { %v1223_v2 = vmul.f32 %v1219_v1, %v3809_v59 }
 0xafe   :  { %v3483_v37 = vpop.eup %3482  ;;  %v1227_v4 = vadd.f32 1e-05, %v1223_v2  ;;  %v3315_v2 = vld [vmem:[%s4785_s8 + $0x18] sm:$0xff] }
 0xaff   :  { %v1249_v6 = vmul.f32 %v3483_v37, %v1226_v63  ;;  %vm1255_vm11 = vweird.f32 %v3483_v37 }
 0xb00   :  { %3484 = vrsqrt.f32 %v1227_v4  ;;  %vm1256_vm13 = vmor %vm1254_vm12, %vm1255_vm11  ;;  %vm1264_vm0 = vweird.f32 %v1227_v4 }
 0xb01   :  { %v1250_v7 = vmul.f32 %v3483_v37, %v1249_v6 }
 0xb03   :  { %v1251_v9 = vmul.f32 0.5, %v1250_v7 }
 0xb05   :  { %v1252_v47 = vsub.f32 1.5, %v1251_v9 }
 0xb06   :  { %v3485_v11 = vpop.eup %3484 }
 0xb07   :  { %v1253_v57 = vmul.f32 %v3483_v37, %v1252_v47  ;;  %v1259_v12 = vmul.f32 %v3485_v11, %v1227_v4  ;;  %vm1265_vm14 = vweird.f32 %v3485_v11 }
 0xb08   :  { %vm1266_vm2 = vmor %vm1264_vm0, %vm1265_vm14 }
 0xb09   :  { %v1260_v29 = vmul.f32 %v3485_v11, %v1259_v12  ;;  %v1257_v33 = vsel %vm1256_vm13, %v3483_v37, %v1253_v57 }
 0xb0a   :  { %v1270_v17 = vmul.f32 %v1257_v33, %v1202_v25 }
 0xb0b   :  { %v1261_v48 = vmul.f32 0.5, %v1260_v29 }
 0xb0c   :  { %v1275_v5 = vmul.f32 %v4107_v39, %v1270_v17  ;;  %v3314_v17 = vld [vmem:[%s4785_s8 + $0x10] sm:$0xff] }
 0xb0d   :  { %v1262_v28 = vsub.f32 1.5, %v1261_v48  ;;  %1501 = vmatpush.bf16.msrb.mxu1 %v3314_v17 }
 0xb0e   :  { %v1280_v22 = vadd.f32 %v4113_v45, %v1275_v5 }
 0xb0f   :  { %v1263_v44 = vmul.f32 %v3485_v11, %v1262_v28 }
 0xb11   :  { %v1267_v19 = vsel %vm1266_vm2, %v3485_v11, %v1263_v44 }
 0xb12   :  { %v1271_v0 = vmul.f32 %v1267_v19, %v1203_v34 }
 0xb14   :  { %v1276_v43 = vmul.f32 %v4107_v39, %v1271_v0 }
 0xb16   :  { %v1281_v3 = vadd.f32 %v4113_v45, %v1276_v43 }
 0xb18   :  { %v1283_v8 = vpack.c.bf16 %v1281_v3, %v1280_v22 }
 0xb1a   :  { %3133 = vmatmul.msk.bf16.gmra.mxu3 %vm296_vm1, %v1283_v8 }
 0xb3f   :  { %v1420_v23 = vpop.xlane.xlu1 %1419 }
 0xb40   :  { %v1424_v24 = vsub.f32 %v1416_v41, %v1420_v23 }
 0xb42   :  { %v1426_v10 = vmul.f32 1.442695, %v1424_v24 }
 0xb44   :  { %3486 = vpow2.f32 %v1426_v10 }
 0xb47   :  { %v1350_v13 = vpop.xlane.xlu2 %1349  ;;  %v1423_v20 = vpop.xlane.xlu0 %1422 }
 0xb48   :  { %v1354_v15 = vsub.f32 %v1346_v52, %v1350_v13  ;;  %v1425_v18 = vsub.f32 %v1417_v53, %v1423_v20 }
 0xb4a   :  { %v3487_v25 = vpop.eup %3486  ;;  %v1356_v46 = vmul.f32 1.442695, %v1354_v15  ;;  %v1428_v26 = vmul.f32 1.442695, %v1425_v18 }
 0xb4b   :  { %v1430_v39 = vsel %vm446_vm15, %v3487_v25, 0.0 }
 0xb4c   :  { %3488 = vpow2.f32 %v1356_v46  ;;  %1431 = vadd.xlane.f32.xlu0 %v1430_v39 }
 0xb4d   :  { %3490 = vpow2.f32 %v1428_v26 }
 0xb4f   :  { %v1353_v35 = vpop.xlane.xlu1 %1352 }
 0xb50   :  { %v1355_v40 = vsub.f32 %v4182_v58, %v1353_v35 }
 0xb52   :  { %v3489_v45 = vpop.eup %3488  ;;  %v1358_v41 = vmul.f32 1.442695, %v1355_v40 }
 0xb53   :  { %v3491_v27 = vpop.eup %3490  ;;  %v1360_v31 = vsel %vm446_vm15, %v3489_v45, 0.0 }
 0xb54   :  { %1361 = vadd.xlane.f32.xlu2 %v1360_v31  ;;  %v1433_v34 = vsel %vm446_vm15, %v3491_v27, 0.0  ;;  %3492 = vpow2.f32 %v1358_v41 }
 0xb55   :  { %1434 = vadd.xlane.f32.xlu0 %v1433_v34 }
 0xb5a   :  { %v3493_v60 = vpop.eup %3492 }
 0xb5b   :  { %v1363_v42 = vsel %vm446_vm15, %v3493_v60, 0.0 }
 0xb67   :  { %v1372_v36 = vpop.permute.xlu1 %1371 }
 0xb68   :  { %1384 = vmatpush.bf16.msra.mxu0 %v1372_v36 }
 0xb69   :  { %1441 = vrot.lane.b32.xlu0 %v4148_v55, %s3597_s29 }
 0xb6c   :  { %1478 = vmatpush.bf16.msrb.mxu0 %v3315_v2 }
 0xb93   :  { %1364 = vadd.xlane.f32.xlu0 %v1363_v42 }
 0xb9d   :  { %v1317_v50 = vpop.f32.mrf.mxu3 }
 0xb9e   :  { %v1318_v53 = vadd.f32 %v1317_v50, %v4144_v14 }
 0xba5   :  { %v1319_v52 = vpop.f32.mrf.mxu3 }
 0xba6   :  { %v1320_v54 = vadd.f32 %v1319_v52, %v4144_v14 }
 0xba8   :  { %v4204_v38 = vpack.c.bf16 %v1320_v54, %v1318_v53 }
 0xbaa   :  { %1580 = vrot.lane.b32.xlu1 %v4204_v38, %s3594_s28  ;;  %1510 = vrot.lane.b32.xlu2 %v4204_v38, %s3595_s4 }
 0xbb2   :  { %1578 = vrot.lane.b32.xlu2 %v4204_v38, %s3593_s27 }
 0xbbf   :  { %v1432_v55 = vpop.xlane.xlu0 %1431 }
 0xbc7   :  { %v1362_v1 = vpop.xlane.xlu2 %1361 }
 0xbc8   :  { %v1435_v49 = vpop.xlane.xlu0 %1434 }
 0xbc9   :  { %3494 = vrcp.f32 %v1435_v49 }
 0xbca   :  { %3496 = vrcp.f32 %v1432_v55 }
 0xbcb   :  { %3498 = vrcp.f32 %v1362_v1 }
 0xbcf   :  { %v3495_v58 = vpop.eup %3494 }
 0xbd0   :  { %v3497_v30 = vpop.eup %3496  ;;  %v1439_v61 = vmul.f32 %v3495_v58, %v3491_v27 }
 0xbd1   :  { %v1438_v62 = vmul.f32 %v3497_v30, %v3487_v25  ;;  %v3499_v7 = vpop.eup %3498 }
 0xbd2   :  { %v1368_v47 = vmul.f32 %v3499_v7, %v3489_v45 }
 0xbd3   :  { %v1440_v63 = vpack.c.bf16 %v1439_v61, %v1438_v62  ;;  %v3561_v62 = vld [vmem:[%s4786_s9] sm:$0x3]  ;;  %s2990_s9 = sshll.u32 %s4797_s20, 4  ;;  %s2991_s9 = int_to_ptr.hbm [resolvable:$true] %s2990_s9 }
 0xbdb   :  { %v1442_v14 = vpop.permute.xlu0 %1441 }
 0xbdc   :  { %1454 = vmatpush.bf16.msra.mxu3 %v1442_v14  ;;  %v4238_v14 = vperm.slane %v3561_v62, 1 }
 0xbdf   :  { %3137 = vmatmul.msk.bf16.vlgmr.msra.gmra.mxu3 %vm446_vm15, %v1440_v63 }
 0xc04   :  { %v1511_v37 = vpop.permute.xlu2 %1510 }
 0xc05   :  { %v1516_v4 = vsel %vm446_vm15, %v1511_v37, 0 }
 0xc06   :  { %v1365_v6 = vpop.xlane.xlu0 %1364  ;;  %1525 = vmatpush.bf16.xpose.msrb.mxu2 %v1516_v4 }
 0xc07   :  { %3500 = vrcp.f32 %v1365_v6 }
 0xc0c   :  { %v1579_v44 = vpop.permute.xlu2 %1578 }
 0xc0d   :  { %v3501_v9 = vpop.eup %3500  ;;  %3148 = vmatmul.msk.bf16.vlgmr.msrb.gmra.mxu2 %vm446_vm15, %v4204_v38 }
 0xc0e   :  { %1658 = vmatpush.bf16.msra.mxu2 %v3315_v2  ;;  %v1369_v11 = vmul.f32 %v3501_v9, %v3493_v60 }
 0xc10   :  { %v1370_v57 = vpack.c.bf16 %v1369_v11, %v1368_v47 }
 0xc12   :  { %3135 = vmatmul.msk.bf16.vlgmr.msra.gmra.mxu0 %vm446_vm15, %v1370_v57 }
 0xc1c   :  { %v1581_v12 = vpop.permute.xlu1 %1580 }
 0xc1d   :  { %v1586_v29 = vsel %vm446_vm15, %v1581_v12, 0 }
 0xc1e   :  { %1595 = vmatpush.bf16.xpose.msra.mxu0 %v1586_v29 }
 0xc62   :  { %v1456_v33 = vpop.f32.mrf.mxu3 }
 0xc6a   :  { %v1458_v48 = vpop.f32.mrf.mxu3 }
 0xc6b   :  { %v1461_v28 = vpack.c.bf16 %v1458_v48, %v1456_v33 }
 0xc6d   :  { %3142 = vmatmul.msk.bf16.vlgmr.msrb.gmra.mxu0 %vm446_vm15, %v1461_v28 }
 0xc7d   :  { %3150 = vmatmul.msk.bf16.vlgmr.msra.gmra.mxu0 %vm446_vm15, %v1579_v44 }
 0xc8f   :  { %v1386_v19 = vpop.f32.mrf.mxu0 }
 0xc90   :  { %v1527_v0 = vpop.f32.mrf.mxu2 }
 0xc91   :  { %v1532_v5 = vmul.f32 0.25, %v1527_v0 }
 0xc93   :  { %v1534_v43 = vsel %vm446_vm15, %v1532_v5, -inf }
 0xc94   :  { %1535 = vmax.xlane.f32.xlu1 %v1534_v43 }
 0xc97   :  { %v1388_v22 = vpop.f32.mrf.mxu0 }
 0xc98   :  { %v1391_v3 = vpack.c.bf16 %v1388_v22, %v1386_v19  ;;  %v1529_v8 = vpop.f32.mrf.mxu2 }
 0xc99   :  { %v1533_v23 = vmul.f32 0.25, %v1529_v8 }
 0xc9a   :  { %3147 = vmatmul.msk.bf16.vlgmr.msrb.gmra.mxu1 %vm446_vm15, %v1391_v3 }
 0xc9b   :  { %v1537_v24 = vsel %vm446_vm15, %v1533_v23, -inf }
 0xc9c   :  { %1538 = vmax.xlane.f32.xlu2 %v1537_v24 }
 0xcb4   :  { %1557 = vrot.lane.b32.xlu2 %v4204_v38, %s3596_s23 }
 0xcea   :  { %v1480_v10 = vpop.f32.mrf.mxu0 }
 0xcf2   :  { %v1482_v13 = vpop.f32.mrf.mxu0 }
 0xcfa   :  { %v1597_v20 = vpop.f32.mrf.mxu0 }
 0xcfb   :  { %v1602_v15 = vmul.f32 0.25, %v1597_v20 }
 0xcfd   :  { %v1604_v18 = vsel %vm446_vm15, %v1602_v15, -inf }
 0xcfe   :  { %1605 = vmax.xlane.f32.xlu0 %v1604_v18 }
 0xd02   :  { %v1599_v25 = vpop.f32.mrf.mxu0 }
 0xd03   :  { %v1603_v46 = vmul.f32 0.25, %v1599_v25 }
 0xd05   :  { %v1607_v26 = vsel %vm446_vm15, %v1603_v46, -inf }
 0xd06   :  { %1608 = vmax.xlane.f32.xlu0 %v1607_v26 }
 0xd07   :  { %v1536_v27 = vpop.xlane.xlu1 %1535 }
 0xd08   :  { %v1540_v35 = vsub.f32 %v1532_v5, %v1536_v27 }
 0xd0a   :  { %v1542_v40 = vmul.f32 1.442695, %v1540_v35 }
 0xd0f   :  { %v1539_v39 = vpop.xlane.xlu2 %1538 }
 0xd10   :  { %v1541_v50 = vsub.f32 %v1533_v23, %v1539_v39 }
 0xd12   :  { %v1544_v55 = vmul.f32 1.442695, %v1541_v50 }
 0xd17   :  { %v1558_v45 = vpop.permute.xlu2 %1557  ;;  %v1503_v52 = vpop.f32.mrf.mxu1 }
 0xd18   :  { %1570 = vmatpush.bf16.msrb.mxu3 %v1558_v45  ;;  %v1504_v49 = vadd.f32 %v1503_v52, %v1480_v10 }
 0xd1a   :  { %v1682_v61 = vadd.f32 %v1504_v49, %v4059_v21 }
 0xd1c   :  { %1675 = vmatpush.bf16.msra.mxu3 %v3314_v17  ;;  %v4243_v37 = vadd.f32 %v4238_v14, %v1682_v61 }
 0xd1e   :  { %v1691_v9 = vsel %vm296_vm1, %v4243_v37, 0.0 }
 0xd1f   :  { %v1505_v2 = vpop.f32.mrf.mxu1 }
 0xd20   :  { %v1506_v4 = vadd.f32 %v1505_v2, %v1482_v13 }
 0xd22   :  { %v1683_v21 = vadd.f32 %v1506_v4, %v4071_v32 }
 0xd24   :  { %v4250_v47 = vadd.f32 %v4238_v14, %v1683_v21  ;;  %v3318_v21 = vld [vmem:[%s4789_s12 + $0x10] sm:$0xff] }
 0xd26   :  { %v1694_v11 = vsel %vm296_vm1, %v4250_v47, 0.0 }
 0xd71   :  { %v1606_v31 = vpop.xlane.xlu0 %1605 }
 0xd72   :  { %v1610_v34 = vsub.f32 %v1602_v15, %v1606_v31 }
 0xd74   :  { %v1612_v36 = vmul.f32 1.442695, %v1610_v34 }
 0xd76   :  { %3502 = vpow2.f32 %v1612_v36 }
 0xd77   :  { %3504 = vpow2.f32 %v1542_v40 }
 0xd79   :  { %v1609_v41 = vpop.xlane.xlu0 %1608 }
 0xd7a   :  { %v1611_v60 = vsub.f32 %v1603_v46, %v1609_v41 }
 0xd7c   :  { %v3503_v42 = vpop.eup %3502  ;;  %v1614_v53 = vmul.f32 1.442695, %v1611_v60 }
 0xd7d   :  { %v1616_v54 = vsel %vm446_vm15, %v3503_v42, 0.0  ;;  %v3505_v58 = vpop.eup %3504 }
 0xd7e   :  { %3506 = vpow2.f32 %v1614_v53  ;;  %1617 = vadd.xlane.f32.xlu0 %v1616_v54  ;;  %v1546_v63 = vsel %vm446_vm15, %v3505_v58, 0.0 }
 0xd7f   :  { %3508 = vpow2.f32 %v1544_v55 }
 0xd84   :  { %v3507_v30 = vpop.eup %3506 }
 0xd85   :  { %v1619_v1 = vsel %vm446_vm15, %v3507_v30, 0.0  ;;  %v3509_v6 = vpop.eup %3508 }
 0xd86   :  { %1547 = vadd.xlane.f32.xlu0 %v1546_v63  ;;  %1620 = vadd.xlane.f32.xlu1 %v1619_v1  ;;  %v1549_v7 = vsel %vm446_vm15, %v3509_v6, 0.0  ;;  %v3319_v63 = vld [vmem:[%s4789_s12 + $0x18] sm:$0xff] }
 0xd87   :  { %1816 = vmatpush.bf16.msrb.mxu0 %v3319_v63 }
 0xd8b   :  { %1817 = vmatpush.bf16.msrb.mxu0 %v3318_v21 }
 0xd8e   :  { %1550 = vadd.xlane.f32.xlu0 %v1549_v7  ;;  %1692 = vadd.xlane.f32.xlu1 %v1691_v9 }
 0xd96   :  { %1695 = vadd.xlane.f32.xlu1 %v1694_v11 }
 0xda2   :  { %1627 = vrot.lane.b32.xlu0 %v4204_v38, %s3597_s29  ;;  %s3609_s29 = smov 128  }
 0xdf1   :  { %v1618_v57 = vpop.xlane.xlu0 %1617 }
 0xdf9   :  { %v1621_v12 = vpop.xlane.xlu1 %1620  ;;  %v1548_v32 = vpop.xlane.xlu0 %1547 }
 0xdfa   :  { %3510 = vrcp.f32 %v1548_v32 }
 0xe00   :  { %v3511_v17 = vpop.eup %3510 }
 0xe01   :  { %v1551_v29 = vpop.xlane.xlu0 %1550  ;;  %v1693_v33 = vpop.xlane.xlu1 %1692  ;;  %v1554_v38 = vmul.f32 %v3511_v17, %v3505_v58 }
 0xe02   :  { %3512 = vrcp.f32 %v1551_v29  ;;  %v1703_v48 = vmul.f32 %v1693_v33, %v3809_v59 }
 0xe03   :  { %3514 = vrcp.f32 %v1621_v12 }
 0xe04   :  { %v4258_v28 = vsub.f32 %v4243_v37, %v1703_v48  ;;  %3516 = vrcp.f32 %v1618_v57 }
 0xe06   :  { %v1711_v44 = vmul.f32 %v4258_v28, %v4258_v28 }
 0xe08   :  { %v3513_v19 = vpop.eup %3512  ;;  %v1715_v0 = vsel %vm296_vm1, %v1711_v44, 0.0 }
 0xe09   :  { %v1555_v5 = vmul.f32 %v3513_v19, %v3509_v6  ;;  %1716 = vadd.xlane.f32.xlu2 %v1715_v0  ;;  %v3515_v22 = vpop.eup %3514  ;;  %v1696_v34 = vpop.xlane.xlu1 %1695 }
 0xe0a   :  { %v3517_v3 = vpop.eup %3516  ;;  %v1625_v8 = vmul.f32 %v3515_v22, %v3507_v30  ;;  %v1704_v60 = vmul.f32 %v1696_v34, %v3809_v59  ;;  %v3562_v22 = vld [vmem:[%s4787_s10] sm:$0x3] }
 0xe0b   :  { %v1556_v43 = vpack.c.bf16 %v1555_v5, %v1554_v38  ;;  %v1624_v23 = vmul.f32 %v3517_v3, %v3503_v42  ;;  %v1779_v3 = vperm.slane %v3562_v22, 1 }
 0xe0d   :  { %3149 = vmatmul.msk.bf16.vlgmr.msrb.gmra.mxu3 %vm446_vm15, %v1556_v43  ;;  %v1626_v10 = vpack.c.bf16 %v1625_v8, %v1624_v23 }
 0xe14   :  { %v1628_v24 = vpop.permute.xlu0 %1627 }
 0xe15   :  { %1640 = vmatpush.bf16.msra.mxu1 %v1628_v24 }
 0xe18   :  { %3151 = vmatmul.msk.bf16.vlgmr.msra.gmra.mxu1 %vm446_vm15, %v1626_v10  ;;  %v3563_v10 = vld [vmem:[%s4788_s11] sm:$0x3] }
 0xe7c   :  { %v1717_v55 = vpop.xlane.xlu2 %1716 }
 0xe7d   :  { %v1727_v49 = vmul.f32 %v1717_v55, %v3809_v59 }
 0xe7f   :  { %v1731_v58 = vadd.f32 1e-05, %v1727_v49 }
 0xe81   :  { %3518 = vrsqrt.f32 %v1731_v58  ;;  %vm1741_vm3 = vweird.f32 %v1731_v58 }
 0xe87   :  { %v3519_v2 = vpop.eup %3518 }
 0xe88   :  { %v1736_v7 = vmul.f32 %v3519_v2, %v1731_v58 }
 0xe8a   :  { %v1737_v57 = vmul.f32 %v3519_v2, %v1736_v7  ;;  %v3564_v7 = vld [vmem:[%s4790_s13] sm:$0x3] }
 0xe8c   :  { %v1738_v33 = vmul.f32 0.5, %v1737_v57 }
 0xe8e   :  { %v1739_v48 = vsub.f32 1.5, %v1738_v33 }
 0xe90   :  { %v1572_v13 = vpop.f32.mrf.mxu3  ;;  %v1740_v44 = vmul.f32 %v3519_v2, %v1739_v48 }
 0xe95   :  { %v1642_v20 = vpop.f32.mrf.mxu1 }
 0xe98   :  { %v1574_v15 = vpop.f32.mrf.mxu3 }
 0xe99   :  { %v1577_v18 = vpack.c.bf16 %v1574_v15, %v1572_v13  ;;  %v1784_v13 = vperm.slane %v3563_v10, 1 }
 0xe9b   :  { %3153 = vmatmul.msk.bf16.vlgmr.msra.gmra.mxu3 %vm446_vm15, %v1577_v18 }
 0xe9d   :  { %v1644_v25 = vpop.f32.mrf.mxu1 }
 0xe9e   :  { %v1647_v46 = vpack.c.bf16 %v1644_v25, %v1642_v20 }
 0xea0   :  { %3152 = vmatmul.msk.bf16.vlgmr.msra.gmra.mxu2 %vm446_vm15, %v1647_v46  ;;  %vm1742_vm15 = vweird.f32 %v3519_v2 }
 0xea1   :  { %vm1743_vm4 = vmor %vm1741_vm3, %vm1742_vm15 }
 0xea2   :  { %v1744_v38 = vsel %vm1743_vm4, %v3519_v2, %v1740_v44  ;;  %v3333_v44 = vld [vmem:[%s4791_s14 + $0x68] sm:$0xff] }
 0xea3   :  { %v1775_v8 = vmul.f32 %v1744_v38, %v4258_v28  ;;  %v3332_v38 = vld [vmem:[%s4791_s14 + $0x60] sm:$0xff] }
 0xea5   :  { %v1780_v20 = vmul.f32 %v1779_v3, %v1775_v8  ;;  %v3331_v8 = vld [vmem:[%s4791_s14 + $0x58] sm:$0xff] }
 0xea7   :  { %v1785_v25 = vadd.f32 %v1784_v13, %v1780_v20  ;;  %v3330_v20 = vld [vmem:[%s4791_s14 + $0x50] sm:$0xff] }
 0xf1e   :  { %v1677_v26 = vpop.f32.mrf.mxu3 }
 0xf23   :  { %v1660_v39 = vpop.f32.mrf.mxu2 }
 0xf24   :  { %v1678_v45 = vadd.f32 %v1677_v26, %v1660_v39 }
 0xf26   :  { %v1684_v27 = vadd.f32 %v1678_v45, %v4158_v51  ;;  %v1679_v36 = vpop.f32.mrf.mxu3  ;;  %v1708_v51 = vsub.f32 %v4250_v47, %v1704_v60 }
 0xf28   :  { %v4269_v31 = vadd.f32 %v4238_v14, %v1684_v27  ;;  %v1712_v53 = vmul.f32 %v1708_v51, %v1708_v51 }
 0xf2a   :  { %v1697_v35 = vsel %vm296_vm1, %v4269_v31, 0.0  ;;  %v1718_v54 = vsel %vm296_vm1, %v1712_v53, 0.0 }
 0xf2b   :  { %1698 = vadd.xlane.f32.xlu0 %v1697_v35  ;;  %v1662_v40 = vpop.f32.mrf.mxu2 }
 0xf2c   :  { %v1680_v41 = vadd.f32 %v1679_v36, %v1662_v40 }
 0xf2e   :  { %v1685_v42 = vadd.f32 %v1680_v41, %v4164_v16 }
 0xf30   :  { %v4276_v50 = vadd.f32 %v4238_v14, %v1685_v42 }
 0xf32   :  { %v1700_v52 = vsel %vm296_vm1, %v4276_v50, 0.0 }
 0xf33   :  { %1701 = vadd.xlane.f32.xlu1 %v1700_v52 }
 0xf3b   :  { %1719 = vadd.xlane.f32.xlu1 %v1718_v54 }
 0xf9e   :  { %v1699_v30 = vpop.xlane.xlu0 %1698 }
 0xf9f   :  { %v1705_v16 = vmul.f32 %v1699_v30, %v3809_v59 }
 0xfa1   :  { %v4285_v61 = vsub.f32 %v4269_v31, %v1705_v16 }
 0xfa3   :  { %v1713_v62 = vmul.f32 %v4285_v61, %v4285_v61 }
 0xfa5   :  { %v1721_v14 = vsel %vm296_vm1, %v1713_v62, 0.0 }
 0xfa6   :  { %1722 = vadd.xlane.f32.xlu1 %v1721_v14  ;;  %v1702_v1 = vpop.xlane.xlu1 %1701 }
 0xfa7   :  { %v1706_v4 = vmul.f32 %v1702_v1, %v3809_v59 }
 0xfa9   :  { %v4295_v6 = vsub.f32 %v4276_v50, %v1706_v4 }
 0xfab   :  { %v1714_v9 = vmul.f32 %v4295_v6, %v4295_v6 }
 0xfad   :  { %v1724_v11 = vsel %vm296_vm1, %v1714_v9, 0.0  ;;  %v4320_v9 = vperm.slane %v3564_v7, 1 }
 0xfae   :  { %1725 = vadd.xlane.f32.xlu1 %v1724_v11  ;;  %v1720_v12 = vpop.xlane.xlu1 %1719 }
 0xfaf   :  { %v1728_v32 = vmul.f32 %v1720_v12, %v3809_v59 }
 0xfb1   :  { %v1732_v29 = vadd.f32 1e-05, %v1728_v32 }
 0xfb3   :  { %3520 = vrsqrt.f32 %v1732_v29  ;;  %vm1751_vm6 = vweird.f32 %v1732_v29 }
 0xfb9   :  { %v3521_v17 = vpop.eup %3520 }
 0xfba   :  { %v1746_v19 = vmul.f32 %v3521_v17, %v1732_v29  ;;  %vm1752_vm5 = vweird.f32 %v3521_v17  ;;  %v3334_v29 = vld [vmem:[%s4791_s14 + $0x70] sm:$0xff] }
 0xfbb   :  { %vm1753_vm7 = vmor %vm1751_vm6, %vm1752_vm5 }
 0xfbc   :  { %v1747_v0 = vmul.f32 %v3521_v17, %v1746_v19 }
 0xfbe   :  { %v1748_v5 = vmul.f32 0.5, %v1747_v0 }
 0xfc0   :  { %v1749_v43 = vsub.f32 1.5, %v1748_v5 }
 0xfc2   :  { %v1750_v23 = vmul.f32 %v3521_v17, %v1749_v43 }
 0xfc4   :  { %v1754_v24 = vsel %vm1753_vm7, %v3521_v17, %v1750_v23 }
 0xfc5   :  { %v1776_v15 = vmul.f32 %v1754_v24, %v1708_v51 }
 0xfc7   :  { %v1781_v18 = vmul.f32 %v1779_v3, %v1776_v15 }
 0xfc9   :  { %v1786_v46 = vadd.f32 %v1784_v13, %v1781_v18 }
 0xfcb   :  { %v1789_v26 = vpack.c.bf16 %v1786_v46, %v1785_v25 }
 0xfcd   :  { %3162 = vmatmul.msk.bf16.vlgmr.msrb.gmra.mxu0 %vm296_vm1, %v1789_v26 }
0x1019   :  { %v1723_v39 = vpop.xlane.xlu1 %1722 }
0x101a   :  { %v1729_v28 = vmul.f32 %v1723_v39, %v3809_v59 }
0x101c   :  { %v1733_v45 = vadd.f32 1e-05, %v1729_v28  ;;  %v3329_v28 = vld [vmem:[%s4791_s14 + $0x48] sm:$0xff] }
0x101e   :  { %3522 = vrsqrt.f32 %v1733_v45  ;;  %vm1761_vm9 = vweird.f32 %v1733_v45 }
0x1021   :  { %v1726_v27 = vpop.xlane.xlu1 %1725 }
0x1022   :  { %v1730_v34 = vmul.f32 %v1726_v27, %v3809_v59 }
0x1024   :  { %v3523_v35 = vpop.eup %3522  ;;  %v1734_v36 = vadd.f32 1e-05, %v1730_v34 }
0x1025   :  { %v1756_v40 = vmul.f32 %v3523_v35, %v1733_v45  ;;  %vm1762_vm8 = vweird.f32 %v3523_v35 }
0x1026   :  { %3524 = vrsqrt.f32 %v1734_v36  ;;  %vm1763_vm10 = vmor %vm1761_vm9, %vm1762_vm8  ;;  %vm1771_vm12 = vweird.f32 %v1734_v36 }
0x1027   :  { %v1757_v41 = vmul.f32 %v3523_v35, %v1756_v40 }
0x1029   :  { %v1758_v60 = vmul.f32 0.5, %v1757_v41 }
0x102b   :  { %v1759_v42 = vsub.f32 1.5, %v1758_v60  ;;  %v3328_v60 = vld [vmem:[%s4791_s14 + $0x40] sm:$0xff] }
0x102c   :  { %v3525_v51 = vpop.eup %3524 }
0x102d   :  { %v1760_v52 = vmul.f32 %v3523_v35, %v1759_v42  ;;  %v1766_v53 = vmul.f32 %v3525_v51, %v1734_v36  ;;  %vm1772_vm11 = vweird.f32 %v3525_v51 }
0x102e   :  { %vm1773_vm13 = vmor %vm1771_vm12, %vm1772_vm11 }
0x102f   :  { %v1767_v54 = vmul.f32 %v3525_v51, %v1766_v53  ;;  %v1764_v55 = vsel %vm1763_vm10, %v3523_v35, %v1760_v52 }
0x1030   :  { %v1777_v30 = vmul.f32 %v1764_v55, %v4285_v61 }
0x1031   :  { %v1768_v49 = vmul.f32 0.5, %v1767_v54 }
0x1032   :  { %v1782_v63 = vmul.f32 %v1779_v3, %v1777_v30 }
0x1033   :  { %v1769_v58 = vsub.f32 1.5, %v1768_v49 }
0x1034   :  { %v1787_v2 = vadd.f32 %v1784_v13, %v1782_v63 }
0x1035   :  { %v1770_v16 = vmul.f32 %v3525_v51, %v1769_v58 }
0x1037   :  { %v1774_v62 = vsel %vm1773_vm13, %v3525_v51, %v1770_v16 }
0x1038   :  { %v1778_v14 = vmul.f32 %v1774_v62, %v4295_v6  ;;  %v3335_v6 = vld [vmem:[%s4791_s14 + $0x78] sm:$0xff]  ;;  %s3610_s14 = smov 8  }
0x1039   :  { %2040 = vmatpush.bf16.msrb.mxu1 %v3335_v6 }
0x103a   :  { %v1783_v1 = vmul.f32 %v1779_v3, %v1778_v14 }
0x103c   :  { %v1788_v4 = vadd.f32 %v1784_v13, %v1783_v1 }
0x103d   :  { %2041 = vmatpush.bf16.msrb.mxu1 %v3334_v29 }
0x103e   :  { %v1790_v21 = vpack.c.bf16 %v1788_v4, %v1787_v2 }
0x1040   :  { %3163 = vmatmul.msk.bf16.gmra.mxu0 %vm296_vm1, %v1790_v21 }
0x1041   :  { %2042 = vmatpush.bf16.msrb.mxu1 %v3333_v44 }
0x1045   :  { %2043 = vmatpush.bf16.msrb.mxu1 %v3332_v38 }
0x1049   :  { %2044 = vmatpush.bf16.msrb.mxu1 %v3331_v8 }
0x104a   :  { %v1819_v61 = vpop.f32.mrf.mxu0 }
0x104b   :  { %v4323_v11 = vadd.f32 %v1819_v61, %v4320_v9 }
0x104d   :  { %v4326_v57 = vmul.f32 0.70710677, %v4323_v11  ;;  %2045 = vmatpush.bf16.msrb.mxu1 %v3330_v20 }
0x104f   :  { %v1845_v12 = vand.u32 2147483647, %v4326_v57  ;;  %vm1837_vm7 = vcmp.ge.f32.partialorder %v4326_v57, 0.0 }
0x1051   :  { %v1849_v32 = vmul.f32 0.3275911, %v1845_v12  ;;  %v1953_v27 = vsub.f32 0.0, %v1845_v12  ;;  %2046 = vmatpush.bf16.msrb.mxu1 %v3329_v28 }
0x1052   :  { %v1821_v33 = vpop.f32.mrf.mxu0 }
0x1053   :  { %v1853_v48 = vadd.f32 1.0, %v1849_v32  ;;  %v4336_v17 = vadd.f32 %v1821_v33, %v4320_v9  ;;  %v1957_v51 = vmul.f32 %v1953_v27, %v1845_v12 }
0x1055   :  { %3526 = vrcp.f32 %v1853_v48  ;;  %v4342_v19 = vmul.f32 0.70710677, %v4336_v17  ;;  %v1868_v24 = vand.u32 2147483648, %v1853_v48  ;;  %v1866_v13 = vand.u32 2147483647, %v1853_v48  ;;  %2047 = vmatpush.bf16.msrb.mxu1 %v3328_v60 }
0x1056   :  { %vm1862_vm0 = vweird.f32 %v1853_v48  ;;  %v1961_v58 = vmul.f32 1.442695, %v1957_v51  ;;  %v1830_v20 = vmul.f32 0.5, %v4336_v17 }
0x1057   :  { %v1846_v0 = vand.u32 2147483647, %v4342_v19  ;;  %v1869_v18 = vor.u32 1.1754944e-38, %v1868_v24  ;;  %vm1867_vm15 = vcmp.eq.f32.partialorder %v1866_v13, 8.507059e+37  ;;  %vm1838_vm8 = vcmp.ge.f32.partialorder %v4342_v19, 0.0 }
0x1058   :  { %v1829_v13 = vmul.f32 0.5, %v4323_v11 }
0x1059   :  { %v1850_v5 = vmul.f32 0.3275911, %v1846_v0  ;;  %v1954_v16 = vsub.f32 0.0, %v1846_v0 }
0x105b   :  { %v3527_v43 = vpop.eup %3526  ;;  %v1854_v3 = vadd.f32 1.0, %v1850_v5  ;;  %v1958_v2 = vmul.f32 %v1954_v16, %v1846_v0 }
0x105c   :  { %v1858_v22 = vmul.f32 %v3527_v43, %v1853_v48  ;;  %vm1863_vm14 = vweird.f32 %v3527_v43 }
0x105d   :  { %3528 = vrcp.f32 %v1854_v3  ;;  %vm1864_vm2 = vmor %vm1862_vm0, %vm1863_vm14  ;;  %v1883_v36 = vand.u32 2147483648, %v1854_v3  ;;  %v1881_v41 = vand.u32 2147483647, %v1854_v3  ;;  %vm1877_vm4 = vweird.f32 %v1854_v3 }
0x105e   :  { %v1859_v23 = vsub.f32 1.0, %v1858_v22  ;;  %3530 = vpow2.f32 %v1961_v58  ;;  %v1963_v6 = vmul.f32 1.442695, %v1958_v2  ;;  %v1841_v22 = vsel %vm1837_vm7, 1.0, %v3598_v56 }
0x105f   :  { %v1884_v54 = vor.u32 1.1754944e-38, %v1883_v36  ;;  %vm1882_vm6 = vcmp.eq.f32.partialorder %v1881_v41, 8.507059e+37 }
0x1060   :  { %v1860_v10 = vmul.f32 %v3527_v43, %v1859_v23  ;;  %3532 = vpow2.f32 %v1963_v6  ;;  %v1842_v23 = vsel %vm1838_vm8, 1.0, %v3598_v56 }
0x1062   :  { %v1861_v15 = vadd.f32 %v3527_v43, %v1860_v10 }
0x1063   :  { %v3529_v25 = vpop.eup %3528 }
0x1064   :  { %v1865_v46 = vsel %vm1864_vm2, %v3527_v43, %v1861_v15  ;;  %v1873_v39 = vmul.f32 %v3529_v25, %v1854_v3  ;;  %vm1878_vm3 = vweird.f32 %v3529_v25  ;;  %v3531_v32 = vpop.eup %3530 }
0x1065   :  { %v1870_v26 = vsel %vm1867_vm15, %v1869_v18, %v1865_v46  ;;  %vm1879_vm5 = vmor %vm1877_vm4, %vm1878_vm3 }
0x1066   :  { %v1917_v45 = vmul.f32 1.0614054, %v1870_v26  ;;  %v1874_v34 = vsub.f32 1.0, %v1873_v39  ;;  %v3533_v43 = vpop.eup %3532 }
0x1068   :  { %v1921_v35 = vadd.f32 -1.4531521, %v1917_v45  ;;  %v1875_v40 = vmul.f32 %v3529_v25, %v1874_v34 }
0x106a   :  { %v1925_v42 = vmul.f32 %v1921_v35, %v1870_v26  ;;  %v1876_v52 = vadd.f32 %v3529_v25, %v1875_v40 }
0x106c   :  { %v1929_v53 = vadd.f32 1.4214138, %v1925_v42  ;;  %v1880_v55 = vsel %vm1879_vm5, %v3529_v25, %v1876_v52 }
0x106d   :  { %v1885_v30 = vsel %vm1882_vm6, %v1884_v54, %v1880_v55 }
0x106e   :  { %v1933_v49 = vmul.f32 %v1929_v53, %v1870_v26  ;;  %v1918_v62 = vmul.f32 1.0614054, %v1885_v30 }
0x1070   :  { %v1937_v14 = vadd.f32 -0.28449672, %v1933_v49  ;;  %v1922_v63 = vadd.f32 -1.4531521, %v1918_v62 }
0x1072   :  { %v1941_v1 = vmul.f32 %v1937_v14, %v1870_v26  ;;  %v1926_v4 = vmul.f32 %v1922_v63, %v1885_v30 }
0x1074   :  { %v1945_v21 = vadd.f32 0.2548296, %v1941_v1  ;;  %v1930_v7 = vadd.f32 1.4214138, %v1926_v4 }
0x1076   :  { %v1949_v61 = vmul.f32 %v1945_v21, %v1870_v26  ;;  %v1934_v12 = vmul.f32 %v1930_v7, %v1885_v30 }
0x1078   :  { %v1969_v29 = vmul.f32 %v3531_v32, %v1949_v61  ;;  %v1938_v33 = vadd.f32 -0.28449672, %v1934_v12 }
0x107a   :  { %v1942_v48 = vmul.f32 %v1938_v33, %v1885_v30  ;;  %v1973_v44 = vsub.f32 1.0, %v1969_v29 }
0x107c   :  { %v1946_v38 = vadd.f32 0.2548296, %v1942_v48  ;;  %v1977_v0 = vmul.f32 %v1973_v44, %v1841_v22 }
0x107e   :  { %v1950_v5 = vmul.f32 %v1946_v38, %v1885_v30  ;;  %v1981_v24 = vadd.f32 1.0, %v1977_v0 }
0x1080   :  { %v1970_v3 = vmul.f32 %v3533_v43, %v1950_v5  ;;  %v1985_v15 = vmul.f32 %v1981_v24, %v1829_v13 }
0x1082   :  { %v1974_v8 = vsub.f32 1.0, %v1970_v3 }
0x1084   :  { %v1978_v10 = vmul.f32 %v1974_v8, %v1842_v23 }
0x1086   :  { %v1982_v57 = vadd.f32 1.0, %v1978_v10 }
0x1088   :  { %v1986_v18 = vmul.f32 %v1982_v57, %v1830_v20 }
0x108a   :  { %v1989_v25 = vpack.c.bf16 %v1986_v18, %v1985_v15 }
0x108c   :  { %2048 = vmatmul.bf16.vlgmr.msrb.gmra.mxu1 %v1989_v25 }
0x10bd   :  { %v1824_v46 = vpop.f32.mrf.mxu0 }
0x10be   :  { %v4367_v26 = vadd.f32 %v1824_v46, %v4320_v9  ;;  %v3337_v46 = vld [vmem:[%s4793_s16 + $0x8] sm:$0xff] }
0x10bf   :  { %2093 = vmatpush.bf16.msrb.mxu2 %v3337_v46 }
0x10c0   :  { %v4370_v19 = vmul.f32 0.70710677, %v4367_v26 }
0x10c2   :  { %v1847_v39 = vand.u32 2147483647, %v4370_v19  ;;  %vm1839_vm15 = vcmp.ge.f32.partialorder %v4370_v19, 0.0 }
0x10c4   :  { %v1851_v28 = vmul.f32 0.3275911, %v1847_v39  ;;  %v1955_v30 = vsub.f32 0.0, %v1847_v39 }
0x10c5   :  { %v1826_v45 = vpop.f32.mrf.mxu0 }
0x10c6   :  { %v1855_v27 = vadd.f32 1.0, %v1851_v28  ;;  %v4374_v11 = vadd.f32 %v1826_v45, %v4320_v9  ;;  %v1959_v4 = vmul.f32 %v1955_v30, %v1847_v39  ;;  %v1843_v45 = vsel %vm1839_vm15, 1.0, %v3598_v56 }
0x10c7   :  { %vm2401_vm15 = vcmask 1042432  }
0x10c8   :  { %3534 = vrcp.f32 %v1855_v27  ;;  %v4377_v17 = vmul.f32 0.70710677, %v4374_v11  ;;  %v1898_v42 = vand.u32 2147483648, %v1855_v27  ;;  %v1896_v52 = vand.u32 2147483647, %v1855_v27 }
0x10c9   :  { %vm1892_vm10 = vweird.f32 %v1855_v27  ;;  %v1965_v32 = vmul.f32 1.442695, %v1959_v4 }
0x10ca   :  { %v1848_v34 = vand.u32 2147483647, %v4377_v17  ;;  %v1899_v9 = vor.u32 1.1754944e-38, %v1898_v42  ;;  %vm1897_vm12 = vcmp.eq.f32.partialorder %v1896_v52, 8.507059e+37  ;;  %vm1840_vm3 = vcmp.ge.f32.partialorder %v4377_v17, 0.0 }
0x10cb   :  { %v1832_v42 = vmul.f32 0.5, %v4374_v11 }
0x10cc   :  { %v1852_v35 = vmul.f32 0.3275911, %v1848_v34  ;;  %v1956_v29 = vsub.f32 0.0, %v1848_v34 }
0x10ce   :  { %v3535_v36 = vpop.eup %3534  ;;  %v1856_v41 = vadd.f32 1.0, %v1852_v35  ;;  %v1960_v43 = vmul.f32 %v1956_v29, %v1848_v34  ;;  %v3336_v35 = vld [vmem:[%s4793_s16] sm:$0xff] }
0x10cf   :  { %v1888_v40 = vmul.f32 %v3535_v36, %v1855_v27  ;;  %vm1893_vm9 = vweird.f32 %v3535_v36  ;;  %2094 = vmatpush.bf16.msrb.mxu2 %v3336_v35 }
0x10d0   :  { %3536 = vrcp.f32 %v1856_v41  ;;  %vm1894_vm11 = vmor %vm1892_vm10, %vm1893_vm9  ;;  %v1913_v14 = vand.u32 2147483648, %v1856_v41  ;;  %v1911_v2 = vand.u32 2147483647, %v1856_v41  ;;  %vm1907_vm14 = vweird.f32 %v1856_v41 }
0x10d1   :  { %v1889_v60 = vsub.f32 1.0, %v1888_v40  ;;  %3538 = vpow2.f32 %v1965_v32  ;;  %v1967_v23 = vmul.f32 1.442695, %v1960_v43 }
0x10d2   :  { %v1914_v61 = vor.u32 1.1754944e-38, %v1913_v14  ;;  %vm1912_vm2 = vcmp.eq.f32.partialorder %v1911_v2, 8.507059e+37 }
0x10d3   :  { %v1890_v51 = vmul.f32 %v3535_v36, %v1889_v60  ;;  %3540 = vpow2.f32 %v1967_v23  ;;  %v1831_v60 = vmul.f32 0.5, %v4367_v26  ;;  %v4431_v23 = vld [vmem:[%s4795_s18 + $0x18] sm:$0xff] }
0x10d5   :  { %v1891_v53 = vadd.f32 %v3535_v36, %v1890_v51 }
0x10d6   :  { %v3537_v54 = vpop.eup %3536 }
0x10d7   :  { %v1895_v55 = vsel %vm1894_vm11, %v3535_v36, %v1891_v53  ;;  %v1903_v49 = vmul.f32 %v3537_v54, %v1856_v41  ;;  %vm1908_vm13 = vweird.f32 %v3537_v54  ;;  %v3539_v13 = vpop.eup %3538  ;;  %v1844_v36 = vsel %vm1840_vm3, 1.0, %v3598_v56 }
0x10d8   :  { %v1900_v58 = vsel %vm1897_vm12, %v1899_v9, %v1895_v55  ;;  %vm1909_vm0 = vmor %vm1907_vm14, %vm1908_vm13  ;;  %vm2251_vm3 = vcmask 1044480  }
0x10d9   :  { %v1919_v16 = vmul.f32 1.0614054, %v1900_v58  ;;  %v1904_v62 = vsub.f32 1.0, %v1903_v49  ;;  %v3541_v28 = vpop.eup %3540 }
0x10db   :  { %v1923_v63 = vadd.f32 -1.4531521, %v1919_v16  ;;  %v1905_v1 = vmul.f32 %v3537_v54, %v1904_v62 }
0x10dd   :  { %v1927_v21 = vmul.f32 %v1923_v63, %v1900_v58  ;;  %v1906_v7 = vadd.f32 %v3537_v54, %v1905_v1 }
0x10df   :  { %v1931_v6 = vadd.f32 1.4214138, %v1927_v21  ;;  %v1910_v12 = vsel %vm1909_vm0, %v3537_v54, %v1906_v7  ;;  %v3565_v54 = vld [vmem:[%s4792_s15] sm:$0x3] }
0x10e0   :  { %v1915_v33 = vsel %vm1912_vm2, %v1914_v61, %v1910_v12  ;;  %v1991_v55 = vperm.slane %v3565_v54, 1  ;;  %v3599_v61 = vmov 1   ;;  %vm2291_vm2 = vcmask 1043456  }
0x10e1   :  { %v1935_v48 = vmul.f32 %v1931_v6, %v1900_v58  ;;  %v1920_v44 = vmul.f32 1.0614054, %v1915_v33  ;;  %3377 = vset.pattern.permute.xlu1 %v3599_v61  ;;  %3375 = vset.pattern.permute.xlu0 %v3599_v61 }
0x10e2   :  { %3376 = vset.pattern.permute.xlu2 %v3599_v61 }
0x10e3   :  { %v1939_v38 = vadd.f32 -0.28449672, %v1935_v48  ;;  %v1924_v5 = vadd.f32 -1.4531521, %v1920_v44 }
0x10e5   :  { %v1943_v22 = vmul.f32 %v1939_v38, %v1900_v58  ;;  %v1928_v0 = vmul.f32 %v1924_v5, %v1915_v33 }
0x10e7   :  { %v1947_v3 = vadd.f32 0.2548296, %v1943_v22  ;;  %v1932_v8 = vadd.f32 1.4214138, %v1928_v0 }
0x10e9   :  { %v1951_v24 = vmul.f32 %v1947_v3, %v1900_v58  ;;  %v1936_v10 = vmul.f32 %v1932_v8, %v1915_v33  ;;  %v4420_v3 = vld [vmem:[%s4795_s18 + $0x8] sm:$0xff]  ;;  %v4426_v8 = vld [vmem:[%s4795_s18 + $0x10] sm:$0xff] }
0x10eb   :  { %v1940_v20 = vadd.f32 -0.28449672, %v1936_v10  ;;  %v1971_v57 = vmul.f32 %v3539_v13, %v1951_v24  ;;  %v4438_v24 = vld [vmem:[%s4795_s18] sm:$0xff]  ;;  %v3600_v10 = vmov 2   ;;  %v3601_v13 = vmov 3  }
0x10ed   :  { %v1944_v15 = vmul.f32 %v1940_v20, %v1915_v33  ;;  %v1975_v25 = vsub.f32 1.0, %v1971_v57  ;;  %v3602_v20 = vmov 0   ;;  %v3603_v57 = vmov 7  }
0x10ef   :  { %v1948_v18 = vadd.f32 0.2548296, %v1944_v15  ;;  %v1979_v34 = vmul.f32 %v1975_v25, %v1843_v45  ;;  %v3604_v25 = vmov 4   ;;  %v3605_v45 = vmov 8  }
0x10f1   :  { %v1952_v39 = vmul.f32 %v1948_v18, %v1915_v33  ;;  %v1983_v41 = vadd.f32 1.0, %v1979_v34 }
0x10f3   :  { %v1972_v27 = vmul.f32 %v3541_v28, %v1952_v39  ;;  %v1987_v52 = vmul.f32 %v1983_v41, %v1831_v60  ;;  %v3607_v41 = vmov 6  }
0x10f5   :  { %v1976_v19 = vsub.f32 1.0, %v1972_v27 }
0x10f7   :  { %v1980_v40 = vmul.f32 %v1976_v19, %v1844_v36 }
0x10f9   :  { %v1984_v51 = vadd.f32 1.0, %v1980_v40  ;;  %v3606_v40 = vmov 5  }
0x10fb   :  { %v1988_v53 = vmul.f32 %v1984_v51, %v1832_v42 }
0x10fd   :  { %v1990_v17 = vpack.c.bf16 %v1988_v53, %v1987_v52 }
0x10ff   :  { %2053 = vmatmul.bf16.gmra.mxu1 %v1990_v17 }
0x1109   :  { %v2049_v9 = vpop.f32.mrf.mxu1 }
0x110a   :  { %v2050_v49 = vadd.f32 %v2049_v9, %v1991_v55 }
0x110c   :  { %v2059_v30 = vadd.f32 %v2050_v49, %v4243_v37 }
0x1111   :  { %v2051_v56 = vpop.f32.mrf.mxu1 }
0x1112   :  { %v2052_v58 = vadd.f32 %v2051_v56, %v1991_v55 }
0x1114   :  { %v2060_v26 = vadd.f32 %v2052_v58, %v4250_v47 }
0x1116   :  { %v2067_v16 = vpack.c.bf16 %v2060_v26, %v2059_v30  ;;  %v3347_v26 = vld [vmem:[%s4796_s19 + $0x48] sm:$0xff] }
0x1117   :  { %2599 = vmatpush.bf16.msra.mxu1 %v3347_v26 }
0x1118   :  { %3204 = vmatmul.msk.bf16.vlgmr.msrb.gmra.mxu2 %vm296_vm1, %v2067_v16 }
0x117c   :  { %v2054_v11 = vpop.f32.mrf.mxu1 }
0x117d   :  { %v2055_v62 = vadd.f32 %v2054_v11, %v1991_v55 }
0x117f   :  { %v2061_v1 = vadd.f32 %v2055_v62, %v4269_v31 }
0x1184   :  { %v2056_v14 = vpop.f32.mrf.mxu1 }
0x1185   :  { %v2057_v63 = vadd.f32 %v2056_v14, %v1991_v55 }
0x1187   :  { %v2062_v2 = vadd.f32 %v2057_v63, %v4276_v50  ;;  %v3346_v63 = vld [vmem:[%s4796_s19 + $0x40] sm:$0xff] }
0x1188   :  { %2600 = vmatpush.bf16.msra.mxu1 %v3346_v63 }
0x1189   :  { %v2068_v4 = vpack.c.bf16 %v2062_v2, %v2061_v1 }
0x118b   :  { %3205 = vmatmul.msk.bf16.gmra.mxu2 %vm296_vm1, %v2068_v4 }
0x119b   :  { %v2096_v21 = vpop.f32.mrf.mxu2 }
0x119c   :  { %v2107_v7 = vsel %vm296_vm1, %v2096_v21, 0.0 }
0x119d   :  { %2108 = vadd.xlane.f32.xlu1 %v2107_v7 }
0x11a3   :  { %v2098_v37 = vpop.f32.mrf.mxu2 }
0x11a4   :  { %v2110_v47 = vsel %vm296_vm1, %v2098_v37, 0.0 }
0x11a5   :  { %2111 = vadd.xlane.f32.xlu1 %v2110_v47 }
0x120e   :  { %v2101_v6 = vpop.f32.mrf.mxu2 }
0x120f   :  { %v2113_v31 = vsel %vm296_vm1, %v2101_v6, 0.0 }
0x1210   :  { %2114 = vadd.xlane.f32.xlu2 %v2113_v31  ;;  %v2109_v50 = vpop.xlane.xlu1 %2108 }
0x1211   :  { %v2119_v12 = vmul.f32 %v2109_v50, %v3809_v59  ;;  %v3341_v50 = vld [vmem:[%s4796_s19 + $0x18] sm:$0xff] }
0x1212   :  { %2349 = vmatpush.bf16.msrb.mxu3 %v3341_v50 }
0x1213   :  { %v4405_v32 = vsub.f32 %v2096_v21, %v2119_v12  ;;  %v3339_v12 = vld [vmem:[%s4796_s19 + $0x8] sm:$0xff] }
0x1214   :  { %2386 = vmatpush.bf16.msra.mxu0 %v3339_v12 }
0x1215   :  { %v2127_v29 = vmul.f32 %v4405_v32, %v4405_v32 }
0x1216   :  { %v2103_v33 = vpop.f32.mrf.mxu2 }
0x1217   :  { %v2116_v48 = vsel %vm296_vm1, %v2103_v33, 0.0  ;;  %v2131_v44 = vsel %vm296_vm1, %v2127_v29, 0.0  ;;  %v3343_v29 = vld [vmem:[%s4796_s19 + $0x28] sm:$0xff] }
0x1218   :  { %2117 = vadd.xlane.f32.xlu0 %v2116_v48  ;;  %2132 = vadd.xlane.f32.xlu1 %v2131_v44  ;;  %v2112_v38 = vpop.xlane.xlu1 %2111 }
0x1219   :  { %v2120_v5 = vmul.f32 %v2112_v38, %v3809_v59  ;;  %2459 = vmatpush.bf16.msra.mxu2 %v3343_v29 }
0x121b   :  { %v4412_v43 = vsub.f32 %v2098_v37, %v2120_v5  ;;  %v3340_v5 = vld [vmem:[%s4796_s19 + $0x10] sm:$0xff] }
0x121c   :  { %2350 = vmatpush.bf16.msrb.mxu3 %v3340_v5 }
0x121d   :  { %v2128_v22 = vmul.f32 %v4412_v43, %v4412_v43 }
0x121f   :  { %v2134_v0 = vsel %vm296_vm1, %v2128_v22, 0.0  ;;  %v3338_v22 = vld [vmem:[%s4796_s19] sm:$0xff] }
0x1220   :  { %2135 = vadd.xlane.f32.xlu0 %v2134_v0  ;;  %v3342_v0 = vld [vmem:[%s4796_s19 + $0x20] sm:$0xff]  ;;  %2387 = vmatpush.bf16.msra.mxu0 %v3338_v22 }
0x1221   :  { %2460 = vmatpush.bf16.msra.mxu2 %v3342_v0 }
0x1228   :  { %2308 = vperm.xlu2 %3376, %v4420_v3  }
0x1230   :  { %2316 = vperm.xlu2 %3376, %v4431_v23  }
0x1231   :  { %2312 = vperm.xlu1 %3377, %v4426_v8  }
0x1234   :  { %2304 = vperm.xlu0 %3375, %v4438_v24  }
0x1238   :  { %3379 = vset.pattern.permute.xlu2 %v3600_v10 }
0x1239   :  { %3378 = vset.pattern.permute.xlu1 %v3600_v10  ;;  %2418 = vperm.xlu2 %3379, %v4420_v3  }
0x123a   :  { %2414 = vperm.xlu1 %3378, %v4438_v24  }
0x123c   :  { %3381 = vset.pattern.permute.xlu0 %v3601_v13 }
0x123d   :  { %2495 = vperm.xlu0 %3381, %v4420_v3  }
0x1241   :  { %3382 = vset.pattern.permute.xlu2 %v3602_v20 }
0x1242   :  { %3380 = vset.pattern.permute.xlu1 %v3601_v13  ;;  %2265 = vperm.xlu2 %3382, %v4438_v24  }
0x1243   :  { %2491 = vperm.xlu1 %3380, %v4438_v24  }
0x1245   :  { %3386 = vset.pattern.permute.xlu0 %v3600_v10 }
0x1246   :  { %2422 = vperm.xlu0 %3386, %v4426_v8  }
0x124a   :  { %3384 = vset.pattern.permute.xlu2 %v3604_v25 }
0x124b   :  { %3383 = vset.pattern.permute.xlu1 %v3602_v20 }
0x124c   :  { %2270 = vperm.xlu1 %3383, %v4420_v3  }
0x124e   :  { %3391 = vset.pattern.permute.xlu0 %v3602_v20 }
0x124f   :  { %2280 = vperm.xlu0 %3391, %v4431_v23  }
0x1254   :  { %3385 = vset.pattern.permute.xlu1 %v3604_v25 }
0x1257   :  { %3396 = vset.pattern.permute.xlu0 %v3603_v57 }
0x1258   :  { %2757 = vperm.xlu0 %3396, %v4438_v24  }
0x1260   :  { %3401 = vset.pattern.permute.xlu0 %v3605_v45 }
0x1261   :  { %2824 = vperm.xlu0 %3401, %v4420_v3  }
0x1269   :  { %3406 = vset.pattern.permute.xlu0 %v3606_v40 }
0x126a   :  { %2639 = vperm.xlu0 %3406, %v4426_v8  }
0x1272   :  { %3410 = vset.pattern.permute.xlu0 %v3605_v45 }
0x1283   :  { %v2115_v15 = vpop.xlane.xlu2 %2114 }
0x1284   :  { %v2121_v18 = vmul.f32 %v2115_v15, %v3809_v59 }
0x1286   :  { %v4452_v46 = vsub.f32 %v2101_v6, %v2121_v18 }
0x1288   :  { %v2129_v39 = vmul.f32 %v4452_v46, %v4452_v46 }
0x128a   :  { %v2137_v28 = vsel %vm296_vm1, %v2129_v39, 0.0 }
0x128b   :  { %v2118_v27 = vpop.xlane.xlu0 %2117  ;;  %2138 = vadd.xlane.f32.xlu1 %v2137_v28  ;;  %v2133_v60 = vpop.xlane.xlu1 %2132 }
0x128c   :  { %v2122_v34 = vmul.f32 %v2118_v27, %v3809_v59  ;;  %v4487_v51 = vpop.permute.xlu2 %2308  ;;  %v2143_v17 = vmul.f32 %v2133_v60, %v3809_v59 }
0x128e   :  { %v4460_v35 = vsub.f32 %v2103_v33, %v2122_v34  ;;  %v2147_v54 = vadd.f32 1e-06, %v2143_v17 }
0x1290   :  { %v2130_v19 = vmul.f32 %v4460_v35, %v4460_v35  ;;  %3542 = vrsqrt.f32 %v2147_v54  ;;  %vm2157_vm6 = vweird.f32 %v2147_v54 }
0x1292   :  { %v2140_v36 = vsel %vm296_vm1, %v2130_v19, 0.0 }
0x1293   :  { %2141 = vadd.xlane.f32.xlu2 %v2140_v36  ;;  %v2136_v52 = vpop.xlane.xlu0 %2135 }
0x1294   :  { %v2144_v9 = vmul.f32 %v2136_v52, %v3809_v59  ;;  %v4497_v49 = vpop.permute.xlu2 %2316 }
0x1296   :  { %v2148_v55 = vadd.f32 1e-06, %v2144_v9  ;;  %v3543_v58 = vpop.eup %3542 }
0x1297   :  { %v2152_v16 = vmul.f32 %v3543_v58, %v2147_v54  ;;  %vm2158_vm4 = vweird.f32 %v3543_v58 }
0x1298   :  { %3544 = vrsqrt.f32 %v2148_v55  ;;  %vm2159_vm7 = vmor %vm2157_vm6, %vm2158_vm4  ;;  %vm2167_vm8 = vweird.f32 %v2148_v55  ;;  %vm2616_vm4 = vcmask 1046528  }
0x1299   :  { %v2153_v1 = vmul.f32 %v3543_v58, %v2152_v16 }
0x129b   :  { %v2154_v4 = vmul.f32 0.5, %v2153_v1 }
0x129c   :  { %v4509_v62 = vpop.permute.xlu2 %2418 }
0x129d   :  { %v2155_v6 = vsub.f32 1.5, %v2154_v4  ;;  %v3345_v4 = vld [vmem:[%s4796_s19 + $0x38] sm:$0xff] }
0x129e   :  { %v3545_v30 = vpop.eup %3544  ;;  %2536 = vmatpush.bf16.msra.mxu3 %v3345_v4 }
0x129f   :  { %v2162_v11 = vmul.f32 %v3545_v30, %v2148_v55  ;;  %v2156_v33 = vmul.f32 %v3543_v58, %v2155_v6  ;;  %vm2168_vm5 = vweird.f32 %v3545_v30 }
0x12a0   :  { %vm2169_vm9 = vmor %vm2167_vm8, %vm2168_vm5  ;;  %vm2478_vm5 = vcmask 1040384  }
0x12a1   :  { %v2163_v2 = vmul.f32 %v3545_v30, %v2162_v11 }
0x12a3   :  { %v4481_v42 = vpop.permute.xlu1 %2312  ;;  %v2164_v21 = vmul.f32 0.5, %v2163_v2 }
0x12a4   :  { %2558 = vperm.xlu1 %3385, %v4420_v3   ;;  %v4518_v7 = vpop.permute.xlu2 %2265 }
0x12a5   :  { %v2165_v31 = vsub.f32 1.5, %v2164_v21  ;;  %v3349_v21 = vld [vmem:[%s4796_s19 + $0x58] sm:$0xff] }
0x12a6   :  { %v2305_v55 = vpop.permute.xlu0 %2304  ;;  %2676 = vmatpush.bf16.msrb.mxu0 %v3349_v21 }
0x12a7   :  { %v2166_v48 = vmul.f32 %v3545_v30, %v2165_v31 }
0x12ab   :  { %2554 = vperm.xlu2 %3384, %v4438_v24  }
0x12ac   :  { %3388 = vset.pattern.permute.xlu1 %v3601_v13  ;;  %v4490_v53 = vpop.permute.xlu1 %2414 }
0x12ad   :  { %2499 = vperm.xlu1 %3388, %v4426_v8  }
0x12b3   :  { %3387 = vset.pattern.permute.xlu2 %v3600_v10 }
0x12b4   :  { %2426 = vperm.xlu2 %3387, %v4431_v23  }
0x12b5   :  { %3390 = vset.pattern.permute.xlu1 %v3602_v20  ;;  %v4499_v56 = vpop.permute.xlu1 %2491 }
0x12b6   :  { %2275 = vperm.xlu1 %3390, %v4426_v8  }
0x12bc   :  { %3389 = vset.pattern.permute.xlu2 %v3601_v13 }
0x12bd   :  { %2503 = vperm.xlu2 %3389, %v4431_v23  }
0x12be   :  { %3393 = vset.pattern.permute.xlu1 %v3604_v25  ;;  %v4511_v14 = vpop.permute.xlu1 %2270 }
0x12bf   :  { %2566 = vperm.xlu1 %3393, %v4431_v23  }
0x12c5   :  { %3392 = vset.pattern.permute.xlu2 %v3604_v25 }
0x12c6   :  { %2562 = vperm.xlu2 %3392, %v4426_v8  }
0x12c7   :  { %3395 = vset.pattern.permute.xlu1 %v3607_v41 }
0x12c8   :  { %2698 = vperm.xlu1 %3395, %v4420_v3  }
0x12ce   :  { %3394 = vset.pattern.permute.xlu2 %v3607_v41 }
0x12cf   :  { %2694 = vperm.xlu2 %3394, %v4438_v24  }
0x12d0   :  { %3398 = vset.pattern.permute.xlu1 %v3606_v40 }
0x12d1   :  { %2631 = vperm.xlu1 %3398, %v4438_v24  }
0x12d7   :  { %3397 = vset.pattern.permute.xlu2 %v3603_v57 }
0x12d8   :  { %2761 = vperm.xlu2 %3397, %v4420_v3  }
0x12d9   :  { %3400 = vset.pattern.permute.xlu1 %v3605_v45 }
0x12da   :  { %2820 = vperm.xlu1 %3400, %v4438_v24   ;;  %v2170_v24 = vsel %vm2169_vm9, %v3545_v30, %v2166_v48  ;;  %v4603_v48 = vpop.permute.xlu0 %2495 }
0x12e0   :  { %3399 = vset.pattern.permute.xlu2 %v3606_v40 }
0x12e1   :  { %2635 = vperm.xlu2 %3399, %v4420_v3  }
0x12e2   :  { %3403 = vset.pattern.permute.xlu1 %v3607_v41 }
0x12e3   :  { %2706 = vperm.xlu1 %3403, %v4431_v23  }
0x12e9   :  { %3402 = vset.pattern.permute.xlu2 %v3607_v41 }
0x12ea   :  { %2702 = vperm.xlu2 %3402, %v4426_v8  }
0x12eb   :  { %3405 = vset.pattern.permute.xlu1 %v3603_v57 }
0x12ec   :  { %2769 = vperm.xlu1 %3405, %v4431_v23  }
0x12f2   :  { %3404 = vset.pattern.permute.xlu2 %v3603_v57  ;;  %v2192_v57 = vmul.f32 %v2170_v24, %v4412_v43 }
0x12f3   :  { %2765 = vperm.xlu2 %3404, %v4426_v8  }
0x12f4   :  { %3408 = vset.pattern.permute.xlu1 %v3605_v45 }
0x12f5   :  { %2828 = vperm.xlu1 %3408, %v4426_v8   ;;  %v4548_v8 = vld [vmem:[%s4794_s17] sm:$0xf] }
0x12f6   :  { %v4551_v13 = vperm.slane %v4548_v8, 0  ;;  %v4557_v39 = vperm.slane %v4548_v8, 1 }
0x12fb   :  { %3407 = vset.pattern.permute.xlu2 %v3606_v40 }
0x12fc   :  { %2643 = vperm.xlu2 %3407, %v4431_v23  }
0x12fe   :  { %v2139_v37 = vpop.xlane.xlu1 %2138 }
0x12ff   :  { %v2145_v47 = vmul.f32 %v2139_v37, %v3809_v59 }
0x1301   :  { %v4521_v61 = vadd.f32 1e-06, %v2145_v47 }
0x1303   :  { %3546 = vrsqrt.f32 %v4521_v61  ;;  %vm2177_vm14 = vweird.f32 %v4521_v61 }
0x1304   :  { %3409 = vset.pattern.permute.xlu2 %v3605_v45  ;;  %v2197_v45 = vmul.f32 %v4551_v13, %v2192_v57  ;;  %v3344_v57 = vld [vmem:[%s4796_s19 + $0x30] sm:$0xff] }
0x1305   :  { %2832 = vperm.xlu2 %3409, %v4431_v23   ;;  %v2160_v23 = vsel %vm2159_vm7, %v3543_v58, %v2156_v33  ;;  %2537 = vmatpush.bf16.msra.mxu3 %v3344_v57 }
0x1306   :  { %v2142_v44 = vpop.xlane.xlu2 %2141  ;;  %v2191_v20 = vmul.f32 %v2160_v23, %v4405_v32  ;;  %v4565_v32 = vadd.f32 %v4557_v39, %v2197_v45 }
0x1307   :  { %v2146_v38 = vmul.f32 %v2142_v44, %v3809_v59 }
0x1308   :  { %v2196_v28 = vmul.f32 %v4551_v13, %v2191_v20  ;;  %v2403_v37 = vrot.slane %v4565_v32, 5  ;;  %v2293_v50 = vrot.slane %v4565_v32, 4 }
0x1309   :  { %v2150_v3 = vadd.f32 1e-06, %v2146_v38  ;;  %v3547_v10 = vpop.eup %3546  ;;  %v2253_v38 = vrot.slane %v4565_v32, 3 }
0x130a   :  { %v2172_v15 = vmul.f32 %v3547_v10, %v4521_v61  ;;  %v4562_v36 = vadd.f32 %v4557_v39, %v2196_v28  ;;  %vm2178_vm13 = vweird.f32 %v3547_v10 }
0x130b   :  { %3548 = vrsqrt.f32 %v2150_v3  ;;  %vm2187_vm11 = vweird.f32 %v2150_v3  ;;  %vm4589_vm0 = vmor %vm2177_vm14, %vm2178_vm13 }
0x130c   :  { %v2173_v27 = vmul.f32 %v3547_v10, %v2172_v15  ;;  %v2402_v61 = vrot.slane %v4562_v36, 5  ;;  %v2292_v33 = vrot.slane %v4562_v36, 4  ;;  %v2252_v44 = vrot.slane %v4562_v36, 3  ;;  %v3350_v15 = vld [vmem:[%s4796_s19 + $0x60] sm:$0xff] }
0x130d   :  { %v2479_v57 = vrot.slane %v4562_v36, 7 }
0x130e   :  { %v2555_v18 = vpop.permute.xlu2 %2554  ;;  %v2174_v43 = vmul.f32 0.5, %v2173_v27  ;;  %v4610_v5 = vsel %vm2401_vm15, %v2402_v61, %v2403_v37 }
0x130f   :  { %v2569_v52 = vmul.f32 %v2555_v18, %v4562_v36  ;;  %v4637_v18 = vsel %vm2251_vm3, %v2252_v44, %v2253_v38 }
0x1310   :  { %v2175_v58 = vsub.f32 1.5, %v2174_v43  ;;  %v2284_v28 = vmul.f32 %v4511_v14, %v4637_v18 }
0x1311   :  { %v3549_v25 = vpop.eup %3548 }
0x1312   :  { %v2182_v34 = vmul.f32 %v3549_v25, %v2150_v3  ;;  %vm2188_vm10 = vweird.f32 %v3549_v25  ;;  %v2176_v11 = vmul.f32 %v3547_v10, %v2175_v58 }
0x1313   :  { %vm2189_vm12 = vmor %vm2187_vm11, %vm2188_vm10 }
0x1314   :  { %v2183_v19 = vmul.f32 %v3549_v25, %v2182_v34  ;;  %v2180_v31 = vsel %vm4589_vm0, %v3547_v10, %v2176_v11  ;;  %v4620_v10 = vsel %vm2291_vm2, %v2292_v33, %v2293_v50 }
0x1315   :  { %v2193_v22 = vmul.f32 %v2180_v31, %v4452_v46  ;;  %v3348_v46 = vld [vmem:[%s4796_s19 + $0x50] sm:$0xff] }
0x1316   :  { %v2184_v40 = vmul.f32 0.5, %v2183_v19  ;;  %v4567_v41 = vpop.permute.xlu2 %2426  ;;  %v2559_v60 = vpop.permute.xlu1 %2558  ;;  %v2320_v19 = vmul.f32 %v4487_v51, %v4620_v10  ;;  %2677 = vmatpush.bf16.msrb.mxu0 %v3348_v46 }
0x1317   :  { %v2570_v17 = vmul.f32 %v2559_v60, %v4565_v32  ;;  %v2198_v45 = vmul.f32 %v4551_v13, %v2193_v22 }
0x1318   :  { %v2185_v9 = vsub.f32 1.5, %v2184_v40 }
0x1319   :  { %v2573_v54 = vpack.c.bf16 %v2570_v17, %v2569_v52  ;;  %v4652_v14 = vadd.f32 %v4557_v39, %v2198_v45  ;;  %v3354_v52 = vld [vmem:[%s4796_s19 + $0x80] sm:$0xff] }
0x131a   :  { %v2186_v30 = vmul.f32 %v3549_v25, %v2185_v9 }
0x131b   :  { %3254 = vmatmul.msk.bf16.vlgmr.msra.gmra.mxu1 %vm296_vm1, %v2573_v54  ;;  %v2405_v17 = vrot.slane %v4652_v14, 5  ;;  %v2255_v54 = vrot.slane %v4652_v14, 3 }
0x131c   :  { %v2190_v26 = vsel %vm2189_vm12, %v3549_v25, %v2186_v30  ;;  %v2295_v30 = vrot.slane %v4652_v14, 4 }
0x131d   :  { %v2194_v16 = vmul.f32 %v2190_v26, %v4460_v35  ;;  %v3351_v35 = vld [vmem:[%s4796_s19 + $0x68] sm:$0xff]  ;;  %v2256_v4 = vsel %vm2251_vm3, %v2253_v38, %v2255_v54 }
0x131e   :  { %v4573_v63 = vpop.permute.xlu2 %2503  ;;  %2739 = vmatpush.bf16.msrb.mxu2 %v3351_v35  ;;  %v4684_v31 = vsel %vm2291_vm2, %v2293_v50, %v2295_v30 }
0x131f   :  { %v2199_v1 = vmul.f32 %v4551_v13, %v2194_v16  ;;  %v4576_v2 = vpop.permute.xlu1 %2499  ;;  %v2423_v13 = vpop.permute.xlu0 %2422  ;;  %v2406_v16 = vsel %vm2401_vm15, %v2403_v37, %v2405_v17 }
0x1320   :  { %v2431_v37 = vmul.f32 %v2423_v13, %v2406_v16 }
0x1321   :  { %v4594_v6 = vadd.f32 %v4557_v39, %v2199_v1 }
0x1322   :  { %2740 = vmatpush.bf16.msrb.mxu2 %v3350_v15  ;;  %v3352_v15 = vld [vmem:[%s4796_s19 + $0x70] sm:$0xff] }
0x1323   :  { %v2399_v12 = vrot.slane %v4594_v6, 5  ;;  %v2246_v29 = vrot.slane %v4594_v6, 3  ;;  %v2289_v3 = vrot.slane %v4594_v6, 4 }
0x1325   :  { %v4614_v0 = vsel %vm2401_vm15, %v2399_v12, %v2402_v61  ;;  %v4623_v20 = vsel %vm2251_vm3, %v2246_v29, %v2252_v44  ;;  %v4643_v27 = vsel %vm2291_vm2, %v2289_v3, %v2292_v33  ;;  %v4667_v58 = vsel %vm2401_vm15, %v2405_v17, %v2399_v12 }
0x1326   :  { %v2429_v23 = vmul.f32 %v4490_v53, %v4614_v0  ;;  %v2563_v24 = vpop.permute.xlu2 %2562  ;;  %v2430_v53 = vmul.f32 %v4509_v62, %v4610_v5  ;;  %v2283_v34 = vmul.f32 %v4518_v7, %v4623_v20  ;;  %v2319_v62 = vmul.f32 %v2305_v55, %v4643_v27  ;;  %v3355_v7 = vld [vmem:[%s4796_s19 + $0x88] sm:$0xff] }
0x1327   :  { %2865 = vmatpush.bf16.msrb.mxu1 %v3355_v7  ;;  %v2571_v39 = vmul.f32 %v2563_v24, %v4652_v14  ;;  %v4674_v11 = vsel %vm2291_vm2, %v2295_v30, %v2289_v3  ;;  %v2432_v1 = vmul.f32 %v4567_v41, %v4667_v58  ;;  %v2257_v21 = vsel %vm2251_vm3, %v2255_v54, %v2246_v29  ;;  %v2281_v61 = vpop.permute.xlu0 %2280 }
0x1328   :  { %v2276_v25 = vpop.permute.xlu1 %2275  ;;  %v2433_v43 = vpack.c.bf16 %v2430_v53, %v2429_v23  ;;  %v2287_v40 = vpack.c.bf16 %v2284_v28, %v2283_v34  ;;  %v2323_v60 = vpack.c.bf16 %v2320_v19, %v2319_v62  ;;  %v2322_v12 = vmul.f32 %v4497_v49, %v4674_v11  ;;  %v3353_v49 = vld [vmem:[%s4796_s19 + $0x78] sm:$0xff]  ;;  %s3608_s19 = smov [#allocation2]  }
0x1329   :  { %v2285_v47 = vmul.f32 %v2276_v25, %v2256_v4  ;;  %v2286_v33 = vmul.f32 %v2281_v61, %v2257_v21  ;;  %v2434_v44 = vpack.c.bf16 %v2432_v1, %v2431_v37  ;;  %v2321_v41 = vmul.f32 %v4481_v42, %v4684_v31  ;;  %s2988_s4 = sshll.u32 %s3608_s19, 4  ;;  %s2989_s4 = int_to_ptr.vmem [resolvable:$true] %s2988_s4 }
0x132a   :  { %3234 = vmatmul.msk.bf16.vlgmr.msra.gmra.mxu2 %vm296_vm1, %v2433_v43  ;;  %3224 = vmatmul.msk.bf16.vlgmr.msra.gmra.mxu0 %vm296_vm1, %v2287_v40  ;;  %v2476_v3 = vrot.slane %v4594_v6, 7  ;;  %v2618_v42 = vrot.slane %v4565_v32, 1  ;;  %v2480_v24 = vrot.slane %v4565_v32, 7  ;;  %v2620_v53 = vrot.slane %v4652_v14, 1 }
0x132b   :  { %3214 = vmatmul.msk.bf16.vlgmr.msrb.gmra.mxu3 %vm296_vm1, %v2323_v60  ;;  %2866 = vmatpush.bf16.msrb.mxu1 %v3354_v52  ;;  %v2288_v29 = vpack.c.bf16 %v2286_v33, %v2285_v47  ;;  %v2324_v22 = vpack.c.bf16 %v2322_v12, %v2321_v41  ;;  %v2617_v25 = vrot.slane %v4562_v36, 1 }
0x132c   :  { %2802 = vmatpush.bf16.msrb.mxu3 %v3353_v49  ;;  %v2489_v28 = vsel %vm2478_vm5, %v2476_v3, %v2479_v57  ;;  %v2481_v19 = vsel %vm2478_vm5, %v2479_v57, %v2480_v24  ;;  %v2621_v60 = vsel %vm2616_vm4, %v2618_v42, %v2620_v53 }
0x132d   :  { %v2619_v34 = vsel %vm2616_vm4, %v2617_v25, %v2618_v42  ;;  %v2506_v43 = vmul.f32 %v4499_v56, %v2489_v28  ;;  %v2507_v13 = vmul.f32 %v4603_v48, %v2481_v19  ;;  %v2482_v48 = vrot.slane %v4652_v14, 7 }
0x132e   :  { %v2695_v51 = vpop.permute.xlu2 %2694 }
0x132f   :  { %v4697_v23 = vpop.permute.xlu0 %2757  ;;  %v2709_v40 = vmul.f32 %v2695_v51, %v4637_v18  ;;  %v2622_v51 = vrot.slane %v4594_v6, 1  ;;  %v2484_v1 = vsel %vm2478_vm5, %v2482_v48, %v2476_v3 }
0x1330   :  { %2803 = vmatpush.bf16.msrb.mxu3 %v3352_v15  ;;  %v2772_v42 = vmul.f32 %v4697_v23, %v4620_v10 }
0x1331   :  { %v2567_v9 = vpop.permute.xlu1 %2566  ;;  %v2629_v61 = vsel %vm2616_vm4, %v2622_v51, %v2617_v25 }
0x1332   :  { %v2572_v55 = vmul.f32 %v2567_v9, %v4594_v6  ;;  %v2510_v9 = vpack.c.bf16 %v2507_v13, %v2506_v43  ;;  %v2509_v6 = vmul.f32 %v4573_v63, %v2484_v1 }
0x1334   :  { %v2574_v26 = vpack.c.bf16 %v2572_v55, %v2571_v39 }
0x1336   :  { %v4680_v35 = vpop.permute.xlu2 %2761  ;;  %3255 = vmatmul.msk.bf16.gmra.mxu1 %vm296_vm1, %v2574_v26  ;;  %v2623_v26 = vsel %vm2616_vm4, %v2620_v53, %v2622_v51 }
0x1337   :  { %v2825_v36 = vpop.permute.xlu0 %2824  ;;  %v2773_v3 = vmul.f32 %v4680_v35, %v4684_v31 }
0x1338   :  { %v2836_v54 = vmul.f32 %v2825_v36, %v2406_v16 }
0x1339   :  { %v2776_v57 = vpack.c.bf16 %v2773_v3, %v2772_v42 }
0x133a   :  { %v2699_v38 = vpop.permute.xlu1 %2698  ;;  %3235 = vmatmul.msk.bf16.gmra.mxu2 %vm296_vm1, %v2434_v44  ;;  %3225 = vmatmul.msk.bf16.gmra.mxu0 %vm296_vm1, %v2288_v29  ;;  %v2483_v44 = vsel %vm2478_vm5, %v2480_v24, %v2482_v48 }
0x133b   :  { %3215 = vmatmul.msk.bf16.gmra.mxu3 %vm296_vm1, %v2324_v22  ;;  %v2710_v45 = vmul.f32 %v2699_v38, %v2256_v4  ;;  %v2508_v41 = vmul.f32 %v4576_v2, %v2483_v44 }
0x133d   :  { %v2713_v52 = vpack.c.bf16 %v2710_v45, %v2709_v40  ;;  %v2511_v38 = vpack.c.bf16 %v2509_v6, %v2508_v41 }
0x133e   :  { %v2636_v50 = vpop.permute.xlu2 %2635 }
0x133f   :  { %v2647_v7 = vmul.f32 %v2636_v50, %v2621_v60  ;;  %v2640_v30 = vpop.permute.xlu0 %2639 }
0x1340   :  { %v2648_v37 = vmul.f32 %v2640_v30, %v2623_v26 }
0x1343   :  { %v2632_v46 = vpop.permute.xlu1 %2631 }
0x1344   :  { %v2646_v62 = vmul.f32 %v2632_v46, %v2619_v34 }
0x1346   :  { %v2703_v32 = vpop.permute.xlu2 %2702  ;;  %v2650_v17 = vpack.c.bf16 %v2647_v7, %v2646_v62 }
0x1347   :  { %v2711_v4 = vmul.f32 %v2703_v32, %v2257_v21 }
0x134a   :  { %3274 = vmatmul.msk.bf16.vlgmr.msrb.gmra.mxu2 %vm296_vm1, %v2713_v52  ;;  %3264 = vmatmul.msk.bf16.vlgmr.msrb.gmra.mxu0 %vm296_vm1, %v2650_v17 }
0x134b   :  { %3244 = vmatmul.msk.bf16.vlgmr.msra.gmra.mxu3 %vm296_vm1, %v2510_v9 }
0x134c   :  { %v2821_v39 = vpop.permute.xlu1 %2820 }
0x134d   :  { %v2835_v55 = vmul.f32 %v2821_v39, %v4610_v5 }
0x134e   :  { %v2766_v56 = vpop.permute.xlu2 %2765 }
0x134f   :  { %v2839_v18 = vpack.c.bf16 %v2836_v54, %v2835_v55  ;;  %v2774_v21 = vmul.f32 %v2766_v56, %v4674_v11 }
0x1351   :  { %3294 = vmatmul.msk.bf16.vlgmr.msrb.gmra.mxu1 %vm296_vm1, %v2839_v18 }
0x1355   :  { %v2707_v16 = vpop.permute.xlu1 %2706 }
0x1356   :  { %v2712_v47 = vmul.f32 %v2707_v16, %v4623_v20  ;;  %v2644_v5 = vpop.permute.xlu2 %2643 }
0x1357   :  { %v2649_v12 = vmul.f32 %v2644_v5, %v2629_v61 }
0x1358   :  { %v2714_v33 = vpack.c.bf16 %v2712_v47, %v2711_v4 }
0x1359   :  { %v2651_v14 = vpack.c.bf16 %v2649_v12, %v2648_v37 }
0x135a   :  { %3275 = vmatmul.msk.bf16.gmra.mxu2 %vm296_vm1, %v2714_v33 }
0x135b   :  { %3265 = vmatmul.msk.bf16.gmra.mxu0 %vm296_vm1, %v2651_v14  ;;  %3245 = vmatmul.msk.bf16.gmra.mxu3 %vm296_vm1, %v2511_v38 }
0x135e   :  { %v2770_v20 = vpop.permute.xlu1 %2769 }
0x135f   :  { %v2775_v29 = vmul.f32 %v2770_v20, %v4643_v27  ;;  %v2833_v63 = vpop.permute.xlu2 %2832 }
0x1360   :  { %v2838_v2 = vmul.f32 %v2833_v63, %v4614_v0 }
0x1361   :  { %v2777_v22 = vpack.c.bf16 %v2775_v29, %v2774_v21 }
0x1367   :  { %v2829_v50 = vpop.permute.xlu1 %2828 }
0x1368   :  { %v2837_v49 = vmul.f32 %v2829_v50, %v4667_v58 }
0x136a   :  { %v2840_v24 = vpack.c.bf16 %v2838_v2, %v2837_v49 }
0x136b   :  { %3284 = vmatmul.msk.bf16.vlgmr.msrb.gmra.mxu3 %vm296_vm1, %v2776_v57 }
0x136c   :  { %3295 = vmatmul.msk.bf16.gmra.mxu1 %vm296_vm1, %v2840_v24 }
0x137b   :  { %3285 = vmatmul.msk.bf16.gmra.mxu3 %vm296_vm1, %v2777_v22 }
0x1398   :  { %v2602_v53 = vpop.f32.mrf.mxu1 }
0x13a0   :  { %v2604_v10 = vpop.f32.mrf.mxu1 }
0x13a7   :  { %v2389_v46 = vpop.f32.mrf.mxu0 }
0x13ad   :  { %v2462_v15 = vpop.f32.mrf.mxu2 }
0x13ae   :  { %v2352_v27 = vpop.f32.mrf.mxu3 }
0x13af   :  { %v2391_v31 = vpop.f32.mrf.mxu0  ;;  %v2390_v19 = vadd.f32 %v2389_v46, %v2352_v27 }
0x13b1   :  { %v2472_v40 = vadd.f32 %v2462_v15, %v2390_v19 }
0x13b3   :  { %v2607_v32 = vpop.f32.mrf.mxu1 }
0x13b5   :  { %v2464_v58 = vpop.f32.mrf.mxu2 }
0x13b6   :  { %v2354_v11 = vpop.f32.mrf.mxu3 }
0x13b7   :  { %v2394_v25 = vpop.f32.mrf.mxu0  ;;  %v2392_v13 = vadd.f32 %v2391_v31, %v2354_v11 }
0x13b9   :  { %v2473_v39 = vadd.f32 %v2464_v58, %v2392_v13 }
0x13bb   :  { %v2609_v36 = vpop.f32.mrf.mxu1 }
0x13bd   :  { %v2467_v23 = vpop.f32.mrf.mxu2 }
0x13be   :  { %v2357_v35 = vpop.f32.mrf.mxu3 }
0x13bf   :  { %v2396_v34 = vpop.f32.mrf.mxu0  ;;  %v2395_v56 = vadd.f32 %v2394_v25, %v2357_v35 }
0x13c1   :  { %v2474_v1 = vadd.f32 %v2467_v23, %v2395_v56 }
0x13c5   :  { %v2469_v62 = vpop.f32.mrf.mxu2 }
0x13c6   :  { %v2359_v0 = vpop.f32.mrf.mxu3 }
0x13c7   :  { %v2679_v7 = vpop.f32.mrf.mxu0  ;;  %v2397_v37 = vadd.f32 %v2396_v34, %v2359_v0 }
0x13c9   :  { %v2475_v38 = vadd.f32 %v2469_v62, %v2397_v37 }
0x13cd   :  { %v2742_v17 = vpop.f32.mrf.mxu2 }
0x13ce   :  { %v2539_v28 = vpop.f32.mrf.mxu3  ;;  %v2868_v18 = vpop.f32.mrf.mxu1 }
0x13cf   :  { %v2549_v60 = vadd.f32 %v2539_v28, %v2472_v40  ;;  %v2681_v51 = vpop.f32.mrf.mxu0 }
0x13d1   :  { %v2612_v52 = vadd.f32 %v2602_v53, %v2549_v60 }
0x13d3   :  { %v2689_v54 = vadd.f32 %v2679_v7, %v2612_v52 }
0x13d5   :  { %v2752_v48 = vadd.f32 %v2742_v17, %v2689_v54  ;;  %v2744_v4 = vpop.f32.mrf.mxu2 }
0x13d6   :  { %v2541_v45 = vpop.f32.mrf.mxu3  ;;  %v2870_v33 = vpop.f32.mrf.mxu1 }
0x13d7   :  { %v2550_v55 = vadd.f32 %v2541_v45, %v2473_v39 }
0x13d8   :  { %v2684_v14 = vpop.f32.mrf.mxu0 }
0x13d9   :  { %v2613_v30 = vadd.f32 %v2604_v10, %v2550_v55 }
0x13db   :  { %v2690_v47 = vadd.f32 %v2681_v51, %v2613_v30 }
0x13dd   :  { %v2753_v6 = vadd.f32 %v2744_v4, %v2690_v47  ;;  %v2747_v63 = vpop.f32.mrf.mxu2 }
0x13de   :  { %v2544_v43 = vpop.f32.mrf.mxu3 }
0x13df   :  { %v2551_v5 = vadd.f32 %v2544_v43, %v2474_v1 }
0x13e0   :  { %v2686_v57 = vpop.f32.mrf.mxu0 }
0x13e1   :  { %v2614_v44 = vadd.f32 %v2607_v32, %v2551_v5 }
0x13e3   :  { %v2691_v21 = vadd.f32 %v2684_v14, %v2614_v44  ;;  %v2970_v14 = vperm.slane %v4548_v8, 2 }
0x13e5   :  { %v2754_v3 = vadd.f32 %v2747_v63, %v2691_v21  ;;  %v2749_v15 = vpop.f32.mrf.mxu2 }
0x13e6   :  { %v2546_v9 = vpop.f32.mrf.mxu3 }
0x13e7   :  { %v2552_v29 = vadd.f32 %v2546_v9, %v2475_v38 }
0x13e9   :  { %v2615_v2 = vadd.f32 %v2609_v36, %v2552_v29  ;;  %v2873_v49 = vpop.f32.mrf.mxu1 }
0x13eb   :  { %v2692_v27 = vadd.f32 %v2686_v57, %v2615_v2 }
0x13ed   :  { %v2755_v35 = vadd.f32 %v2749_v15, %v2692_v27 }
0x13ee   :  { %v2805_v26 = vpop.f32.mrf.mxu3 }
0x13ef   :  { %v2815_v16 = vadd.f32 %v2805_v26, %v2752_v48 }
0x13f1   :  { %v2878_v61 = vadd.f32 %v2868_v18, %v2815_v16  ;;  %v2875_v53 = vpop.f32.mrf.mxu1 }
0x13f3   :  { %v2882_v12 = vsel %vm296_vm1, %v2878_v61, 0.0 }
0x13f4   :  { %2883 = vadd.xlane.f32.xlu1 %v2882_v12 }
0x13f6   :  { %v2807_v41 = vpop.f32.mrf.mxu3 }
0x13f7   :  { %v2816_v20 = vadd.f32 %v2807_v41, %v2753_v6 }
0x13f9   :  { %v2879_v22 = vadd.f32 %v2870_v33, %v2816_v20  ;;  %v2975_v20 = vperm.slane %v4548_v8, 3 }
0x13fb   :  { %v2885_v50 = vsel %vm296_vm1, %v2879_v22, 0.0 }
0x13fc   :  { %2886 = vadd.xlane.f32.xlu0 %v2885_v50 }
0x13fe   :  { %v2810_v42 = vpop.f32.mrf.mxu3 }
0x13ff   :  { %v2817_v24 = vadd.f32 %v2810_v42, %v2754_v3 }
0x1401   :  { %v2880_v11 = vadd.f32 %v2873_v49, %v2817_v24 }
0x1403   :  { %v2888_v46 = vsel %vm296_vm1, %v2880_v11, 0.0 }
0x1404   :  { %2889 = vadd.xlane.f32.xlu2 %v2888_v46 }
0x1406   :  { %v2812_v31 = vpop.f32.mrf.mxu3 }
0x1407   :  { %v2818_v0 = vadd.f32 %v2812_v31, %v2755_v35 }
0x1409   :  { %v2881_v58 = vadd.f32 %v2875_v53, %v2818_v0 }
0x140b   :  { %v2891_v25 = vsel %vm296_vm1, %v2881_v58, 0.0 }
0x140c   :  { %2892 = vadd.xlane.f32.xlu1 %v2891_v25 }
0x1467   :  { %v2884_v28 = vpop.xlane.xlu1 %2883 }
0x1468   :  { %v2894_v10 = vmul.f32 %v2884_v28, %v3809_v59 }
0x146a   :  { %v2898_v23 = vsub.f32 %v2878_v61, %v2894_v10 }
0x146c   :  { %v2902_v45 = vmul.f32 %v2898_v23, %v2898_v23 }
0x146e   :  { %v2906_v34 = vsel %vm296_vm1, %v2902_v45, 0.0 }
0x146f   :  { %v2887_v32 = vpop.xlane.xlu0 %2886  ;;  %2907 = vadd.xlane.f32.xlu2 %v2906_v34 }
0x1470   :  { %v2895_v19 = vmul.f32 %v2887_v32, %v3809_v59 }
0x1472   :  { %v2899_v62 = vsub.f32 %v2879_v22, %v2895_v19 }
0x1474   :  { %v2903_v43 = vmul.f32 %v2899_v62, %v2899_v62 }
0x1476   :  { %v2909_v40 = vsel %vm296_vm1, %v2903_v43, 0.0 }
0x1477   :  { %2910 = vadd.xlane.f32.xlu0 %v2909_v40  ;;  %v2890_v60 = vpop.xlane.xlu2 %2889 }
0x1478   :  { %v2896_v7 = vmul.f32 %v2890_v60, %v3809_v59 }
0x147a   :  { %v4751_v13 = vsub.f32 %v2880_v11, %v2896_v7 }
0x147c   :  { %v2904_v36 = vmul.f32 %v4751_v13, %v4751_v13 }
0x147e   :  { %v2912_v52 = vsel %vm296_vm1, %v2904_v36, 0.0 }
0x147f   :  { %2913 = vadd.xlane.f32.xlu1 %v2912_v52  ;;  %v2893_v17 = vpop.xlane.xlu1 %2892 }
0x1480   :  { %v2897_v9 = vmul.f32 %v2893_v17, %v3809_v59 }
0x1482   :  { %v4757_v39 = vsub.f32 %v2881_v58, %v2897_v9 }
0x1484   :  { %v2905_v54 = vmul.f32 %v4757_v39, %v4757_v39 }
0x1486   :  { %v2915_v55 = vsel %vm296_vm1, %v2905_v54, 0.0 }
0x1487   :  { %2916 = vadd.xlane.f32.xlu2 %v2915_v55 }
0x14e2   :  { %v2908_v56 = vpop.xlane.xlu2 %2907 }
0x14e3   :  { %v2918_v18 = vmul.f32 %v2908_v56, %v3809_v59 }
0x14e5   :  { %v2922_v51 = vadd.f32 1e-06, %v2918_v18 }
0x14e7   :  { %3550 = vrsqrt.f32 %v2922_v51  ;;  %vm2932_vm7 = vweird.f32 %v2922_v51 }
0x14ea   :  { %v2911_v48 = vpop.xlane.xlu0 %2910 }
0x14eb   :  { %v2919_v30 = vmul.f32 %v2911_v48, %v3809_v59 }
0x14ed   :  { %v3551_v26 = vpop.eup %3550  ;;  %v2923_v1 = vadd.f32 1e-06, %v2919_v30 }
0x14ee   :  { %v2927_v16 = vmul.f32 %v3551_v26, %v2922_v51  ;;  %vm2933_vm6 = vweird.f32 %v3551_v26 }
0x14ef   :  { %3552 = vrsqrt.f32 %v2923_v1  ;;  %vm2934_vm8 = vmor %vm2932_vm7, %vm2933_vm6  ;;  %vm2942_vm10 = vweird.f32 %v2923_v1 }
0x14f0   :  { %v2928_v4 = vmul.f32 %v3551_v26, %v2927_v16 }
0x14f2   :  { %v2929_v47 = vmul.f32 0.5, %v2928_v4  ;;  %v2914_v5 = vpop.xlane.xlu1 %2913 }
0x14f3   :  { %v2920_v61 = vmul.f32 %v2914_v5, %v3809_v59 }
0x14f4   :  { %v2930_v37 = vsub.f32 1.5, %v2929_v47 }
0x14f5   :  { %v3553_v12 = vpop.eup %3552  ;;  %v2924_v6 = vadd.f32 1e-06, %v2920_v61 }
0x14f6   :  { %v2931_v33 = vmul.f32 %v3551_v26, %v2930_v37  ;;  %v2937_v44 = vmul.f32 %v3553_v12, %v2923_v1  ;;  %vm2943_vm9 = vweird.f32 %v3553_v12 }
0x14f7   :  { %3554 = vrsqrt.f32 %v2924_v6  ;;  %vm2944_vm11 = vmor %vm2942_vm10, %vm2943_vm9  ;;  %vm2952_vm13 = vweird.f32 %v2924_v6 }
0x14f8   :  { %v2935_v41 = vsel %vm2934_vm8, %v3551_v26, %v2931_v33  ;;  %v2938_v38 = vmul.f32 %v3553_v12, %v2937_v44 }
0x14f9   :  { %v2966_v21 = vmul.f32 %v2935_v41, %v2898_v23 }
0x14fa   :  { %v2939_v29 = vmul.f32 0.5, %v2938_v38  ;;  %v2917_v22 = vpop.xlane.xlu2 %2916 }
0x14fb   :  { %v2971_v63 = vmul.f32 %v2970_v14, %v2966_v21  ;;  %v2921_v50 = vmul.f32 %v2917_v22, %v3809_v59 }
0x14fc   :  { %v2940_v3 = vsub.f32 1.5, %v2939_v29 }
0x14fd   :  { %v3555_v2 = vpop.eup %3554  ;;  %v2976_v49 = vadd.f32 %v2975_v20, %v2971_v63  ;;  %v2925_v42 = vadd.f32 1e-06, %v2921_v50 }
0x14fe   :  { %v2941_v24 = vmul.f32 %v3553_v12, %v2940_v3  ;;  %v2947_v57 = vmul.f32 %v3555_v2, %v2924_v6  ;;  %vm2953_vm12 = vweird.f32 %v3555_v2 }
0x14ff   :  { %2980 = vst.msk [vmem:[#allocation2] sm:$0xff] %vm296_vm1, %v2976_v49  ;;  %3556 = vrsqrt.f32 %v2925_v42  ;;  %vm2954_vm14 = vmor %vm2952_vm13, %vm2953_vm12  ;;  %vm2962_vm2 = vweird.f32 %v2925_v42 }
0x1500   :  { %v2945_v27 = vsel %vm2944_vm11, %v3553_v12, %v2941_v24  ;;  %v2948_v8 = vmul.f32 %v3555_v2, %v2947_v57 }
0x1501   :  { %v2967_v11 = vmul.f32 %v2945_v27, %v2899_v62 }
0x1502   :  { %v2949_v46 = vmul.f32 0.5, %v2948_v8 }
0x1503   :  { %v2972_v15 = vmul.f32 %v2970_v14, %v2967_v11 }
0x1504   :  { %v2950_v35 = vsub.f32 1.5, %v2949_v46 }
0x1505   :  { %v3557_v59 = vpop.eup %3556  ;;  %v2977_v31 = vadd.f32 %v2975_v20, %v2972_v15 }
0x1506   :  { %v2951_v0 = vmul.f32 %v3555_v2, %v2950_v35  ;;  %v2957_v53 = vmul.f32 %v3557_v59, %v2925_v42  ;;  %vm2963_vm0 = vweird.f32 %v3557_v59 }
0x1507   :  { %2981 = vst.msk [vmem:[#allocation2 + $0x8] sm:$0xff] %vm296_vm1, %v2977_v31  ;;  %vm2964_vm15 = vmor %vm2962_vm2, %vm2963_vm0 }
0x1508   :  { %v2955_v58 = vsel %vm2954_vm14, %v3555_v2, %v2951_v0  ;;  %v2958_v25 = vmul.f32 %v3557_v59, %v2957_v53 }
0x1509   :  { %v2968_v28 = vmul.f32 %v2955_v58, %v4751_v13 }
0x150a   :  { %v2959_v10 = vmul.f32 0.5, %v2958_v25 }
0x150b   :  { %v2973_v23 = vmul.f32 %v2970_v14, %v2968_v28 }
0x150c   :  { %v2960_v45 = vsub.f32 1.5, %v2959_v10 }
0x150d   :  { %v2978_v34 = vadd.f32 %v2975_v20, %v2973_v23 }
0x150e   :  { %v2961_v32 = vmul.f32 %v3557_v59, %v2960_v45 }
0x150f   :  { %2982 = vst.msk [vmem:[#allocation2 + $0x10] sm:$0xff] %vm296_vm1, %v2978_v34 }
0x1510   :  { %v2965_v19 = vsel %vm2964_vm15, %v3557_v59, %v2961_v32 }
0x1511   :  { %v2969_v62 = vmul.f32 %v2965_v19, %v4757_v39 }
0x1513   :  { %v2974_v43 = vmul.f32 %v2970_v14, %v2969_v62 }
0x1515   :  { %v2979_v40 = vadd.f32 %v2975_v20, %v2974_v43 }
0x1517   :  { %2983 = vst.msk [vmem:[#allocation2 + $0x18] sm:$0xff] %vm296_vm1, %v2979_v40 }
0x1518   :  { %2996 = dma.vmem_to_hbm [thread:$0]  %s2989_s4, 512, %s2991_s9, [#allocation3], %s3609_s29, %s3609_s29, %s3610_s14  }
0x1519   :  { %3590 = dma.done.wait [#allocation3], 512  }
0x151a   :  { %3591 = vsyncadd [#allocation3], 4294966784 }
0x151b   :  { %3001 = vsyncpa [#allocation3], 1 }

</bundles_post_ra>
